<compile_context>
chip_gen: v7x
topology: tpu7x:2x2x1
jax: 0.10.0
libtpu: 0.0.40
codegen_flags: <defaults>
</compile_context>

<pallas_src>
import functools

import jax
import jax.numpy as jnp
from jax.experimental import pallas as pl
from jax.experimental.pallas import tpu as pltpu


# ----------------------------------------------------------------------------
# In-kernel helpers (f32 elementwise)
# ----------------------------------------------------------------------------
def _gelu(x):
    c = 0.7978845608028654  # sqrt(2/pi)
    return 0.5 * x * (1.0 + jnp.tanh(c * (x + 0.044715 * x * x * x)))


def _layernorm(y, gamma, beta, eps=1e-5):
    mu = jnp.mean(y, axis=-1, keepdims=True)
    var = jnp.mean((y - mu) ** 2, axis=-1, keepdims=True)
    return (y - mu) * jax.lax.rsqrt(var + eps) * gamma + beta


# ----------------------------------------------------------------------------
# Pallas kernels (whole-array VMEM blocks; shapes here are tiny)
# ----------------------------------------------------------------------------
def _init_kernel(x_ref, w_ref, b_ref, o_ref):
    # initial_transform: Linear(word_dim -> D) + LayerNorm(D).
    # b_ref rows: 0 = bias, 1 = gamma, 2 = beta.
    x = x_ref[...].astype(jnp.bfloat16)
    y = jnp.dot(x, w_ref[...], preferred_element_type=jnp.float32) + b_ref[0:1, :]
    o_ref[...] = _layernorm(y, b_ref[1:2, :], b_ref[2:3, :])


def _step_kernel(l_ref, r_ref, w_ref, b_ref, out_ref):
    """Fused per-depth-step kernel.

    Inputs:
      l_ref, r_ref : (M, D) f32  left / right rows of every adjacent pair.
      w_ref        : (6D, 5D) bf16 weight slab
                     rows [0:2D]  = fused layer-1 [gc_w1 | dm_w1]
                     rows [2D:6D] = gate layer gc_w2 (cols [0:4D])
      b_ref        : (8, 5D) f32 slab
                     0: fused layer-1 bias [gc_b1 | dm_b1]   1: gc_b2
                     2: dm_w2 (VPU row)  3: LN gamma  4: LN beta  5: dm_b2
    Output:
      out_ref      : (M, >=D+1) f32 slab: [:, :D] = GRC output, [:, D] = logit.
    """
    M, D = l_ref.shape
    cell = 4 * D

    left = l_ref[...]
    right = r_ref[...]

    w1_l = w_ref[0:D, :]                       # (D, 5D)
    w1_r = w_ref[D:2 * D, :]                   # (D, 5D)
    w2 = w_ref[2 * D:2 * D + cell, 0:cell]     # (cell, 4D)

    b1 = b_ref[0:1, :]                         # (1, 5D) fused [gc_b1 | dm_b1]
    gc_b2 = b_ref[1:2, 0:cell]
    dm_w2 = b_ref[2:3, 0:D]
    gc_g = b_ref[3:4, 0:D]
    gc_be = b_ref[4:5, 0:D]
    dm_b2 = b_ref[5:6, 0:1]

    # --- fused layer 1 (shared LHS): one matmul pair, one bias, one GELU ----
    h = jnp.dot(left.astype(jnp.bfloat16), w1_l, preferred_element_type=jnp.float32)
    h = h + jnp.dot(right.astype(jnp.bfloat16), w1_r, preferred_element_type=jnp.float32)
    h = _gelu(h + b1)                          # (M, 5D)

    hg = h[:, 0:cell]                          # GRC hidden (lane-aligned 4D)
    hd = h[:, cell:cell + D]                   # decision hidden

    # --- decision logit: VPU multiply + lane reduction (no 1-col MXU pass) --
    logit = jnp.sum(hd * dm_w2, axis=-1, keepdims=True) + dm_b2     # (M, 1)

    # --- GRC gate layer: one (cell -> 4D) matmul, one sigmoid over 3D lanes -
    gates = jnp.dot(hg.astype(jnp.bfloat16), w2,
                    preferred_element_type=jnp.float32) + gc_b2     # (M, 4D)
    sig = jax.nn.sigmoid(gates[:, 0:3 * D])
    f1 = sig[:, 0:D]
    f2 = sig[:, D:2 * D]
    ig = sig[:, 2 * D:3 * D]
    par = gates[:, 3 * D:4 * D]

    z = f1 * left + f2 * right + ig * par
    out_ref[:, 0:D] = _layernorm(z, gc_g, gc_be)
    out_ref[:, D:D + 1] = logit


def _pcall(kernel, out_shape, *args):
    """Run `kernel` once (no grid) with every array as a full VMEM block."""
    vm = pltpu.MemorySpace.VMEM
    return pl.pallas_call(
        kernel,
        out_shape=out_shape,
        in_specs=[pl.BlockSpec(memory_space=vm) for _ in args],
        out_specs=pl.BlockSpec(memory_space=vm),
    )(*args)


def _ceil_to(x, m):
    return (x + m - 1) // m * m


# ----------------------------------------------------------------------------
# Thin wrappers around the kernels
# ----------------------------------------------------------------------------
def initial_transform(x2d, p):
    M = x2d.shape[0]
    D = p["it_w"].shape[1]
    return _pcall(_init_kernel, jax.ShapeDtypeStruct((M, D), jnp.float32),
                  x2d, p["it_w"], p["it_bias"])


def step_compute(l2d, r2d, p):
    """Decision logits + GRC outputs for M (left, right) row pairs."""
    M, D = l2d.shape
    W = _ceil_to(D + 1, 128)
    out = _pcall(_step_kernel, jax.ShapeDtypeStruct((M, W), jnp.float32),
                 l2d, r2d, p["w_slab"], p["b_slab"])
    return out[:, :D], out[:, D]


# ----------------------------------------------------------------------------
# Plain-JAX glue (beam bookkeeping)
# ----------------------------------------------------------------------------
def stochastic_topk(logits, mask, select_k):
    # eval-mode (training=False) deterministic top-k over masked logits.
    masked = logits + (1.0 - mask) * (-1e9)
    soft_scores = jax.nn.softmax(masked, axis=-1)
    _, idx = jax.lax.top_k(masked, select_k)                                  # (R, k)
    select_mask = jax.nn.one_hot(idx, logits.shape[-1], dtype=logits.dtype)   # (R, k, S)
    return select_mask, soft_scores


def select_composition(ocs, mask, accu_scores, beam_mask, p, beam_size):
    N, B, Sp1, D = ocs.shape
    S = Sp1 - 1
    l2d = ocs[:, :, :-1, :].reshape(N * B * S, D)
    r2d = ocs[:, :, 1:, :].reshape(N * B * S, D)

    # One fused kernel call: logits AND GRC outputs for all (beam, position)
    # pairs.  The later one-hot selection is an exact copy, so this matches
    # the reference's select-then-compose exactly.
    grc_all, logits = step_compute(l2d, r2d, p)
    comp = logits.reshape(N, B, S)
    grc_all = grc_all.reshape(N, B, S, D)

    topk = min(S, beam_size)
    logits2 = comp.reshape(N * B, S)
    mask_rep = jnp.broadcast_to(mask[:, None, :], (N, B, S)).reshape(N * B, S)
    select_mask, soft_scores = stochastic_topk(logits2, mask_rep, topk)

    soft_scores = soft_scores.reshape(N, B, 1, S)
    select_mask = select_mask.reshape(N, B, topk, S)
    new_scores = jnp.log(jnp.sum(select_mask * soft_scores, axis=-1) + 1e-20)  # (N,B,topk)

    done_mask = 1.0 - jnp.broadcast_to(mask[:, 0].reshape(N, 1, 1), (N, B, 1))
    if topk == 1:
        done_topk = jnp.ones((N, B, topk), jnp.float32)
    else:
        done_topk = jnp.concatenate(
            [jnp.ones((N, B, 1), jnp.float32),
             jnp.zeros((N, B, topk - 1), jnp.float32)], axis=-1)
    not_done_topk = jnp.ones((N, B, topk), jnp.float32)
    new_beam_mask = done_mask * done_topk + (1.0 - done_mask) * not_done_topk
    beam_mask = (beam_mask[:, :, None] * new_beam_mask).reshape(N, B * topk)
    accu_scores = (accu_scores[:, :, None] + new_scores).reshape(N, B * topk)

    select_mask = select_mask.reshape(N, B * topk, S)
    ocs_rep = jnp.broadcast_to(ocs[:, :, None],
                               (N, B, topk, Sp1, D)).reshape(N, B * topk, Sp1, D)
    grc_rep = jnp.broadcast_to(grc_all[:, :, None],
                               (N, B, topk, S, D)).reshape(N, B * topk, S, D)

    if B * topk > beam_size:
        B2 = beam_size
        beam_sel, _ = stochastic_topk(accu_scores, beam_mask, B2)      # (N, B2, B*topk)
        ocs_rep = jnp.matmul(beam_sel, ocs_rep.reshape(N, B * topk, -1)).reshape(N, B2, Sp1, D)
        grc_rep = jnp.matmul(beam_sel, grc_rep.reshape(N, B * topk, -1)).reshape(N, B2, S, D)
        select_mask = jnp.matmul(beam_sel, select_mask)
        accu_scores = jnp.matmul(beam_sel, accu_scores[..., None])[..., 0]
        beam_mask = jnp.matmul(beam_sel, beam_mask[..., None])[..., 0]
    else:
        B2 = B * topk

    # Gather the GRC output of the selected pair (exact one-hot copy).
    new_cs = jnp.matmul(select_mask[:, :, None, :], grc_rep)           # (N, B2, 1, D)

    olc = ocs_rep[:, :, :-1, :]
    orc = ocs_rep[:, :, 1:, :]
    sm_exp = select_mask[..., None]
    cum = jnp.cumsum(select_mask, axis=-1)
    left_mask = (1.0 - cum)[..., None]
    right_mask = (cum - select_mask)[..., None]
    new_cs = sm_exp * new_cs + left_mask * olc + right_mask * orc      # (N, B2, S, D)
    return ocs_rep, new_cs, accu_scores, beam_mask


def forward(params, inp, input_mask, *, beam_size):
    N, max_depth, word_dim = inp.shape
    length_mask = input_mask.astype(jnp.float32)

    cs = initial_transform(inp.reshape(N * max_depth, word_dim), params)
    D = cs.shape[-1]
    content_state = cs.reshape(N, max_depth, D)[:, None, :, :]         # (N, 1, S, D)
    accu_scores = jnp.zeros((N, 1), jnp.float32)
    beam_mask = jnp.ones((N, 1), jnp.float32)

    for i in range(max_depth - 1):
        B = content_state.shape[1]
        if i < max_depth - 2:
            old_cs, new_cs, accu_scores, beam_mask = select_composition(
                content_state, length_mask[:, i + 1:], accu_scores, beam_mask,
                params, beam_size)
        else:
            old_cs = content_state
            l2d = content_state[:, :, :-1, :].reshape(N * B, D)
            r2d = content_state[:, :, 1:, :].reshape(N * B, D)
            grc, _ = step_compute(l2d, r2d, params)   # decision logits unused here
            new_cs = grc.reshape(N, B, 1, D)
        done_mask = length_mask[:, i + 1].reshape(N, 1, 1, 1)
        content_state = done_mask * new_cs + (1.0 - done_mask) * old_cs[..., :-1, :]

    h = content_state[:, :, 0, :]                                      # (N, B, D)
    scores = beam_mask * accu_scores + (1.0 - beam_mask) * (-999999.0)
    normed_scores = jax.nn.softmax(scores, axis=-1)
    global_state = jnp.sum(normed_scores[..., None] * h, axis=1)       # (N, D)
    return {
        "sequence": inp,
        "global_state": global_state,
        "input_mask": input_mask[..., None],
        "aux_loss": None,
    }


# ----------------------------------------------------------------------------
# Deterministic parameter construction (MXU weights packed + pre-cast to bf16)
# ----------------------------------------------------------------------------
def make_params(key, word_dim, hidden):
    D = hidden
    cell = 4 * D
    w1_cols = cell + D                   # fused [gc_w1 | dm_w1] output width
    ks = jax.random.split(key, 10)
    nrm = lambda k, s: (0.1 * jax.random.normal(k, s)).astype(jnp.float32)

    it_w = nrm(ks[0], (word_dim, D))
    it_b = nrm(ks[1], (D,))

    # decision_module: Linear(2D, D) -> GELU -> Linear(D, 1)
    dm_w1 = nrm(ks[2], (2 * D, D))
    dm_b1 = nrm(ks[3], (D,))
    dm_w2 = nrm(ks[4], (D,))
    dm_b2 = nrm(ks[5], (1,))

    # GRC: Linear(2D, cell) -> GELU -> Linear(cell, 4D) -> gates -> LayerNorm(D)
    gc_w1 = nrm(ks[6], (2 * D, cell))
    gc_b1 = nrm(ks[7], (cell,))
    gc_w2 = nrm(ks[8], (cell, 4 * D))
    gc_b2 = nrm(ks[9], (4 * D,))
    gc_g = jnp.ones((D,), jnp.float32)
    gc_be = jnp.zeros((D,), jnp.float32)

    # bf16 MXU-weight slab: rows [0:2D] = fused layer-1 [gc_w1 | dm_w1],
    # rows [2D:6D] = gate layer gc_w2 padded to the same width.
    w1_fused = jnp.concatenate([gc_w1, dm_w1], axis=1)                  # (2D, 5D)
    w2_pad = jnp.pad(gc_w2, ((0, 0), (0, w1_cols - 4 * D)))             # (4D, 5D)
    w_slab = jnp.concatenate([w1_fused, w2_pad], axis=0).astype(jnp.bfloat16)

    # f32 bias / LN / VPU-vector slab, one row per parameter vector.
    def row(v):
        return jnp.pad(v, (0, w1_cols - v.shape[0]))[None, :]

    b_slab = jnp.concatenate([
        row(jnp.concatenate([gc_b1, dm_b1])),    # 0: fused layer-1 bias
        row(gc_b2),                              # 1: gate-layer bias
        row(dm_w2),                              # 2: decision output weights (VPU)
        row(gc_g),                               # 3: GRC LayerNorm gamma
        row(gc_be),                              # 4: GRC LayerNorm beta
        row(dm_b2),                              # 5: decision output bias (lane 0)
        jnp.zeros((2, w1_cols), jnp.float32),    # pad to 8 rows
    ], axis=0)

    it_bias = jnp.concatenate([
        it_b[None, :],                           # 0: bias
        jnp.ones((1, D), jnp.float32),           # 1: LayerNorm gamma
        jnp.zeros((1, D), jnp.float32),          # 2: LayerNorm beta
        jnp.zeros((5, D), jnp.float32),          # pad to 8 rows
    ], axis=0)

    return {"it_w": it_w.astype(jnp.bfloat16), "it_bias": it_bias,
            "w_slab": w_slab, "b_slab": b_slab}


# ----------------------------------------------------------------------------
if __name__ == "__main__":
    N, SEQ, WORD_DIM, HIDDEN, BEAM = 2, 8, 32, 32, 2

    key = jax.random.PRNGKey(0)
    k_par, k_inp = jax.random.split(key)
    params = make_params(k_par, WORD_DIM, HIDDEN)

    x = jax.random.normal(k_inp, (N, SEQ, WORD_DIM), dtype=jnp.float32)
    # sample 0: full length; sample 1: length 6 (last two positions padded)
    input_mask = jnp.array(
        [[1.0] * SEQ,
         [1.0] * 6 + [0.0] * (SEQ - 6)], dtype=jnp.float32)

    fwd = jax.jit(functools.partial(forward, beam_size=BEAM))
    out = fwd(params, x, input_mask)
    gs = jax.block_until_ready(out["global_state"])

    assert gs.shape == (N, HIDDEN)
    assert bool(jnp.all(jnp.isfinite(gs)))
    assert out["sequence"].shape == (N, SEQ, WORD_DIM)
    assert out["input_mask"].shape == (N, SEQ, 1)
    print("KERNEL_OK")
</pallas_src>

<mosaic_0001>
module attributes {stable_mosaic.version = 11 : i64} {
  func.func @_init_kernel(%arg0: memref<16x32xf32, #tpu.memory_space<vmem>>, %arg1: memref<32x32xbf16, #tpu.memory_space<vmem>>, %arg2: memref<8x32xf32, #tpu.memory_space<vmem>>, %arg3: memref<16x32xf32, #tpu.memory_space<vmem>>) attributes {dimension_semantics = [], scalar_prefetch = 0 : i64, scratch_operands = 0 : i64, tpu.core_type = #tpu.core_type<tc>} {
    %c0 = arith.constant 0 : index
    %c0_0 = arith.constant 0 : index
    %0 = vector.load %arg0[%c0, %c0_0] : memref<16x32xf32, #tpu.memory_space<vmem>>, vector<16x32xf32>
    %1 = arith.truncf %0 : vector<16x32xf32> to vector<16x32xbf16>
    %c0_1 = arith.constant 0 : index
    %c0_2 = arith.constant 0 : index
    %2 = vector.load %arg1[%c0_1, %c0_2] : memref<32x32xbf16, #tpu.memory_space<vmem>>, vector<32x32xbf16>
    %cst = arith.constant dense<0.000000e+00> : vector<16x32xf32>
    %3 = tpu.matmul %1, %2, %cst {dimension_numbers = #tpu.dot_dimension_numbers<[1], [0], [0], [1], [0, 0, 1, 1], [], []>} : vector<16x32xbf16>, vector<32x32xbf16>, vector<16x32xf32> -> vector<16x32xf32>
    %c0_3 = arith.constant 0 : index
    %c0_4 = arith.constant 0 : index
    %4 = vector.load %arg2[%c0_3, %c0_4] : memref<8x32xf32, #tpu.memory_space<vmem>>, vector<1x32xf32>
    %5 = vector.broadcast %4 : vector<1x32xf32> to vector<16x32xf32>
    %6 = arith.addf %3, %5 : vector<16x32xf32>
    %c1 = arith.constant 1 : index
    %c0_5 = arith.constant 0 : index
    %7 = vector.load %arg2[%c1, %c0_5] : memref<8x32xf32, #tpu.memory_space<vmem>>, vector<1x32xf32>
    %c2 = arith.constant 2 : index
    %c0_6 = arith.constant 0 : index
    %8 = vector.load %arg2[%c2, %c0_6] : memref<8x32xf32, #tpu.memory_space<vmem>>, vector<1x32xf32>
    %cst_7 = arith.constant dense<0.000000e+00> : vector<16xf32>
    %9 = vector.multi_reduction <add>, %6, %cst_7 [1] : vector<16x32xf32> to vector<16xf32>
    %10 = vector.shape_cast %9 : vector<16xf32> to vector<16x1xf32>
    %cst_8 = arith.constant 3.200000e+01 : f32
    %11 = vector.broadcast %cst_8 : f32 to vector<16x1xf32>
    %12 = arith.divf %10, %11 : vector<16x1xf32>
    %13 = vector.broadcast %12 : vector<16x1xf32> to vector<16x32xf32>
    %14 = arith.subf %6, %13 : vector<16x32xf32>
    %15 = arith.mulf %14, %14 : vector<16x32xf32>
    %cst_9 = arith.constant dense<0.000000e+00> : vector<16xf32>
    %16 = vector.multi_reduction <add>, %15, %cst_9 [1] : vector<16x32xf32> to vector<16xf32>
    %17 = vector.shape_cast %16 : vector<16xf32> to vector<16x1xf32>
    %cst_10 = arith.constant 3.200000e+01 : f32
    %18 = vector.broadcast %cst_10 : f32 to vector<16x1xf32>
    %19 = arith.divf %17, %18 : vector<16x1xf32>
    %20 = vector.broadcast %12 : vector<16x1xf32> to vector<16x32xf32>
    %21 = arith.subf %6, %20 : vector<16x32xf32>
    %cst_11 = arith.constant 9.99999974E-6 : f32
    %22 = vector.broadcast %cst_11 : f32 to vector<16x1xf32>
    %23 = arith.addf %19, %22 : vector<16x1xf32>
    %24 = math.rsqrt %23 : vector<16x1xf32>
    %25 = vector.broadcast %24 : vector<16x1xf32> to vector<16x32xf32>
    %26 = arith.mulf %21, %25 : vector<16x32xf32>
    %27 = vector.broadcast %7 : vector<1x32xf32> to vector<16x32xf32>
    %28 = arith.mulf %26, %27 : vector<16x32xf32>
    %29 = vector.broadcast %8 : vector<1x32xf32> to vector<16x32xf32>
    %30 = arith.addf %28, %29 : vector<16x32xf32>
    %c0_12 = arith.constant 0 : index
    %c0_13 = arith.constant 0 : index
    %31 = vector.load %arg3[%c0_12, %c0_13] : memref<16x32xf32, #tpu.memory_space<vmem>>, vector<16x32xf32>
    tpu.vector_store %arg3[%c0_12, %c0_13], %30 {strides = array<i32>} : memref<16x32xf32, #tpu.memory_space<vmem>>, vector<16x32xf32>,
    return
  }
}

module attributes {stable_mosaic.version = 11 : i64} {
  func.func @_step_kernel(%arg0: memref<14x32xf32, #tpu.memory_space<vmem>>, %arg1: memref<14x32xf32, #tpu.memory_space<vmem>>, %arg2: memref<192x160xbf16, #tpu.memory_space<vmem>>, %arg3: memref<8x160xf32, #tpu.memory_space<vmem>>, %arg4: memref<14x128xf32, #tpu.memory_space<vmem>>) attributes {dimension_semantics = [], scalar_prefetch = 0 : i64, scratch_operands = 0 : i64, tpu.core_type = #tpu.core_type<tc>} {
    %c0 = arith.constant 0 : index
    %c0_0 = arith.constant 0 : index
    %0 = vector.load %arg0[%c0, %c0_0] : memref<14x32xf32, #tpu.memory_space<vmem>>, vector<14x32xf32>
    %c0_1 = arith.constant 0 : index
    %c0_2 = arith.constant 0 : index
    %1 = vector.load %arg1[%c0_1, %c0_2] : memref<14x32xf32, #tpu.memory_space<vmem>>, vector<14x32xf32>
    %c0_3 = arith.constant 0 : index
    %c0_4 = arith.constant 0 : index
    %2 = vector.load %arg2[%c0_3, %c0_4] : memref<192x160xbf16, #tpu.memory_space<vmem>>, vector<32x160xbf16>
    %c32 = arith.constant 32 : index
    %c0_5 = arith.constant 0 : index
    %3 = vector.load %arg2[%c32, %c0_5] : memref<192x160xbf16, #tpu.memory_space<vmem>>, vector<32x160xbf16>
    %c64 = arith.constant 64 : index
    %c0_6 = arith.constant 0 : index
    %4 = vector.load %arg2[%c64, %c0_6] : memref<192x160xbf16, #tpu.memory_space<vmem>>, vector<128x128xbf16>
    %c0_7 = arith.constant 0 : index
    %c0_8 = arith.constant 0 : index
    %5 = vector.load %arg3[%c0_7, %c0_8] : memref<8x160xf32, #tpu.memory_space<vmem>>, vector<1x160xf32>
    %c1 = arith.constant 1 : index
    %c0_9 = arith.constant 0 : index
    %6 = vector.load %arg3[%c1, %c0_9] : memref<8x160xf32, #tpu.memory_space<vmem>>, vector<1x128xf32>
    %c2 = arith.constant 2 : index
    %c0_10 = arith.constant 0 : index
    %7 = vector.load %arg3[%c2, %c0_10] : memref<8x160xf32, #tpu.memory_space<vmem>>, vector<1x32xf32>
    %c3 = arith.constant 3 : index
    %c0_11 = arith.constant 0 : index
    %8 = vector.load %arg3[%c3, %c0_11] : memref<8x160xf32, #tpu.memory_space<vmem>>, vector<1x32xf32>
    %c4 = arith.constant 4 : index
    %c0_12 = arith.constant 0 : index
    %9 = vector.load %arg3[%c4, %c0_12] : memref<8x160xf32, #tpu.memory_space<vmem>>, vector<1x32xf32>
    %c5 = arith.constant 5 : index
    %c0_13 = arith.constant 0 : index
    %10 = vector.load %arg3[%c5, %c0_13] : memref<8x160xf32, #tpu.memory_space<vmem>>, vector<1x1xf32>
    %11 = arith.truncf %0 : vector<14x32xf32> to vector<14x32xbf16>
    %cst = arith.constant dense<0.000000e+00> : vector<14x160xf32>
    %12 = tpu.matmul %11, %2, %cst {dimension_numbers = #tpu.dot_dimension_numbers<[1], [0], [0], [1], [0, 0, 1, 1], [], []>} : vector<14x32xbf16>, vector<32x160xbf16>, vector<14x160xf32> -> vector<14x160xf32>
    %13 = arith.truncf %1 : vector<14x32xf32> to vector<14x32xbf16>
    %cst_14 = arith.constant dense<0.000000e+00> : vector<14x160xf32>
    %14 = tpu.matmul %13, %3, %cst_14 {dimension_numbers = #tpu.dot_dimension_numbers<[1], [0], [0], [1], [0, 0, 1, 1], [], []>} : vector<14x32xbf16>, vector<32x160xbf16>, vector<14x160xf32> -> vector<14x160xf32>
    %15 = arith.addf %12, %14 : vector<14x160xf32>
    %16 = vector.broadcast %5 : vector<1x160xf32> to vector<14x160xf32>
    %17 = arith.addf %15, %16 : vector<14x160xf32>
    %cst_15 = arith.constant 5.000000e-01 : f32
    %18 = vector.broadcast %cst_15 : f32 to vector<14x160xf32>
    %19 = arith.mulf %18, %17 : vector<14x160xf32>
    %cst_16 = arith.constant 4.471500e-02 : f32
    %20 = vector.broadcast %cst_16 : f32 to vector<14x160xf32>
    %21 = arith.mulf %20, %17 : vector<14x160xf32>
    %22 = arith.mulf %21, %17 : vector<14x160xf32>
    %23 = arith.mulf %22, %17 : vector<14x160xf32>
    %24 = arith.addf %17, %23 : vector<14x160xf32>
    %cst_17 = arith.constant 0.797884583 : f32
    %25 = vector.broadcast %cst_17 : f32 to vector<14x160xf32>
    %26 = arith.mulf %25, %24 : vector<14x160xf32>
    %27 = math.tanh %26 : vector<14x160xf32>
    %cst_18 = arith.constant 1.000000e+00 : f32
    %28 = vector.broadcast %cst_18 : f32 to vector<14x160xf32>
    %29 = arith.addf %28, %27 : vector<14x160xf32>
    %30 = arith.mulf %19, %29 : vector<14x160xf32>
    %31 = vector.extract_strided_slice %30 {offsets = [0, 0], sizes = [14, 128], strides = [1, 1]} : vector<14x160xf32> to vector<14x128xf32>
    %32 = vector.extract_strided_slice %30 {offsets = [0, 128], sizes = [14, 32], strides = [1, 1]} : vector<14x160xf32> to vector<14x32xf32>
    %33 = vector.broadcast %7 : vector<1x32xf32> to vector<14x32xf32>
    %34 = arith.mulf %32, %33 : vector<14x32xf32>
    %cst_19 = arith.constant dense<0.000000e+00> : vector<14xf32>
    %35 = vector.multi_reduction <add>, %34, %cst_19 [1] : vector<14x32xf32> to vector<14xf32>
    %36 = vector.shape_cast %35 : vector<14xf32> to vector<14x1xf32>
    %37 = vector.broadcast %10 : vector<1x1xf32> to vector<14x1xf32>
    %38 = arith.addf %36, %37 : vector<14x1xf32>
    %39 = arith.truncf %31 : vector<14x128xf32> to vector<14x128xbf16>
    %cst_20 = arith.constant dense<0.000000e+00> : vector<14x128xf32>
    %40 = tpu.matmul %39, %4, %cst_20 {dimension_numbers = #tpu.dot_dimension_numbers<[1], [0], [0], [1], [0, 0, 1, 1], [], []>} : vector<14x128xbf16>, vector<128x128xbf16>, vector<14x128xf32> -> vector<14x128xf32>
    %41 = vector.broadcast %6 : vector<1x128xf32> to vector<14x128xf32>
    %42 = arith.addf %40, %41 : vector<14x128xf32>
    %43 = vector.extract_strided_slice %42 {offsets = [0, 0], sizes = [14, 96], strides = [1, 1]} : vector<14x128xf32> to vector<14x96xf32>
    %44 = arith.negf %43 : vector<14x96xf32>
    %45 = math.exp %44 : vector<14x96xf32>
    %cst_21 = arith.constant 1.000000e+00 : f32
    %46 = vector.broadcast %cst_21 : f32 to vector<14x96xf32>
    %47 = arith.addf %46, %45 : vector<14x96xf32>
    %48 = arith.divf %46, %47 : vector<14x96xf32>
    %49 = vector.extract_strided_slice %48 {offsets = [0, 0], sizes = [14, 32], strides = [1, 1]} : vector<14x96xf32> to vector<14x32xf32>
    %50 = vector.extract_strided_slice %48 {offsets = [0, 32], sizes = [14, 32], strides = [1, 1]} : vector<14x96xf32> to vector<14x32xf32>
    %51 = vector.extract_strided_slice %48 {offsets = [0, 64], sizes = [14, 32], strides = [1, 1]} : vector<14x96xf32> to vector<14x32xf32>
    %52 = vector.extract_strided_slice %42 {offsets = [0, 96], sizes = [14, 32], strides = [1, 1]} : vector<14x128xf32> to vector<14x32xf32>
    %53 = arith.mulf %49, %0 : vector<14x32xf32>
    %54 = arith.mulf %50, %1 : vector<14x32xf32>
    %55 = arith.addf %53, %54 : vector<14x32xf32>
    %56 = arith.mulf %51, %52 : vector<14x32xf32>
    %57 = arith.addf %55, %56 : vector<14x32xf32>
    %cst_22 = arith.constant dense<0.000000e+00> : vector<14xf32>
    %58 = vector.multi_reduction <add>, %57, %cst_22 [1] : vector<14x32xf32> to vector<14xf32>
    %59 = vector.shape_cast %58 : vector<14xf32> to vector<14x1xf32>
    %cst_23 = arith.constant 3.200000e+01 : f32
    %60 = vector.broadcast %cst_23 : f32 to vector<14x1xf32>
    %61 = arith.divf %59, %60 : vector<14x1xf32>
    %62 = vector.broadcast %61 : vector<14x1xf32> to vector<14x32xf32>
    %63 = arith.subf %57, %62 : vector<14x32xf32>
    %64 = arith.mulf %63, %63 : vector<14x32xf32>
    %cst_24 = arith.constant dense<0.000000e+00> : vector<14xf32>
    %65 = vector.multi_reduction <add>, %64, %cst_24 [1] : vector<14x32xf32> to vector<14xf32>
    %66 = vector.shape_cast %65 : vector<14xf32> to vector<14x1xf32>
    %cst_25 = arith.constant 3.200000e+01 : f32
    %67 = vector.broadcast %cst_25 : f32 to vector<14x1xf32>
    %68 = arith.divf %66, %67 : vector<14x1xf32>
    %69 = vector.broadcast %61 : vector<14x1xf32> to vector<14x32xf32>
    %70 = arith.subf %57, %69 : vector<14x32xf32>
    %cst_26 = arith.constant 9.99999974E-6 : f32
    %71 = vector.broadcast %cst_26 : f32 to vector<14x1xf32>
    %72 = arith.addf %68, %71 : vector<14x1xf32>
    %73 = math.rsqrt %72 : vector<14x1xf32>
    %74 = vector.broadcast %73 : vector<14x1xf32> to vector<14x32xf32>
    %75 = arith.mulf %70, %74 : vector<14x32xf32>
    %76 = vector.broadcast %8 : vector<1x32xf32> to vector<14x32xf32>
    %77 = arith.mulf %75, %76 : vector<14x32xf32>
    %78 = vector.broadcast %9 : vector<1x32xf32> to vector<14x32xf32>
    %79 = arith.addf %77, %78 : vector<14x32xf32>
    %c0_27 = arith.constant 0 : index
    %c0_28 = arith.constant 0 : index
    %80 = vector.load %arg4[%c0_27, %c0_28] : memref<14x128xf32, #tpu.memory_space<vmem>>, vector<14x32xf32>
    tpu.vector_store %arg4[%c0_27, %c0_28], %79 {strides = array<i32>} : memref<14x128xf32, #tpu.memory_space<vmem>>, vector<14x32xf32>,
    %c0_29 = arith.constant 0 : index
    %c32_30 = arith.constant 32 : index
    %81 = vector.load %arg4[%c0_29, %c32_30] : memref<14x128xf32, #tpu.memory_space<vmem>>, vector<14x1xf32>
    tpu.vector_store %arg4[%c0_29, %c32_30], %38 {strides = array<i32>} : memref<14x128xf32, #tpu.memory_space<vmem>>, vector<14x1xf32>,
    return
  }
}

module attributes {stable_mosaic.version = 11 : i64} {
  func.func @_step_kernel(%arg0: memref<24x32xf32, #tpu.memory_space<vmem>>, %arg1: memref<24x32xf32, #tpu.memory_space<vmem>>, %arg2: memref<192x160xbf16, #tpu.memory_space<vmem>>, %arg3: memref<8x160xf32, #tpu.memory_space<vmem>>, %arg4: memref<24x128xf32, #tpu.memory_space<vmem>>) attributes {dimension_semantics = [], scalar_prefetch = 0 : i64, scratch_operands = 0 : i64, tpu.core_type = #tpu.core_type<tc>} {
    %c0 = arith.constant 0 : index
    %c0_0 = arith.constant 0 : index
    %0 = vector.load %arg0[%c0, %c0_0] : memref<24x32xf32, #tpu.memory_space<vmem>>, vector<24x32xf32>
    %c0_1 = arith.constant 0 : index
    %c0_2 = arith.constant 0 : index
    %1 = vector.load %arg1[%c0_1, %c0_2] : memref<24x32xf32, #tpu.memory_space<vmem>>, vector<24x32xf32>
    %c0_3 = arith.constant 0 : index
    %c0_4 = arith.constant 0 : index
    %2 = vector.load %arg2[%c0_3, %c0_4] : memref<192x160xbf16, #tpu.memory_space<vmem>>, vector<32x160xbf16>
    %c32 = arith.constant 32 : index
    %c0_5 = arith.constant 0 : index
    %3 = vector.load %arg2[%c32, %c0_5] : memref<192x160xbf16, #tpu.memory_space<vmem>>, vector<32x160xbf16>
    %c64 = arith.constant 64 : index
    %c0_6 = arith.constant 0 : index
    %4 = vector.load %arg2[%c64, %c0_6] : memref<192x160xbf16, #tpu.memory_space<vmem>>, vector<128x128xbf16>
    %c0_7 = arith.constant 0 : index
    %c0_8 = arith.constant 0 : index
    %5 = vector.load %arg3[%c0_7, %c0_8] : memref<8x160xf32, #tpu.memory_space<vmem>>, vector<1x160xf32>
    %c1 = arith.constant 1 : index
    %c0_9 = arith.constant 0 : index
    %6 = vector.load %arg3[%c1, %c0_9] : memref<8x160xf32, #tpu.memory_space<vmem>>, vector<1x128xf32>
    %c2 = arith.constant 2 : index
    %c0_10 = arith.constant 0 : index
    %7 = vector.load %arg3[%c2, %c0_10] : memref<8x160xf32, #tpu.memory_space<vmem>>, vector<1x32xf32>
    %c3 = arith.constant 3 : index
    %c0_11 = arith.constant 0 : index
    %8 = vector.load %arg3[%c3, %c0_11] : memref<8x160xf32, #tpu.memory_space<vmem>>, vector<1x32xf32>
    %c4 = arith.constant 4 : index
    %c0_12 = arith.constant 0 : index
    %9 = vector.load %arg3[%c4, %c0_12] : memref<8x160xf32, #tpu.memory_space<vmem>>, vector<1x32xf32>
    %c5 = arith.constant 5 : index
    %c0_13 = arith.constant 0 : index
    %10 = vector.load %arg3[%c5, %c0_13] : memref<8x160xf32, #tpu.memory_space<vmem>>, vector<1x1xf32>
    %11 = arith.truncf %0 : vector<24x32xf32> to vector<24x32xbf16>
    %cst = arith.constant dense<0.000000e+00> : vector<24x160xf32>
    %12 = tpu.matmul %11, %2, %cst {dimension_numbers = #tpu.dot_dimension_numbers<[1], [0], [0], [1], [0, 0, 1, 1], [], []>} : vector<24x32xbf16>, vector<32x160xbf16>, vector<24x160xf32> -> vector<24x160xf32>
    %13 = arith.truncf %1 : vector<24x32xf32> to vector<24x32xbf16>
    %cst_14 = arith.constant dense<0.000000e+00> : vector<24x160xf32>
    %14 = tpu.matmul %13, %3, %cst_14 {dimension_numbers = #tpu.dot_dimension_numbers<[1], [0], [0], [1], [0, 0, 1, 1], [], []>} : vector<24x32xbf16>, vector<32x160xbf16>, vector<24x160xf32> -> vector<24x160xf32>
    %15 = arith.addf %12, %14 : vector<24x160xf32>
    %16 = vector.broadcast %5 : vector<1x160xf32> to vector<24x160xf32>
    %17 = arith.addf %15, %16 : vector<24x160xf32>
    %cst_15 = arith.constant 5.000000e-01 : f32
    %18 = vector.broadcast %cst_15 : f32 to vector<24x160xf32>
    %19 = arith.mulf %18, %17 : vector<24x160xf32>
    %cst_16 = arith.constant 4.471500e-02 : f32
    %20 = vector.broadcast %cst_16 : f32 to vector<24x160xf32>
    %21 = arith.mulf %20, %17 : vector<24x160xf32>
    %22 = arith.mulf %21, %17 : vector<24x160xf32>
    %23 = arith.mulf %22, %17 : vector<24x160xf32>
    %24 = arith.addf %17, %23 : vector<24x160xf32>
    %cst_17 = arith.constant 0.797884583 : f32
    %25 = vector.broadcast %cst_17 : f32 to vector<24x160xf32>
    %26 = arith.mulf %25, %24 : vector<24x160xf32>
    %27 = math.tanh %26 : vector<24x160xf32>
    %cst_18 = arith.constant 1.000000e+00 : f32
    %28 = vector.broadcast %cst_18 : f32 to vector<24x160xf32>
    %29 = arith.addf %28, %27 : vector<24x160xf32>
    %30 = arith.mulf %19, %29 : vector<24x160xf32>
    %31 = vector.extract_strided_slice %30 {offsets = [0, 0], sizes = [24, 128], strides = [1, 1]} : vector<24x160xf32> to vector<24x128xf32>
    %32 = vector.extract_strided_slice %30 {offsets = [0, 128], sizes = [24, 32], strides = [1, 1]} : vector<24x160xf32> to vector<24x32xf32>
    %33 = vector.broadcast %7 : vector<1x32xf32> to vector<24x32xf32>
    %34 = arith.mulf %32, %33 : vector<24x32xf32>
    %cst_19 = arith.constant dense<0.000000e+00> : vector<24xf32>
    %35 = vector.multi_reduction <add>, %34, %cst_19 [1] : vector<24x32xf32> to vector<24xf32>
    %36 = vector.shape_cast %35 : vector<24xf32> to vector<24x1xf32>
    %37 = vector.broadcast %10 : vector<1x1xf32> to vector<24x1xf32>
    %38 = arith.addf %36, %37 : vector<24x1xf32>
    %39 = arith.truncf %31 : vector<24x128xf32> to vector<24x128xbf16>
    %cst_20 = arith.constant dense<0.000000e+00> : vector<24x128xf32>
    %40 = tpu.matmul %39, %4, %cst_20 {dimension_numbers = #tpu.dot_dimension_numbers<[1], [0], [0], [1], [0, 0, 1, 1], [], []>} : vector<24x128xbf16>, vector<128x128xbf16>, vector<24x128xf32> -> vector<24x128xf32>
    %41 = vector.broadcast %6 : vector<1x128xf32> to vector<24x128xf32>
    %42 = arith.addf %40, %41 : vector<24x128xf32>
    %43 = vector.extract_strided_slice %42 {offsets = [0, 0], sizes = [24, 96], strides = [1, 1]} : vector<24x128xf32> to vector<24x96xf32>
    %44 = arith.negf %43 : vector<24x96xf32>
    %45 = math.exp %44 : vector<24x96xf32>
    %cst_21 = arith.constant 1.000000e+00 : f32
    %46 = vector.broadcast %cst_21 : f32 to vector<24x96xf32>
    %47 = arith.addf %46, %45 : vector<24x96xf32>
    %48 = arith.divf %46, %47 : vector<24x96xf32>
    %49 = vector.extract_strided_slice %48 {offsets = [0, 0], sizes = [24, 32], strides = [1, 1]} : vector<24x96xf32> to vector<24x32xf32>
    %50 = vector.extract_strided_slice %48 {offsets = [0, 32], sizes = [24, 32], strides = [1, 1]} : vector<24x96xf32> to vector<24x32xf32>
    %51 = vector.extract_strided_slice %48 {offsets = [0, 64], sizes = [24, 32], strides = [1, 1]} : vector<24x96xf32> to vector<24x32xf32>
    %52 = vector.extract_strided_slice %42 {offsets = [0, 96], sizes = [24, 32], strides = [1, 1]} : vector<24x128xf32> to vector<24x32xf32>
    %53 = arith.mulf %49, %0 : vector<24x32xf32>
    %54 = arith.mulf %50, %1 : vector<24x32xf32>
    %55 = arith.addf %53, %54 : vector<24x32xf32>
    %56 = arith.mulf %51, %52 : vector<24x32xf32>
    %57 = arith.addf %55, %56 : vector<24x32xf32>
    %cst_22 = arith.constant dense<0.000000e+00> : vector<24xf32>
    %58 = vector.multi_reduction <add>, %57, %cst_22 [1] : vector<24x32xf32> to vector<24xf32>
    %59 = vector.shape_cast %58 : vector<24xf32> to vector<24x1xf32>
    %cst_23 = arith.constant 3.200000e+01 : f32
    %60 = vector.broadcast %cst_23 : f32 to vector<24x1xf32>
    %61 = arith.divf %59, %60 : vector<24x1xf32>
    %62 = vector.broadcast %61 : vector<24x1xf32> to vector<24x32xf32>
    %63 = arith.subf %57, %62 : vector<24x32xf32>
    %64 = arith.mulf %63, %63 : vector<24x32xf32>
    %cst_24 = arith.constant dense<0.000000e+00> : vector<24xf32>
    %65 = vector.multi_reduction <add>, %64, %cst_24 [1] : vector<24x32xf32> to vector<24xf32>
    %66 = vector.shape_cast %65 : vector<24xf32> to vector<24x1xf32>
    %cst_25 = arith.constant 3.200000e+01 : f32
    %67 = vector.broadcast %cst_25 : f32 to vector<24x1xf32>
    %68 = arith.divf %66, %67 : vector<24x1xf32>
    %69 = vector.broadcast %61 : vector<24x1xf32> to vector<24x32xf32>
    %70 = arith.subf %57, %69 : vector<24x32xf32>
    %cst_26 = arith.constant 9.99999974E-6 : f32
    %71 = vector.broadcast %cst_26 : f32 to vector<24x1xf32>
    %72 = arith.addf %68, %71 : vector<24x1xf32>
    %73 = math.rsqrt %72 : vector<24x1xf32>
    %74 = vector.broadcast %73 : vector<24x1xf32> to vector<24x32xf32>
    %75 = arith.mulf %70, %74 : vector<24x32xf32>
    %76 = vector.broadcast %8 : vector<1x32xf32> to vector<24x32xf32>
    %77 = arith.mulf %75, %76 : vector<24x32xf32>
    %78 = vector.broadcast %9 : vector<1x32xf32> to vector<24x32xf32>
    %79 = arith.addf %77, %78 : vector<24x32xf32>
    %c0_27 = arith.constant 0 : index
    %c0_28 = arith.constant 0 : index
    %80 = vector.load %arg4[%c0_27, %c0_28] : memref<24x128xf32, #tpu.memory_space<vmem>>, vector<24x32xf32>
    tpu.vector_store %arg4[%c0_27, %c0_28], %79 {strides = array<i32>} : memref<24x128xf32, #tpu.memory_space<vmem>>, vector<24x32xf32>,
    %c0_29 = arith.constant 0 : index
    %c32_30 = arith.constant 32 : index
    %81 = vector.load %arg4[%c0_29, %c32_30] : memref<24x128xf32, #tpu.memory_space<vmem>>, vector<24x1xf32>
    tpu.vector_store %arg4[%c0_29, %c32_30], %38 {strides = array<i32>} : memref<24x128xf32, #tpu.memory_space<vmem>>, vector<24x1xf32>,
    return
  }
}

module attributes {stable_mosaic.version = 11 : i64} {
  func.func @_step_kernel(%arg0: memref<20x32xf32, #tpu.memory_space<vmem>>, %arg1: memref<20x32xf32, #tpu.memory_space<vmem>>, %arg2: memref<192x160xbf16, #tpu.memory_space<vmem>>, %arg3: memref<8x160xf32, #tpu.memory_space<vmem>>, %arg4: memref<20x128xf32, #tpu.memory_space<vmem>>) attributes {dimension_semantics = [], scalar_prefetch = 0 : i64, scratch_operands = 0 : i64, tpu.core_type = #tpu.core_type<tc>} {
    %c0 = arith.constant 0 : index
    %c0_0 = arith.constant 0 : index
    %0 = vector.load %arg0[%c0, %c0_0] : memref<20x32xf32, #tpu.memory_space<vmem>>, vector<20x32xf32>
    %c0_1 = arith.constant 0 : index
    %c0_2 = arith.constant 0 : index
    %1 = vector.load %arg1[%c0_1, %c0_2] : memref<20x32xf32, #tpu.memory_space<vmem>>, vector<20x32xf32>
    %c0_3 = arith.constant 0 : index
    %c0_4 = arith.constant 0 : index
    %2 = vector.load %arg2[%c0_3, %c0_4] : memref<192x160xbf16, #tpu.memory_space<vmem>>, vector<32x160xbf16>
    %c32 = arith.constant 32 : index
    %c0_5 = arith.constant 0 : index
    %3 = vector.load %arg2[%c32, %c0_5] : memref<192x160xbf16, #tpu.memory_space<vmem>>, vector<32x160xbf16>
    %c64 = arith.constant 64 : index
    %c0_6 = arith.constant 0 : index
    %4 = vector.load %arg2[%c64, %c0_6] : memref<192x160xbf16, #tpu.memory_space<vmem>>, vector<128x128xbf16>
    %c0_7 = arith.constant 0 : index
    %c0_8 = arith.constant 0 : index
    %5 = vector.load %arg3[%c0_7, %c0_8] : memref<8x160xf32, #tpu.memory_space<vmem>>, vector<1x160xf32>
    %c1 = arith.constant 1 : index
    %c0_9 = arith.constant 0 : index
    %6 = vector.load %arg3[%c1, %c0_9] : memref<8x160xf32, #tpu.memory_space<vmem>>, vector<1x128xf32>
    %c2 = arith.constant 2 : index
    %c0_10 = arith.constant 0 : index
    %7 = vector.load %arg3[%c2, %c0_10] : memref<8x160xf32, #tpu.memory_space<vmem>>, vector<1x32xf32>
    %c3 = arith.constant 3 : index
    %c0_11 = arith.constant 0 : index
    %8 = vector.load %arg3[%c3, %c0_11] : memref<8x160xf32, #tpu.memory_space<vmem>>, vector<1x32xf32>
    %c4 = arith.constant 4 : index
    %c0_12 = arith.constant 0 : index
    %9 = vector.load %arg3[%c4, %c0_12] : memref<8x160xf32, #tpu.memory_space<vmem>>, vector<1x32xf32>
    %c5 = arith.constant 5 : index
    %c0_13 = arith.constant 0 : index
    %10 = vector.load %arg3[%c5, %c0_13] : memref<8x160xf32, #tpu.memory_space<vmem>>, vector<1x1xf32>
    %11 = arith.truncf %0 : vector<20x32xf32> to vector<20x32xbf16>
    %cst = arith.constant dense<0.000000e+00> : vector<20x160xf32>
    %12 = tpu.matmul %11, %2, %cst {dimension_numbers = #tpu.dot_dimension_numbers<[1], [0], [0], [1], [0, 0, 1, 1], [], []>} : vector<20x32xbf16>, vector<32x160xbf16>, vector<20x160xf32> -> vector<20x160xf32>
    %13 = arith.truncf %1 : vector<20x32xf32> to vector<20x32xbf16>
    %cst_14 = arith.constant dense<0.000000e+00> : vector<20x160xf32>
    %14 = tpu.matmul %13, %3, %cst_14 {dimension_numbers = #tpu.dot_dimension_numbers<[1], [0], [0], [1], [0, 0, 1, 1], [], []>} : vector<20x32xbf16>, vector<32x160xbf16>, vector<20x160xf32> -> vector<20x160xf32>
    %15 = arith.addf %12, %14 : vector<20x160xf32>
    %16 = vector.broadcast %5 : vector<1x160xf32> to vector<20x160xf32>
    %17 = arith.addf %15, %16 : vector<20x160xf32>
    %cst_15 = arith.constant 5.000000e-01 : f32
    %18 = vector.broadcast %cst_15 : f32 to vector<20x160xf32>
    %19 = arith.mulf %18, %17 : vector<20x160xf32>
    %cst_16 = arith.constant 4.471500e-02 : f32
    %20 = vector.broadcast %cst_16 : f32 to vector<20x160xf32>
    %21 = arith.mulf %20, %17 : vector<20x160xf32>
    %22 = arith.mulf %21, %17 : vector<20x160xf32>
    %23 = arith.mulf %22, %17 : vector<20x160xf32>
    %24 = arith.addf %17, %23 : vector<20x160xf32>
    %cst_17 = arith.constant 0.797884583 : f32
    %25 = vector.broadcast %cst_17 : f32 to vector<20x160xf32>
    %26 = arith.mulf %25, %24 : vector<20x160xf32>
    %27 = math.tanh %26 : vector<20x160xf32>
    %cst_18 = arith.constant 1.000000e+00 : f32
    %28 = vector.broadcast %cst_18 : f32 to vector<20x160xf32>
    %29 = arith.addf %28, %27 : vector<20x160xf32>
    %30 = arith.mulf %19, %29 : vector<20x160xf32>
    %31 = vector.extract_strided_slice %30 {offsets = [0, 0], sizes = [20, 128], strides = [1, 1]} : vector<20x160xf32> to vector<20x128xf32>
    %32 = vector.extract_strided_slice %30 {offsets = [0, 128], sizes = [20, 32], strides = [1, 1]} : vector<20x160xf32> to vector<20x32xf32>
    %33 = vector.broadcast %7 : vector<1x32xf32> to vector<20x32xf32>
    %34 = arith.mulf %32, %33 : vector<20x32xf32>
    %cst_19 = arith.constant dense<0.000000e+00> : vector<20xf32>
    %35 = vector.multi_reduction <add>, %34, %cst_19 [1] : vector<20x32xf32> to vector<20xf32>
    %36 = vector.shape_cast %35 : vector<20xf32> to vector<20x1xf32>
    %37 = vector.broadcast %10 : vector<1x1xf32> to vector<20x1xf32>
    %38 = arith.addf %36, %37 : vector<20x1xf32>
    %39 = arith.truncf %31 : vector<20x128xf32> to vector<20x128xbf16>
    %cst_20 = arith.constant dense<0.000000e+00> : vector<20x128xf32>
    %40 = tpu.matmul %39, %4, %cst_20 {dimension_numbers = #tpu.dot_dimension_numbers<[1], [0], [0], [1], [0, 0, 1, 1], [], []>} : vector<20x128xbf16>, vector<128x128xbf16>, vector<20x128xf32> -> vector<20x128xf32>
    %41 = vector.broadcast %6 : vector<1x128xf32> to vector<20x128xf32>
    %42 = arith.addf %40, %41 : vector<20x128xf32>
    %43 = vector.extract_strided_slice %42 {offsets = [0, 0], sizes = [20, 96], strides = [1, 1]} : vector<20x128xf32> to vector<20x96xf32>
    %44 = arith.negf %43 : vector<20x96xf32>
    %45 = math.exp %44 : vector<20x96xf32>
    %cst_21 = arith.constant 1.000000e+00 : f32
    %46 = vector.broadcast %cst_21 : f32 to vector<20x96xf32>
    %47 = arith.addf %46, %45 : vector<20x96xf32>
    %48 = arith.divf %46, %47 : vector<20x96xf32>
    %49 = vector.extract_strided_slice %48 {offsets = [0, 0], sizes = [20, 32], strides = [1, 1]} : vector<20x96xf32> to vector<20x32xf32>
    %50 = vector.extract_strided_slice %48 {offsets = [0, 32], sizes = [20, 32], strides = [1, 1]} : vector<20x96xf32> to vector<20x32xf32>
    %51 = vector.extract_strided_slice %48 {offsets = [0, 64], sizes = [20, 32], strides = [1, 1]} : vector<20x96xf32> to vector<20x32xf32>
    %52 = vector.extract_strided_slice %42 {offsets = [0, 96], sizes = [20, 32], strides = [1, 1]} : vector<20x128xf32> to vector<20x32xf32>
    %53 = arith.mulf %49, %0 : vector<20x32xf32>
    %54 = arith.mulf %50, %1 : vector<20x32xf32>
    %55 = arith.addf %53, %54 : vector<20x32xf32>
    %56 = arith.mulf %51, %52 : vector<20x32xf32>
    %57 = arith.addf %55, %56 : vector<20x32xf32>
    %cst_22 = arith.constant dense<0.000000e+00> : vector<20xf32>
    %58 = vector.multi_reduction <add>, %57, %cst_22 [1] : vector<20x32xf32> to vector<20xf32>
    %59 = vector.shape_cast %58 : vector<20xf32> to vector<20x1xf32>
    %cst_23 = arith.constant 3.200000e+01 : f32
    %60 = vector.broadcast %cst_23 : f32 to vector<20x1xf32>
    %61 = arith.divf %59, %60 : vector<20x1xf32>
    %62 = vector.broadcast %61 : vector<20x1xf32> to vector<20x32xf32>
    %63 = arith.subf %57, %62 : vector<20x32xf32>
    %64 = arith.mulf %63, %63 : vector<20x32xf32>
    %cst_24 = arith.constant dense<0.000000e+00> : vector<20xf32>
    %65 = vector.multi_reduction <add>, %64, %cst_24 [1] : vector<20x32xf32> to vector<20xf32>
    %66 = vector.shape_cast %65 : vector<20xf32> to vector<20x1xf32>
    %cst_25 = arith.constant 3.200000e+01 : f32
    %67 = vector.broadcast %cst_25 : f32 to vector<20x1xf32>
    %68 = arith.divf %66, %67 : vector<20x1xf32>
    %69 = vector.broadcast %61 : vector<20x1xf32> to vector<20x32xf32>
    %70 = arith.subf %57, %69 : vector<20x32xf32>
    %cst_26 = arith.constant 9.99999974E-6 : f32
    %71 = vector.broadcast %cst_26 : f32 to vector<20x1xf32>
    %72 = arith.addf %68, %71 : vector<20x1xf32>
    %73 = math.rsqrt %72 : vector<20x1xf32>
    %74 = vector.broadcast %73 : vector<20x1xf32> to vector<20x32xf32>
    %75 = arith.mulf %70, %74 : vector<20x32xf32>
    %76 = vector.broadcast %8 : vector<1x32xf32> to vector<20x32xf32>
    %77 = arith.mulf %75, %76 : vector<20x32xf32>
    %78 = vector.broadcast %9 : vector<1x32xf32> to vector<20x32xf32>
    %79 = arith.addf %77, %78 : vector<20x32xf32>
    %c0_27 = arith.constant 0 : index
    %c0_28 = arith.constant 0 : index
    %80 = vector.load %arg4[%c0_27, %c0_28] : memref<20x128xf32, #tpu.memory_space<vmem>>, vector<20x32xf32>
    tpu.vector_store %arg4[%c0_27, %c0_28], %79 {strides = array<i32>} : memref<20x128xf32, #tpu.memory_space<vmem>>, vector<20x32xf32>,
    %c0_29 = arith.constant 0 : index
    %c32_30 = arith.constant 32 : index
    %81 = vector.load %arg4[%c0_29, %c32_30] : memref<20x128xf32, #tpu.memory_space<vmem>>, vector<20x1xf32>
    tpu.vector_store %arg4[%c0_29, %c32_30], %38 {strides = array<i32>} : memref<20x128xf32, #tpu.memory_space<vmem>>, vector<20x1xf32>,
    return
  }
}

module attributes {stable_mosaic.version = 11 : i64} {
  func.func @_step_kernel(%arg0: memref<16x32xf32, #tpu.memory_space<vmem>>, %arg1: memref<16x32xf32, #tpu.memory_space<vmem>>, %arg2: memref<192x160xbf16, #tpu.memory_space<vmem>>, %arg3: memref<8x160xf32, #tpu.memory_space<vmem>>, %arg4: memref<16x128xf32, #tpu.memory_space<vmem>>) attributes {dimension_semantics = [], scalar_prefetch = 0 : i64, scratch_operands = 0 : i64, tpu.core_type = #tpu.core_type<tc>} {
    %c0 = arith.constant 0 : index
    %c0_0 = arith.constant 0 : index
    %0 = vector.load %arg0[%c0, %c0_0] : memref<16x32xf32, #tpu.memory_space<vmem>>, vector<16x32xf32>
    %c0_1 = arith.constant 0 : index
    %c0_2 = arith.constant 0 : index
    %1 = vector.load %arg1[%c0_1, %c0_2] : memref<16x32xf32, #tpu.memory_space<vmem>>, vector<16x32xf32>
    %c0_3 = arith.constant 0 : index
    %c0_4 = arith.constant 0 : index
    %2 = vector.load %arg2[%c0_3, %c0_4] : memref<192x160xbf16, #tpu.memory_space<vmem>>, vector<32x160xbf16>
    %c32 = arith.constant 32 : index
    %c0_5 = arith.constant 0 : index
    %3 = vector.load %arg2[%c32, %c0_5] : memref<192x160xbf16, #tpu.memory_space<vmem>>, vector<32x160xbf16>
    %c64 = arith.constant 64 : index
    %c0_6 = arith.constant 0 : index
    %4 = vector.load %arg2[%c64, %c0_6] : memref<192x160xbf16, #tpu.memory_space<vmem>>, vector<128x128xbf16>
    %c0_7 = arith.constant 0 : index
    %c0_8 = arith.constant 0 : index
    %5 = vector.load %arg3[%c0_7, %c0_8] : memref<8x160xf32, #tpu.memory_space<vmem>>, vector<1x160xf32>
    %c1 = arith.constant 1 : index
    %c0_9 = arith.constant 0 : index
    %6 = vector.load %arg3[%c1, %c0_9] : memref<8x160xf32, #tpu.memory_space<vmem>>, vector<1x128xf32>
    %c2 = arith.constant 2 : index
    %c0_10 = arith.constant 0 : index
    %7 = vector.load %arg3[%c2, %c0_10] : memref<8x160xf32, #tpu.memory_space<vmem>>, vector<1x32xf32>
    %c3 = arith.constant 3 : index
    %c0_11 = arith.constant 0 : index
    %8 = vector.load %arg3[%c3, %c0_11] : memref<8x160xf32, #tpu.memory_space<vmem>>, vector<1x32xf32>
    %c4 = arith.constant 4 : index
    %c0_12 = arith.constant 0 : index
    %9 = vector.load %arg3[%c4, %c0_12] : memref<8x160xf32, #tpu.memory_space<vmem>>, vector<1x32xf32>
    %c5 = arith.constant 5 : index
    %c0_13 = arith.constant 0 : index
    %10 = vector.load %arg3[%c5, %c0_13] : memref<8x160xf32, #tpu.memory_space<vmem>>, vector<1x1xf32>
    %11 = arith.truncf %0 : vector<16x32xf32> to vector<16x32xbf16>
    %cst = arith.constant dense<0.000000e+00> : vector<16x160xf32>
    %12 = tpu.matmul %11, %2, %cst {dimension_numbers = #tpu.dot_dimension_numbers<[1], [0], [0], [1], [0, 0, 1, 1], [], []>} : vector<16x32xbf16>, vector<32x160xbf16>, vector<16x160xf32> -> vector<16x160xf32>
    %13 = arith.truncf %1 : vector<16x32xf32> to vector<16x32xbf16>
    %cst_14 = arith.constant dense<0.000000e+00> : vector<16x160xf32>
    %14 = tpu.matmul %13, %3, %cst_14 {dimension_numbers = #tpu.dot_dimension_numbers<[1], [0], [0], [1], [0, 0, 1, 1], [], []>} : vector<16x32xbf16>, vector<32x160xbf16>, vector<16x160xf32> -> vector<16x160xf32>
    %15 = arith.addf %12, %14 : vector<16x160xf32>
    %16 = vector.broadcast %5 : vector<1x160xf32> to vector<16x160xf32>
    %17 = arith.addf %15, %16 : vector<16x160xf32>
    %cst_15 = arith.constant 5.000000e-01 : f32
    %18 = vector.broadcast %cst_15 : f32 to vector<16x160xf32>
    %19 = arith.mulf %18, %17 : vector<16x160xf32>
    %cst_16 = arith.constant 4.471500e-02 : f32
    %20 = vector.broadcast %cst_16 : f32 to vector<16x160xf32>
    %21 = arith.mulf %20, %17 : vector<16x160xf32>
    %22 = arith.mulf %21, %17 : vector<16x160xf32>
    %23 = arith.mulf %22, %17 : vector<16x160xf32>
    %24 = arith.addf %17, %23 : vector<16x160xf32>
    %cst_17 = arith.constant 0.797884583 : f32
    %25 = vector.broadcast %cst_17 : f32 to vector<16x160xf32>
    %26 = arith.mulf %25, %24 : vector<16x160xf32>
    %27 = math.tanh %26 : vector<16x160xf32>
    %cst_18 = arith.constant 1.000000e+00 : f32
    %28 = vector.broadcast %cst_18 : f32 to vector<16x160xf32>
    %29 = arith.addf %28, %27 : vector<16x160xf32>
    %30 = arith.mulf %19, %29 : vector<16x160xf32>
    %31 = vector.extract_strided_slice %30 {offsets = [0, 0], sizes = [16, 128], strides = [1, 1]} : vector<16x160xf32> to vector<16x128xf32>
    %32 = vector.extract_strided_slice %30 {offsets = [0, 128], sizes = [16, 32], strides = [1, 1]} : vector<16x160xf32> to vector<16x32xf32>
    %33 = vector.broadcast %7 : vector<1x32xf32> to vector<16x32xf32>
    %34 = arith.mulf %32, %33 : vector<16x32xf32>
    %cst_19 = arith.constant dense<0.000000e+00> : vector<16xf32>
    %35 = vector.multi_reduction <add>, %34, %cst_19 [1] : vector<16x32xf32> to vector<16xf32>
    %36 = vector.shape_cast %35 : vector<16xf32> to vector<16x1xf32>
    %37 = vector.broadcast %10 : vector<1x1xf32> to vector<16x1xf32>
    %38 = arith.addf %36, %37 : vector<16x1xf32>
    %39 = arith.truncf %31 : vector<16x128xf32> to vector<16x128xbf16>
    %cst_20 = arith.constant dense<0.000000e+00> : vector<16x128xf32>
    %40 = tpu.matmul %39, %4, %cst_20 {dimension_numbers = #tpu.dot_dimension_numbers<[1], [0], [0], [1], [0, 0, 1, 1], [], []>} : vector<16x128xbf16>, vector<128x128xbf16>, vector<16x128xf32> -> vector<16x128xf32>
    %41 = vector.broadcast %6 : vector<1x128xf32> to vector<16x128xf32>
    %42 = arith.addf %40, %41 : vector<16x128xf32>
    %43 = vector.extract_strided_slice %42 {offsets = [0, 0], sizes = [16, 96], strides = [1, 1]} : vector<16x128xf32> to vector<16x96xf32>
    %44 = arith.negf %43 : vector<16x96xf32>
    %45 = math.exp %44 : vector<16x96xf32>
    %cst_21 = arith.constant 1.000000e+00 : f32
    %46 = vector.broadcast %cst_21 : f32 to vector<16x96xf32>
    %47 = arith.addf %46, %45 : vector<16x96xf32>
    %48 = arith.divf %46, %47 : vector<16x96xf32>
    %49 = vector.extract_strided_slice %48 {offsets = [0, 0], sizes = [16, 32], strides = [1, 1]} : vector<16x96xf32> to vector<16x32xf32>
    %50 = vector.extract_strided_slice %48 {offsets = [0, 32], sizes = [16, 32], strides = [1, 1]} : vector<16x96xf32> to vector<16x32xf32>
    %51 = vector.extract_strided_slice %48 {offsets = [0, 64], sizes = [16, 32], strides = [1, 1]} : vector<16x96xf32> to vector<16x32xf32>
    %52 = vector.extract_strided_slice %42 {offsets = [0, 96], sizes = [16, 32], strides = [1, 1]} : vector<16x128xf32> to vector<16x32xf32>
    %53 = arith.mulf %49, %0 : vector<16x32xf32>
    %54 = arith.mulf %50, %1 : vector<16x32xf32>
    %55 = arith.addf %53, %54 : vector<16x32xf32>
    %56 = arith.mulf %51, %52 : vector<16x32xf32>
    %57 = arith.addf %55, %56 : vector<16x32xf32>
    %cst_22 = arith.constant dense<0.000000e+00> : vector<16xf32>
    %58 = vector.multi_reduction <add>, %57, %cst_22 [1] : vector<16x32xf32> to vector<16xf32>
    %59 = vector.shape_cast %58 : vector<16xf32> to vector<16x1xf32>
    %cst_23 = arith.constant 3.200000e+01 : f32
    %60 = vector.broadcast %cst_23 : f32 to vector<16x1xf32>
    %61 = arith.divf %59, %60 : vector<16x1xf32>
    %62 = vector.broadcast %61 : vector<16x1xf32> to vector<16x32xf32>
    %63 = arith.subf %57, %62 : vector<16x32xf32>
    %64 = arith.mulf %63, %63 : vector<16x32xf32>
    %cst_24 = arith.constant dense<0.000000e+00> : vector<16xf32>
    %65 = vector.multi_reduction <add>, %64, %cst_24 [1] : vector<16x32xf32> to vector<16xf32>
    %66 = vector.shape_cast %65 : vector<16xf32> to vector<16x1xf32>
    %cst_25 = arith.constant 3.200000e+01 : f32
    %67 = vector.broadcast %cst_25 : f32 to vector<16x1xf32>
    %68 = arith.divf %66, %67 : vector<16x1xf32>
    %69 = vector.broadcast %61 : vector<16x1xf32> to vector<16x32xf32>
    %70 = arith.subf %57, %69 : vector<16x32xf32>
    %cst_26 = arith.constant 9.99999974E-6 : f32
    %71 = vector.broadcast %cst_26 : f32 to vector<16x1xf32>
    %72 = arith.addf %68, %71 : vector<16x1xf32>
    %73 = math.rsqrt %72 : vector<16x1xf32>
    %74 = vector.broadcast %73 : vector<16x1xf32> to vector<16x32xf32>
    %75 = arith.mulf %70, %74 : vector<16x32xf32>
    %76 = vector.broadcast %8 : vector<1x32xf32> to vector<16x32xf32>
    %77 = arith.mulf %75, %76 : vector<16x32xf32>
    %78 = vector.broadcast %9 : vector<1x32xf32> to vector<16x32xf32>
    %79 = arith.addf %77, %78 : vector<16x32xf32>
    %c0_27 = arith.constant 0 : index
    %c0_28 = arith.constant 0 : index
    %80 = vector.load %arg4[%c0_27, %c0_28] : memref<16x128xf32, #tpu.memory_space<vmem>>, vector<16x32xf32>
    tpu.vector_store %arg4[%c0_27, %c0_28], %79 {strides = array<i32>} : memref<16x128xf32, #tpu.memory_space<vmem>>, vector<16x32xf32>,
    %c0_29 = arith.constant 0 : index
    %c32_30 = arith.constant 32 : index
    %81 = vector.load %arg4[%c0_29, %c32_30] : memref<16x128xf32, #tpu.memory_space<vmem>>, vector<16x1xf32>
    tpu.vector_store %arg4[%c0_29, %c32_30], %38 {strides = array<i32>} : memref<16x128xf32, #tpu.memory_space<vmem>>, vector<16x1xf32>,
    return
  }
}

module attributes {stable_mosaic.version = 11 : i64} {
  func.func @_step_kernel(%arg0: memref<12x32xf32, #tpu.memory_space<vmem>>, %arg1: memref<12x32xf32, #tpu.memory_space<vmem>>, %arg2: memref<192x160xbf16, #tpu.memory_space<vmem>>, %arg3: memref<8x160xf32, #tpu.memory_space<vmem>>, %arg4: memref<12x128xf32, #tpu.memory_space<vmem>>) attributes {dimension_semantics = [], scalar_prefetch = 0 : i64, scratch_operands = 0 : i64, tpu.core_type = #tpu.core_type<tc>} {
    %c0 = arith.constant 0 : index
    %c0_0 = arith.constant 0 : index
    %0 = vector.load %arg0[%c0, %c0_0] : memref<12x32xf32, #tpu.memory_space<vmem>>, vector<12x32xf32>
    %c0_1 = arith.constant 0 : index
    %c0_2 = arith.constant 0 : index
    %1 = vector.load %arg1[%c0_1, %c0_2] : memref<12x32xf32, #tpu.memory_space<vmem>>, vector<12x32xf32>
    %c0_3 = arith.constant 0 : index
    %c0_4 = arith.constant 0 : index
    %2 = vector.load %arg2[%c0_3, %c0_4] : memref<192x160xbf16, #tpu.memory_space<vmem>>, vector<32x160xbf16>
    %c32 = arith.constant 32 : index
    %c0_5 = arith.constant 0 : index
    %3 = vector.load %arg2[%c32, %c0_5] : memref<192x160xbf16, #tpu.memory_space<vmem>>, vector<32x160xbf16>
    %c64 = arith.constant 64 : index
    %c0_6 = arith.constant 0 : index
    %4 = vector.load %arg2[%c64, %c0_6] : memref<192x160xbf16, #tpu.memory_space<vmem>>, vector<128x128xbf16>
    %c0_7 = arith.constant 0 : index
    %c0_8 = arith.constant 0 : index
    %5 = vector.load %arg3[%c0_7, %c0_8] : memref<8x160xf32, #tpu.memory_space<vmem>>, vector<1x160xf32>
    %c1 = arith.constant 1 : index
    %c0_9 = arith.constant 0 : index
    %6 = vector.load %arg3[%c1, %c0_9] : memref<8x160xf32, #tpu.memory_space<vmem>>, vector<1x128xf32>
    %c2 = arith.constant 2 : index
    %c0_10 = arith.constant 0 : index
    %7 = vector.load %arg3[%c2, %c0_10] : memref<8x160xf32, #tpu.memory_space<vmem>>, vector<1x32xf32>
    %c3 = arith.constant 3 : index
    %c0_11 = arith.constant 0 : index
    %8 = vector.load %arg3[%c3, %c0_11] : memref<8x160xf32, #tpu.memory_space<vmem>>, vector<1x32xf32>
    %c4 = arith.constant 4 : index
    %c0_12 = arith.constant 0 : index
    %9 = vector.load %arg3[%c4, %c0_12] : memref<8x160xf32, #tpu.memory_space<vmem>>, vector<1x32xf32>
    %c5 = arith.constant 5 : index
    %c0_13 = arith.constant 0 : index
    %10 = vector.load %arg3[%c5, %c0_13] : memref<8x160xf32, #tpu.memory_space<vmem>>, vector<1x1xf32>
    %11 = arith.truncf %0 : vector<12x32xf32> to vector<12x32xbf16>
    %cst = arith.constant dense<0.000000e+00> : vector<12x160xf32>
    %12 = tpu.matmul %11, %2, %cst {dimension_numbers = #tpu.dot_dimension_numbers<[1], [0], [0], [1], [0, 0, 1, 1], [], []>} : vector<12x32xbf16>, vector<32x160xbf16>, vector<12x160xf32> -> vector<12x160xf32>
    %13 = arith.truncf %1 : vector<12x32xf32> to vector<12x32xbf16>
    %cst_14 = arith.constant dense<0.000000e+00> : vector<12x160xf32>
    %14 = tpu.matmul %13, %3, %cst_14 {dimension_numbers = #tpu.dot_dimension_numbers<[1], [0], [0], [1], [0, 0, 1, 1], [], []>} : vector<12x32xbf16>, vector<32x160xbf16>, vector<12x160xf32> -> vector<12x160xf32>
    %15 = arith.addf %12, %14 : vector<12x160xf32>
    %16 = vector.broadcast %5 : vector<1x160xf32> to vector<12x160xf32>
    %17 = arith.addf %15, %16 : vector<12x160xf32>
    %cst_15 = arith.constant 5.000000e-01 : f32
    %18 = vector.broadcast %cst_15 : f32 to vector<12x160xf32>
    %19 = arith.mulf %18, %17 : vector<12x160xf32>
    %cst_16 = arith.constant 4.471500e-02 : f32
    %20 = vector.broadcast %cst_16 : f32 to vector<12x160xf32>
    %21 = arith.mulf %20, %17 : vector<12x160xf32>
    %22 = arith.mulf %21, %17 : vector<12x160xf32>
    %23 = arith.mulf %22, %17 : vector<12x160xf32>
    %24 = arith.addf %17, %23 : vector<12x160xf32>
    %cst_17 = arith.constant 0.797884583 : f32
    %25 = vector.broadcast %cst_17 : f32 to vector<12x160xf32>
    %26 = arith.mulf %25, %24 : vector<12x160xf32>
    %27 = math.tanh %26 : vector<12x160xf32>
    %cst_18 = arith.constant 1.000000e+00 : f32
    %28 = vector.broadcast %cst_18 : f32 to vector<12x160xf32>
    %29 = arith.addf %28, %27 : vector<12x160xf32>
    %30 = arith.mulf %19, %29 : vector<12x160xf32>
    %31 = vector.extract_strided_slice %30 {offsets = [0, 0], sizes = [12, 128], strides = [1, 1]} : vector<12x160xf32> to vector<12x128xf32>
    %32 = vector.extract_strided_slice %30 {offsets = [0, 128], sizes = [12, 32], strides = [1, 1]} : vector<12x160xf32> to vector<12x32xf32>
    %33 = vector.broadcast %7 : vector<1x32xf32> to vector<12x32xf32>
    %34 = arith.mulf %32, %33 : vector<12x32xf32>
    %cst_19 = arith.constant dense<0.000000e+00> : vector<12xf32>
    %35 = vector.multi_reduction <add>, %34, %cst_19 [1] : vector<12x32xf32> to vector<12xf32>
    %36 = vector.shape_cast %35 : vector<12xf32> to vector<12x1xf32>
    %37 = vector.broadcast %10 : vector<1x1xf32> to vector<12x1xf32>
    %38 = arith.addf %36, %37 : vector<12x1xf32>
    %39 = arith.truncf %31 : vector<12x128xf32> to vector<12x128xbf16>
    %cst_20 = arith.constant dense<0.000000e+00> : vector<12x128xf32>
    %40 = tpu.matmul %39, %4, %cst_20 {dimension_numbers = #tpu.dot_dimension_numbers<[1], [0], [0], [1], [0, 0, 1, 1], [], []>} : vector<12x128xbf16>, vector<128x128xbf16>, vector<12x128xf32> -> vector<12x128xf32>
    %41 = vector.broadcast %6 : vector<1x128xf32> to vector<12x128xf32>
    %42 = arith.addf %40, %41 : vector<12x128xf32>
    %43 = vector.extract_strided_slice %42 {offsets = [0, 0], sizes = [12, 96], strides = [1, 1]} : vector<12x128xf32> to vector<12x96xf32>
    %44 = arith.negf %43 : vector<12x96xf32>
    %45 = math.exp %44 : vector<12x96xf32>
    %cst_21 = arith.constant 1.000000e+00 : f32
    %46 = vector.broadcast %cst_21 : f32 to vector<12x96xf32>
    %47 = arith.addf %46, %45 : vector<12x96xf32>
    %48 = arith.divf %46, %47 : vector<12x96xf32>
    %49 = vector.extract_strided_slice %48 {offsets = [0, 0], sizes = [12, 32], strides = [1, 1]} : vector<12x96xf32> to vector<12x32xf32>
    %50 = vector.extract_strided_slice %48 {offsets = [0, 32], sizes = [12, 32], strides = [1, 1]} : vector<12x96xf32> to vector<12x32xf32>
    %51 = vector.extract_strided_slice %48 {offsets = [0, 64], sizes = [12, 32], strides = [1, 1]} : vector<12x96xf32> to vector<12x32xf32>
    %52 = vector.extract_strided_slice %42 {offsets = [0, 96], sizes = [12, 32], strides = [1, 1]} : vector<12x128xf32> to vector<12x32xf32>
    %53 = arith.mulf %49, %0 : vector<12x32xf32>
    %54 = arith.mulf %50, %1 : vector<12x32xf32>
    %55 = arith.addf %53, %54 : vector<12x32xf32>
    %56 = arith.mulf %51, %52 : vector<12x32xf32>
    %57 = arith.addf %55, %56 : vector<12x32xf32>
    %cst_22 = arith.constant dense<0.000000e+00> : vector<12xf32>
    %58 = vector.multi_reduction <add>, %57, %cst_22 [1] : vector<12x32xf32> to vector<12xf32>
    %59 = vector.shape_cast %58 : vector<12xf32> to vector<12x1xf32>
    %cst_23 = arith.constant 3.200000e+01 : f32
    %60 = vector.broadcast %cst_23 : f32 to vector<12x1xf32>
    %61 = arith.divf %59, %60 : vector<12x1xf32>
    %62 = vector.broadcast %61 : vector<12x1xf32> to vector<12x32xf32>
    %63 = arith.subf %57, %62 : vector<12x32xf32>
    %64 = arith.mulf %63, %63 : vector<12x32xf32>
    %cst_24 = arith.constant dense<0.000000e+00> : vector<12xf32>
    %65 = vector.multi_reduction <add>, %64, %cst_24 [1] : vector<12x32xf32> to vector<12xf32>
    %66 = vector.shape_cast %65 : vector<12xf32> to vector<12x1xf32>
    %cst_25 = arith.constant 3.200000e+01 : f32
    %67 = vector.broadcast %cst_25 : f32 to vector<12x1xf32>
    %68 = arith.divf %66, %67 : vector<12x1xf32>
    %69 = vector.broadcast %61 : vector<12x1xf32> to vector<12x32xf32>
    %70 = arith.subf %57, %69 : vector<12x32xf32>
    %cst_26 = arith.constant 9.99999974E-6 : f32
    %71 = vector.broadcast %cst_26 : f32 to vector<12x1xf32>
    %72 = arith.addf %68, %71 : vector<12x1xf32>
    %73 = math.rsqrt %72 : vector<12x1xf32>
    %74 = vector.broadcast %73 : vector<12x1xf32> to vector<12x32xf32>
    %75 = arith.mulf %70, %74 : vector<12x32xf32>
    %76 = vector.broadcast %8 : vector<1x32xf32> to vector<12x32xf32>
    %77 = arith.mulf %75, %76 : vector<12x32xf32>
    %78 = vector.broadcast %9 : vector<1x32xf32> to vector<12x32xf32>
    %79 = arith.addf %77, %78 : vector<12x32xf32>
    %c0_27 = arith.constant 0 : index
    %c0_28 = arith.constant 0 : index
    %80 = vector.load %arg4[%c0_27, %c0_28] : memref<12x128xf32, #tpu.memory_space<vmem>>, vector<12x32xf32>
    tpu.vector_store %arg4[%c0_27, %c0_28], %79 {strides = array<i32>} : memref<12x128xf32, #tpu.memory_space<vmem>>, vector<12x32xf32>,
    %c0_29 = arith.constant 0 : index
    %c32_30 = arith.constant 32 : index
    %81 = vector.load %arg4[%c0_29, %c32_30] : memref<12x128xf32, #tpu.memory_space<vmem>>, vector<12x1xf32>
    tpu.vector_store %arg4[%c0_29, %c32_30], %38 {strides = array<i32>} : memref<12x128xf32, #tpu.memory_space<vmem>>, vector<12x1xf32>,
    return
  }
}

module attributes {stable_mosaic.version = 11 : i64} {
  func.func @_step_kernel(%arg0: memref<8x32xf32, #tpu.memory_space<vmem>>, %arg1: memref<8x32xf32, #tpu.memory_space<vmem>>, %arg2: memref<192x160xbf16, #tpu.memory_space<vmem>>, %arg3: memref<8x160xf32, #tpu.memory_space<vmem>>, %arg4: memref<8x128xf32, #tpu.memory_space<vmem>>) attributes {dimension_semantics = [], scalar_prefetch = 0 : i64, scratch_operands = 0 : i64, tpu.core_type = #tpu.core_type<tc>} {
    %c0 = arith.constant 0 : index
    %c0_0 = arith.constant 0 : index
    %0 = vector.load %arg0[%c0, %c0_0] : memref<8x32xf32, #tpu.memory_space<vmem>>, vector<8x32xf32>
    %c0_1 = arith.constant 0 : index
    %c0_2 = arith.constant 0 : index
    %1 = vector.load %arg1[%c0_1, %c0_2] : memref<8x32xf32, #tpu.memory_space<vmem>>, vector<8x32xf32>
    %c0_3 = arith.constant 0 : index
    %c0_4 = arith.constant 0 : index
    %2 = vector.load %arg2[%c0_3, %c0_4] : memref<192x160xbf16, #tpu.memory_space<vmem>>, vector<32x160xbf16>
    %c32 = arith.constant 32 : index
    %c0_5 = arith.constant 0 : index
    %3 = vector.load %arg2[%c32, %c0_5] : memref<192x160xbf16, #tpu.memory_space<vmem>>, vector<32x160xbf16>
    %c64 = arith.constant 64 : index
    %c0_6 = arith.constant 0 : index
    %4 = vector.load %arg2[%c64, %c0_6] : memref<192x160xbf16, #tpu.memory_space<vmem>>, vector<128x128xbf16>
    %c0_7 = arith.constant 0 : index
    %c0_8 = arith.constant 0 : index
    %5 = vector.load %arg3[%c0_7, %c0_8] : memref<8x160xf32, #tpu.memory_space<vmem>>, vector<1x160xf32>
    %c1 = arith.constant 1 : index
    %c0_9 = arith.constant 0 : index
    %6 = vector.load %arg3[%c1, %c0_9] : memref<8x160xf32, #tpu.memory_space<vmem>>, vector<1x128xf32>
    %c2 = arith.constant 2 : index
    %c0_10 = arith.constant 0 : index
    %7 = vector.load %arg3[%c2, %c0_10] : memref<8x160xf32, #tpu.memory_space<vmem>>, vector<1x32xf32>
    %c3 = arith.constant 3 : index
    %c0_11 = arith.constant 0 : index
    %8 = vector.load %arg3[%c3, %c0_11] : memref<8x160xf32, #tpu.memory_space<vmem>>, vector<1x32xf32>
    %c4 = arith.constant 4 : index
    %c0_12 = arith.constant 0 : index
    %9 = vector.load %arg3[%c4, %c0_12] : memref<8x160xf32, #tpu.memory_space<vmem>>, vector<1x32xf32>
    %c5 = arith.constant 5 : index
    %c0_13 = arith.constant 0 : index
    %10 = vector.load %arg3[%c5, %c0_13] : memref<8x160xf32, #tpu.memory_space<vmem>>, vector<1x1xf32>
    %11 = arith.truncf %0 : vector<8x32xf32> to vector<8x32xbf16>
    %cst = arith.constant dense<0.000000e+00> : vector<8x160xf32>
    %12 = tpu.matmul %11, %2, %cst {dimension_numbers = #tpu.dot_dimension_numbers<[1], [0], [0], [1], [0, 0, 1, 1], [], []>} : vector<8x32xbf16>, vector<32x160xbf16>, vector<8x160xf32> -> vector<8x160xf32>
    %13 = arith.truncf %1 : vector<8x32xf32> to vector<8x32xbf16>
    %cst_14 = arith.constant dense<0.000000e+00> : vector<8x160xf32>
    %14 = tpu.matmul %13, %3, %cst_14 {dimension_numbers = #tpu.dot_dimension_numbers<[1], [0], [0], [1], [0, 0, 1, 1], [], []>} : vector<8x32xbf16>, vector<32x160xbf16>, vector<8x160xf32> -> vector<8x160xf32>
    %15 = arith.addf %12, %14 : vector<8x160xf32>
    %16 = vector.broadcast %5 : vector<1x160xf32> to vector<8x160xf32>
    %17 = arith.addf %15, %16 : vector<8x160xf32>
    %cst_15 = arith.constant 5.000000e-01 : f32
    %18 = vector.broadcast %cst_15 : f32 to vector<8x160xf32>
    %19 = arith.mulf %18, %17 : vector<8x160xf32>
    %cst_16 = arith.constant 4.471500e-02 : f32
    %20 = vector.broadcast %cst_16 : f32 to vector<8x160xf32>
    %21 = arith.mulf %20, %17 : vector<8x160xf32>
    %22 = arith.mulf %21, %17 : vector<8x160xf32>
    %23 = arith.mulf %22, %17 : vector<8x160xf32>
    %24 = arith.addf %17, %23 : vector<8x160xf32>
    %cst_17 = arith.constant 0.797884583 : f32
    %25 = vector.broadcast %cst_17 : f32 to vector<8x160xf32>
    %26 = arith.mulf %25, %24 : vector<8x160xf32>
    %27 = math.tanh %26 : vector<8x160xf32>
    %cst_18 = arith.constant 1.000000e+00 : f32
    %28 = vector.broadcast %cst_18 : f32 to vector<8x160xf32>
    %29 = arith.addf %28, %27 : vector<8x160xf32>
    %30 = arith.mulf %19, %29 : vector<8x160xf32>
    %31 = vector.extract_strided_slice %30 {offsets = [0, 0], sizes = [8, 128], strides = [1, 1]} : vector<8x160xf32> to vector<8x128xf32>
    %32 = vector.extract_strided_slice %30 {offsets = [0, 128], sizes = [8, 32], strides = [1, 1]} : vector<8x160xf32> to vector<8x32xf32>
    %33 = vector.broadcast %7 : vector<1x32xf32> to vector<8x32xf32>
    %34 = arith.mulf %32, %33 : vector<8x32xf32>
    %cst_19 = arith.constant dense<0.000000e+00> : vector<8xf32>
    %35 = vector.multi_reduction <add>, %34, %cst_19 [1] : vector<8x32xf32> to vector<8xf32>
    %36 = vector.shape_cast %35 : vector<8xf32> to vector<8x1xf32>
    %37 = vector.broadcast %10 : vector<1x1xf32> to vector<8x1xf32>
    %38 = arith.addf %36, %37 : vector<8x1xf32>
    %39 = arith.truncf %31 : vector<8x128xf32> to vector<8x128xbf16>
    %cst_20 = arith.constant dense<0.000000e+00> : vector<8x128xf32>
    %40 = tpu.matmul %39, %4, %cst_20 {dimension_numbers = #tpu.dot_dimension_numbers<[1], [0], [0], [1], [0, 0, 1, 1], [], []>} : vector<8x128xbf16>, vector<128x128xbf16>, vector<8x128xf32> -> vector<8x128xf32>
    %41 = vector.broadcast %6 : vector<1x128xf32> to vector<8x128xf32>
    %42 = arith.addf %40, %41 : vector<8x128xf32>
    %43 = vector.extract_strided_slice %42 {offsets = [0, 0], sizes = [8, 96], strides = [1, 1]} : vector<8x128xf32> to vector<8x96xf32>
    %44 = arith.negf %43 : vector<8x96xf32>
    %45 = math.exp %44 : vector<8x96xf32>
    %cst_21 = arith.constant 1.000000e+00 : f32
    %46 = vector.broadcast %cst_21 : f32 to vector<8x96xf32>
    %47 = arith.addf %46, %45 : vector<8x96xf32>
    %48 = arith.divf %46, %47 : vector<8x96xf32>
    %49 = vector.extract_strided_slice %48 {offsets = [0, 0], sizes = [8, 32], strides = [1, 1]} : vector<8x96xf32> to vector<8x32xf32>
    %50 = vector.extract_strided_slice %48 {offsets = [0, 32], sizes = [8, 32], strides = [1, 1]} : vector<8x96xf32> to vector<8x32xf32>
    %51 = vector.extract_strided_slice %48 {offsets = [0, 64], sizes = [8, 32], strides = [1, 1]} : vector<8x96xf32> to vector<8x32xf32>
    %52 = vector.extract_strided_slice %42 {offsets = [0, 96], sizes = [8, 32], strides = [1, 1]} : vector<8x128xf32> to vector<8x32xf32>
    %53 = arith.mulf %49, %0 : vector<8x32xf32>
    %54 = arith.mulf %50, %1 : vector<8x32xf32>
    %55 = arith.addf %53, %54 : vector<8x32xf32>
    %56 = arith.mulf %51, %52 : vector<8x32xf32>
    %57 = arith.addf %55, %56 : vector<8x32xf32>
    %cst_22 = arith.constant dense<0.000000e+00> : vector<8xf32>
    %58 = vector.multi_reduction <add>, %57, %cst_22 [1] : vector<8x32xf32> to vector<8xf32>
    %59 = vector.shape_cast %58 : vector<8xf32> to vector<8x1xf32>
    %cst_23 = arith.constant 3.200000e+01 : f32
    %60 = vector.broadcast %cst_23 : f32 to vector<8x1xf32>
    %61 = arith.divf %59, %60 : vector<8x1xf32>
    %62 = vector.broadcast %61 : vector<8x1xf32> to vector<8x32xf32>
    %63 = arith.subf %57, %62 : vector<8x32xf32>
    %64 = arith.mulf %63, %63 : vector<8x32xf32>
    %cst_24 = arith.constant dense<0.000000e+00> : vector<8xf32>
    %65 = vector.multi_reduction <add>, %64, %cst_24 [1] : vector<8x32xf32> to vector<8xf32>
    %66 = vector.shape_cast %65 : vector<8xf32> to vector<8x1xf32>
    %cst_25 = arith.constant 3.200000e+01 : f32
    %67 = vector.broadcast %cst_25 : f32 to vector<8x1xf32>
    %68 = arith.divf %66, %67 : vector<8x1xf32>
    %69 = vector.broadcast %61 : vector<8x1xf32> to vector<8x32xf32>
    %70 = arith.subf %57, %69 : vector<8x32xf32>
    %cst_26 = arith.constant 9.99999974E-6 : f32
    %71 = vector.broadcast %cst_26 : f32 to vector<8x1xf32>
    %72 = arith.addf %68, %71 : vector<8x1xf32>
    %73 = math.rsqrt %72 : vector<8x1xf32>
    %74 = vector.broadcast %73 : vector<8x1xf32> to vector<8x32xf32>
    %75 = arith.mulf %70, %74 : vector<8x32xf32>
    %76 = vector.broadcast %8 : vector<1x32xf32> to vector<8x32xf32>
    %77 = arith.mulf %75, %76 : vector<8x32xf32>
    %78 = vector.broadcast %9 : vector<1x32xf32> to vector<8x32xf32>
    %79 = arith.addf %77, %78 : vector<8x32xf32>
    %c0_27 = arith.constant 0 : index
    %c0_28 = arith.constant 0 : index
    %80 = vector.load %arg4[%c0_27, %c0_28] : memref<8x128xf32, #tpu.memory_space<vmem>>, vector<8x32xf32>
    tpu.vector_store %arg4[%c0_27, %c0_28], %79 {strides = array<i32>} : memref<8x128xf32, #tpu.memory_space<vmem>>, vector<8x32xf32>,
    %c0_29 = arith.constant 0 : index
    %c32_30 = arith.constant 32 : index
    %81 = vector.load %arg4[%c0_29, %c32_30] : memref<8x128xf32, #tpu.memory_space<vmem>>, vector<8x1xf32>
    tpu.vector_store %arg4[%c0_29, %c32_30], %38 {strides = array<i32>} : memref<8x128xf32, #tpu.memory_space<vmem>>, vector<8x1xf32>,
    return
  }
}

module attributes {stable_mosaic.version = 11 : i64} {
  func.func @_step_kernel(%arg0: memref<4x32xf32, #tpu.memory_space<vmem>>, %arg1: memref<4x32xf32, #tpu.memory_space<vmem>>, %arg2: memref<192x160xbf16, #tpu.memory_space<vmem>>, %arg3: memref<8x160xf32, #tpu.memory_space<vmem>>, %arg4: memref<4x128xf32, #tpu.memory_space<vmem>>) attributes {dimension_semantics = [], scalar_prefetch = 0 : i64, scratch_operands = 0 : i64, tpu.core_type = #tpu.core_type<tc>} {
    %c0 = arith.constant 0 : index
    %c0_0 = arith.constant 0 : index
    %0 = vector.load %arg0[%c0, %c0_0] : memref<4x32xf32, #tpu.memory_space<vmem>>, vector<4x32xf32>
    %c0_1 = arith.constant 0 : index
    %c0_2 = arith.constant 0 : index
    %1 = vector.load %arg1[%c0_1, %c0_2] : memref<4x32xf32, #tpu.memory_space<vmem>>, vector<4x32xf32>
    %c0_3 = arith.constant 0 : index
    %c0_4 = arith.constant 0 : index
    %2 = vector.load %arg2[%c0_3, %c0_4] : memref<192x160xbf16, #tpu.memory_space<vmem>>, vector<32x160xbf16>
    %c32 = arith.constant 32 : index
    %c0_5 = arith.constant 0 : index
    %3 = vector.load %arg2[%c32, %c0_5] : memref<192x160xbf16, #tpu.memory_space<vmem>>, vector<32x160xbf16>
    %c64 = arith.constant 64 : index
    %c0_6 = arith.constant 0 : index
    %4 = vector.load %arg2[%c64, %c0_6] : memref<192x160xbf16, #tpu.memory_space<vmem>>, vector<128x128xbf16>
    %c0_7 = arith.constant 0 : index
    %c0_8 = arith.constant 0 : index
    %5 = vector.load %arg3[%c0_7, %c0_8] : memref<8x160xf32, #tpu.memory_space<vmem>>, vector<1x160xf32>
    %c1 = arith.constant 1 : index
    %c0_9 = arith.constant 0 : index
    %6 = vector.load %arg3[%c1, %c0_9] : memref<8x160xf32, #tpu.memory_space<vmem>>, vector<1x128xf32>
    %c2 = arith.constant 2 : index
    %c0_10 = arith.constant 0 : index
    %7 = vector.load %arg3[%c2, %c0_10] : memref<8x160xf32, #tpu.memory_space<vmem>>, vector<1x32xf32>
    %c3 = arith.constant 3 : index
    %c0_11 = arith.constant 0 : index
    %8 = vector.load %arg3[%c3, %c0_11] : memref<8x160xf32, #tpu.memory_space<vmem>>, vector<1x32xf32>
    %c4 = arith.constant 4 : index
    %c0_12 = arith.constant 0 : index
    %9 = vector.load %arg3[%c4, %c0_12] : memref<8x160xf32, #tpu.memory_space<vmem>>, vector<1x32xf32>
    %c5 = arith.constant 5 : index
    %c0_13 = arith.constant 0 : index
    %10 = vector.load %arg3[%c5, %c0_13] : memref<8x160xf32, #tpu.memory_space<vmem>>, vector<1x1xf32>
    %11 = arith.truncf %0 : vector<4x32xf32> to vector<4x32xbf16>
    %cst = arith.constant dense<0.000000e+00> : vector<4x160xf32>
    %12 = tpu.matmul %11, %2, %cst {dimension_numbers = #tpu.dot_dimension_numbers<[1], [0], [0], [1], [0, 0, 1, 1], [], []>} : vector<4x32xbf16>, vector<32x160xbf16>, vector<4x160xf32> -> vector<4x160xf32>
    %13 = arith.truncf %1 : vector<4x32xf32> to vector<4x32xbf16>
    %cst_14 = arith.constant dense<0.000000e+00> : vector<4x160xf32>
    %14 = tpu.matmul %13, %3, %cst_14 {dimension_numbers = #tpu.dot_dimension_numbers<[1], [0], [0], [1], [0, 0, 1, 1], [], []>} : vector<4x32xbf16>, vector<32x160xbf16>, vector<4x160xf32> -> vector<4x160xf32>
    %15 = arith.addf %12, %14 : vector<4x160xf32>
    %16 = vector.broadcast %5 : vector<1x160xf32> to vector<4x160xf32>
    %17 = arith.addf %15, %16 : vector<4x160xf32>
    %cst_15 = arith.constant 5.000000e-01 : f32
    %18 = vector.broadcast %cst_15 : f32 to vector<4x160xf32>
    %19 = arith.mulf %18, %17 : vector<4x160xf32>
    %cst_16 = arith.constant 4.471500e-02 : f32
    %20 = vector.broadcast %cst_16 : f32 to vector<4x160xf32>
    %21 = arith.mulf %20, %17 : vector<4x160xf32>
    %22 = arith.mulf %21, %17 : vector<4x160xf32>
    %23 = arith.mulf %22, %17 : vector<4x160xf32>
    %24 = arith.addf %17, %23 : vector<4x160xf32>
    %cst_17 = arith.constant 0.797884583 : f32
    %25 = vector.broadcast %cst_17 : f32 to vector<4x160xf32>
    %26 = arith.mulf %25, %24 : vector<4x160xf32>
    %27 = math.tanh %26 : vector<4x160xf32>
    %cst_18 = arith.constant 1.000000e+00 : f32
    %28 = vector.broadcast %cst_18 : f32 to vector<4x160xf32>
    %29 = arith.addf %28, %27 : vector<4x160xf32>
    %30 = arith.mulf %19, %29 : vector<4x160xf32>
    %31 = vector.extract_strided_slice %30 {offsets = [0, 0], sizes = [4, 128], strides = [1, 1]} : vector<4x160xf32> to vector<4x128xf32>
    %32 = vector.extract_strided_slice %30 {offsets = [0, 128], sizes = [4, 32], strides = [1, 1]} : vector<4x160xf32> to vector<4x32xf32>
    %33 = vector.broadcast %7 : vector<1x32xf32> to vector<4x32xf32>
    %34 = arith.mulf %32, %33 : vector<4x32xf32>
    %cst_19 = arith.constant dense<0.000000e+00> : vector<4xf32>
    %35 = vector.multi_reduction <add>, %34, %cst_19 [1] : vector<4x32xf32> to vector<4xf32>
    %36 = vector.shape_cast %35 : vector<4xf32> to vector<4x1xf32>
    %37 = vector.broadcast %10 : vector<1x1xf32> to vector<4x1xf32>
    %38 = arith.addf %36, %37 : vector<4x1xf32>
    %39 = arith.truncf %31 : vector<4x128xf32> to vector<4x128xbf16>
    %cst_20 = arith.constant dense<0.000000e+00> : vector<4x128xf32>
    %40 = tpu.matmul %39, %4, %cst_20 {dimension_numbers = #tpu.dot_dimension_numbers<[1], [0], [0], [1], [0, 0, 1, 1], [], []>} : vector<4x128xbf16>, vector<128x128xbf16>, vector<4x128xf32> -> vector<4x128xf32>
    %41 = vector.broadcast %6 : vector<1x128xf32> to vector<4x128xf32>
    %42 = arith.addf %40, %41 : vector<4x128xf32>
    %43 = vector.extract_strided_slice %42 {offsets = [0, 0], sizes = [4, 96], strides = [1, 1]} : vector<4x128xf32> to vector<4x96xf32>
    %44 = arith.negf %43 : vector<4x96xf32>
    %45 = math.exp %44 : vector<4x96xf32>
    %cst_21 = arith.constant 1.000000e+00 : f32
    %46 = vector.broadcast %cst_21 : f32 to vector<4x96xf32>
    %47 = arith.addf %46, %45 : vector<4x96xf32>
    %48 = arith.divf %46, %47 : vector<4x96xf32>
    %49 = vector.extract_strided_slice %48 {offsets = [0, 0], sizes = [4, 32], strides = [1, 1]} : vector<4x96xf32> to vector<4x32xf32>
    %50 = vector.extract_strided_slice %48 {offsets = [0, 32], sizes = [4, 32], strides = [1, 1]} : vector<4x96xf32> to vector<4x32xf32>
    %51 = vector.extract_strided_slice %48 {offsets = [0, 64], sizes = [4, 32], strides = [1, 1]} : vector<4x96xf32> to vector<4x32xf32>
    %52 = vector.extract_strided_slice %42 {offsets = [0, 96], sizes = [4, 32], strides = [1, 1]} : vector<4x128xf32> to vector<4x32xf32>
    %53 = arith.mulf %49, %0 : vector<4x32xf32>
    %54 = arith.mulf %50, %1 : vector<4x32xf32>
    %55 = arith.addf %53, %54 : vector<4x32xf32>
    %56 = arith.mulf %51, %52 : vector<4x32xf32>
    %57 = arith.addf %55, %56 : vector<4x32xf32>
    %cst_22 = arith.constant dense<0.000000e+00> : vector<4xf32>
    %58 = vector.multi_reduction <add>, %57, %cst_22 [1] : vector<4x32xf32> to vector<4xf32>
    %59 = vector.shape_cast %58 : vector<4xf32> to vector<4x1xf32>
    %cst_23 = arith.constant 3.200000e+01 : f32
    %60 = vector.broadcast %cst_23 : f32 to vector<4x1xf32>
    %61 = arith.divf %59, %60 : vector<4x1xf32>
    %62 = vector.broadcast %61 : vector<4x1xf32> to vector<4x32xf32>
    %63 = arith.subf %57, %62 : vector<4x32xf32>
    %64 = arith.mulf %63, %63 : vector<4x32xf32>
    %cst_24 = arith.constant dense<0.000000e+00> : vector<4xf32>
    %65 = vector.multi_reduction <add>, %64, %cst_24 [1] : vector<4x32xf32> to vector<4xf32>
    %66 = vector.shape_cast %65 : vector<4xf32> to vector<4x1xf32>
    %cst_25 = arith.constant 3.200000e+01 : f32
    %67 = vector.broadcast %cst_25 : f32 to vector<4x1xf32>
    %68 = arith.divf %66, %67 : vector<4x1xf32>
    %69 = vector.broadcast %61 : vector<4x1xf32> to vector<4x32xf32>
    %70 = arith.subf %57, %69 : vector<4x32xf32>
    %cst_26 = arith.constant 9.99999974E-6 : f32
    %71 = vector.broadcast %cst_26 : f32 to vector<4x1xf32>
    %72 = arith.addf %68, %71 : vector<4x1xf32>
    %73 = math.rsqrt %72 : vector<4x1xf32>
    %74 = vector.broadcast %73 : vector<4x1xf32> to vector<4x32xf32>
    %75 = arith.mulf %70, %74 : vector<4x32xf32>
    %76 = vector.broadcast %8 : vector<1x32xf32> to vector<4x32xf32>
    %77 = arith.mulf %75, %76 : vector<4x32xf32>
    %78 = vector.broadcast %9 : vector<1x32xf32> to vector<4x32xf32>
    %79 = arith.addf %77, %78 : vector<4x32xf32>
    %c0_27 = arith.constant 0 : index
    %c0_28 = arith.constant 0 : index
    %80 = vector.load %arg4[%c0_27, %c0_28] : memref<4x128xf32, #tpu.memory_space<vmem>>, vector<4x32xf32>
    tpu.vector_store %arg4[%c0_27, %c0_28], %79 {strides = array<i32>} : memref<4x128xf32, #tpu.memory_space<vmem>>, vector<4x32xf32>,
    %c0_29 = arith.constant 0 : index
    %c32_30 = arith.constant 32 : index
    %81 = vector.load %arg4[%c0_29, %c32_30] : memref<4x128xf32, #tpu.memory_space<vmem>>, vector<4x1xf32>
    tpu.vector_store %arg4[%c0_29, %c32_30], %38 {strides = array<i32>} : memref<4x128xf32, #tpu.memory_space<vmem>>, vector<4x1xf32>,
    return
  }
}

</mosaic_0001>

<bundles_post_ra>
// kernel: squeeze.22
= control target key start
LH: loop header
LB: loop body
LE: loop exit
PB: predicated region body
PF: predicated region fallthrough
CT: control target
= control target key end

     0   :  { %vm7_vm0 = vcmask 56320   ;;  %s39_s0 = inlined_call_operand.vmem [shape: f32[14], index: 0, kind: input, shape index: {}]   ;;  %s40_s1 = inlined_call_operand.vmem [shape: f32[2,7], index: 1, kind: output, shape index: {}]  }
   0x1   :  { %v4_v0 = vld [vmem:[%s39_s0] sm:$0x1]  ;;  %s22_s0 = smov 121  }
   0x2   :  { %5 = vst [vmem:[#allocation1] sm:$0x1] %v4_v0 }
   0x9   :  { %v9_v1 = vld [vmem:[#allocation1] sm:$0x1]  }
   0xa   :  { %v6_v2 = vld [vmem:[#allocation1] sm:$0x1]   ;;  %10 = vrot.lane.b32.xlu0 %v9_v1, %s22_s0 }
   0xb   :  { %8 = vst.msk [vmem:[#allocation0] sm:$0x1] %vm7_vm0, %v6_v2  }
  0x7c   :  { %v11_v3 = vpop.permute.xlu0 %10  }
  0x7d   :  { %14 = vst.msk [vmem:[#allocation0 + $0x1] sm:$0x1] %vm7_vm0, %v11_v3  }
  0x84   :  { %v18_v4 = vld [vmem:[#allocation0] sm:$0x3] }
  0x85   :  { %20 = vst [vmem:[%s40_s1] sm:$0x3] %v18_v4 }

// kernel: forward.8
= control target key start
LH: loop header
LB: loop body
LE: loop exit
PB: predicated region body
PF: predicated region fallthrough
CT: control target
= control target key end

     0   :  { %8 = vsyncpa [#allocation3], 0  ;;  %s305_s0 = inlined_call_operand.vmem [shape: f32[16,32], index: 0, kind: input, shape index: {}]   ;;  %s306_s1 = inlined_call_operand.hbm [shape: bf16[32,32], index: 1, kind: input, shape index: {}]   ;;  %s307_s2 = inlined_call_operand.hbm [shape: f32[8,32], index: 2, kind: input, shape index: {}]   ;;  %s308_s3 = inlined_call_operand.vmem [shape: f32[16,32], index: 3, kind: output, shape index: {}]  }
   0x1   :  { %9 = vsyncpa [#allocation5], 0  ;;  %s236_s12 = smov [#allocation2]   ;;  %s188_s16 = scalar_lea.hbm %s306_s1, 256 }
   0x2   :  { %s17_s13 = sshll.u32 %s236_s12, 4  ;;  %p189_p0 = scmp.ne.s32.totalorder %s306_s1, %s188_s16  ;;  %s18_s13 = int_to_ptr.vmem [resolvable:$true] %s17_s13 }
   0x3   :  { %p192_p1 = scmp.lt.u32.totalorder %s188_s16, %s306_s1 }
   0x5   :  { %p194_p2 = pnand %p192_p1, %p189_p0 }
   0x7   :  { %197 = shalt.err (!%p194_p2)
}
   0x8   :  { %s198_s21 = scalar_lea.vmem %s18_s13, 256  ;;  %p203_p4 = scmp.lt.s32.totalorder %s18_s13, %s18_s13 }
   0x9   :  { %p199_p3 = scmp.ne.s32.totalorder %s18_s13, %s198_s21  ;;  %p204_p5 = scmp.lt.s32.totalorder %s198_s21, %s198_s21 }
   0xb   :  { %p205_p6 = por %p204_p5, %p203_p4 }
   0xd   :  { %p206_p7 = pnand %p205_p6, %p199_p3 }
   0xf   :  { %209 = shalt.err (!%p206_p7)
}
  0x10   :  { %s237_s22 = smov 64   ;;  %s238_s23 = smov 4  }
  0x11   :  { %23 = dma.hbm_to_vmem [thread:$0]  %s306_s1, 256, %s18_s13, [#allocation3], %s237_s22, %s237_s22, %s238_s23  }
  0x12   :  { %s239_s26 = smov [#allocation4]   ;;  %s210_s30 = scalar_lea.hbm %s307_s2, 128 }
  0x13   :  { %s30_s27 = sshll.u32 %s239_s26, 4  ;;  %p211_p8 = scmp.ne.s32.totalorder %s307_s2, %s210_s30  ;;  %s31_s27 = int_to_ptr.vmem [resolvable:$true] %s30_s27 }
  0x14   :  { %p214_p9 = scmp.lt.u32.totalorder %s210_s30, %s307_s2 }
  0x16   :  { %p216_p10 = pnand %p214_p9, %p211_p8 }
  0x18   :  { %219 = shalt.err (!%p216_p10)
}
  0x19   :  { %s220_s8 = scalar_lea.vmem %s31_s27, 128  ;;  %p225_p12 = scmp.lt.s32.totalorder %s31_s27, %s31_s27 }
  0x1a   :  { %p221_p11 = scmp.ne.s32.totalorder %s31_s27, %s220_s8  ;;  %p226_p13 = scmp.lt.s32.totalorder %s220_s8, %s220_s8 }
  0x1c   :  { %p227_p0 = por %p226_p13, %p225_p12 }
  0x1e   :  { %p228_p1 = pnand %p227_p0, %p221_p11 }
  0x20   :  { %231 = shalt.err (!%p228_p1)
}
  0x21   :  { %33 = dma.hbm_to_vmem [thread:$0]  %s307_s2, 128, %s31_s27, [#allocation5]  }
  0x22   :  { %232 = dma.done.wait [#allocation3], 256  }
  0x23   :  { %233 = vsyncadd [#allocation3], 4294967040 }
  0x24   :  { %234 = dma.done.wait [#allocation5], 128  }
  0x25   :  { %235 = vsyncadd [#allocation5], 4294967168  ;;  %v240_v0 = vmov 0.0   ;;  %vm241_vm0 = vmmov 0   ;;  %v182_v1 = vld [vmem:[#allocation2] sm:$0xff]   ;;  %v183_v2 = vld [vmem:[#allocation2 + $0x8] sm:$0xff]  }
  0x26   :  { %168 = vmatprep.subr.bf16.mxu0 %v240_v0  ;;  %172 = vmatprep.mubr.msk.bf16.mxu0 %vm241_vm0, %v240_v0  ;;  %v41_v3 = vld [vmem:[%s305_s0] sm:$0xff]  ;;  %v42_v4 = vld [vmem:[%s305_s0 + $0x8] sm:$0xff]  ;;  %vm65_vm1 = vcmask 261120   ;;  %v159_v6 = vld [vmem:[#allocation4] ss:$0 sm:$0xff] }
  0x27   :  { %169 = vmatpush3.bf16.msra.mxu0 %v182_v1  ;;  %v43_v5 = vpack.c.bf16 %v42_v4, %v41_v3  ;;  %v163_v32 = vld [vmem:[#allocation4 + $0x1] ss:$0 sm:$0xff]  ;;  %v164_v34 = vld [vmem:[#allocation4 + $0x2] ss:$0 sm:$0xff] }
  0x28   :  { %170 = vmatprep.subr.bf16.mxu0 %v240_v0 }
  0x2b   :  { %171 = vmatpush3.bf16.msra.mxu0 %v183_v2 }
  0x2e   :  { %173 = vmatmul.mubr.msk.bf16.vlgmr.msra.gmra.mrb[0].mxu0 %vm65_vm1, %v43_v5 }
 0x101   :  { %v103_v7 = vpop.f32.mrb[0].mxu0 }
 0x102   :  { %v104_v8 = vadd.f32 %v159_v6, %v103_v7  ;;  %v174_v9 = vpop.f32.mrb[1].mxu0 }
 0x103   :  { %v106_v10 = vpop.f32.mrb[2].mxu0 }
 0x104   :  { %v107_v11 = vadd.f32 %v159_v6, %v106_v10  ;;  %v175_v12 = vpop.f32.mrb[3].mxu0  ;;  %v112_v13 = vsel %vm65_vm1, %v104_v8, 0.0 }
 0x105   :  { %113 = vadd.xlane.f32.xlu0 %v112_v13 }
 0x106   :  { %v115_v14 = vsel %vm65_vm1, %v107_v11, 0.0 }
 0x109   :  { %116 = vadd.xlane.f32.xlu0 %v115_v14 }
 0x192   :  { %v114_v15 = vpop.xlane.xlu0 %113 }
 0x193   :  { %v119_v16 = vmul.f32 0.03125, %v114_v15 }
 0x195   :  { %v121_v17 = vsub.f32 %v104_v8, %v119_v16 }
 0x196   :  { %v117_v18 = vpop.xlane.xlu0 %116 }
 0x197   :  { %v120_v19 = vmul.f32 0.03125, %v117_v18  ;;  %v123_v20 = vmul.f32 %v121_v17, %v121_v17 }
 0x199   :  { %v122_v21 = vsub.f32 %v107_v11, %v120_v19  ;;  %v125_v22 = vsel %vm65_vm1, %v123_v20, 0.0 }
 0x19a   :  { %126 = vadd.xlane.f32.xlu1 %v125_v22 }
 0x19b   :  { %v124_v23 = vmul.f32 %v122_v21, %v122_v21 }
 0x19d   :  { %v128_v24 = vsel %vm65_vm1, %v124_v23, 0.0 }
 0x19e   :  { %129 = vadd.xlane.f32.xlu1 %v128_v24 }
 0x227   :  { %v127_v25 = vpop.xlane.xlu1 %126 }
 0x228   :  { %v131_v26 = vmul.f32 0.03125, %v127_v25 }
 0x22a   :  { %v133_v27 = vadd.f32 1e-05, %v131_v26 }
 0x22b   :  { %v130_v28 = vpop.xlane.xlu1 %129 }
 0x22c   :  { %184 = vrsqrt.f32 %v133_v27  ;;  %v132_v29 = vmul.f32 0.03125, %v130_v28 }
 0x22e   :  { %v134_v30 = vadd.f32 1e-05, %v132_v29 }
 0x230   :  { %186 = vrsqrt.f32 %v134_v30 }
 0x236   :  { %v185_v31 = vpop.eup %184 }
 0x237   :  { %v137_v33 = vmul.f32 %v185_v31, %v121_v17 }
 0x239   :  { %v143_v35 = vmul.f32 %v163_v32, %v137_v33 }
 0x23a   :  { %v187_v36 = vpop.eup %186 }
 0x23b   :  { %v149_v37 = vadd.f32 %v164_v34, %v143_v35  ;;  %v138_v38 = vmul.f32 %v187_v36, %v122_v21 }
 0x23d   :  { %151 = vst.msk [vmem:[%s308_s3] sm:$0xff] %vm65_vm1, %v149_v37  ;;  %v144_v39 = vmul.f32 %v163_v32, %v138_v38 }
 0x23f   :  { %v150_v40 = vadd.f32 %v164_v34, %v144_v39 }
 0x241   :  { %152 = vst.msk [vmem:[%s308_s3 + $0x8] sm:$0xff] %vm65_vm1, %v150_v40 }
 0x242   :  { %157 = vsyncpa [#allocation3], 1 }
 0x243   :  { %158 = vsyncpa [#allocation5], 1 }

// kernel: squeeze.25
= control target key start
LH: loop header
LB: loop body
LE: loop exit
PB: predicated region body
PF: predicated region fallthrough
CT: control target
= control target key end

     0   :  { %s37_s8 = smov 110   ;;  %vm7_vm0 = vcmask 48128   ;;  %s38_s9 = smov 116   ;;  %s55_s0 = inlined_call_operand.vmem [shape: f32[24], index: 0, kind: input, shape index: {}]   ;;  %s56_s1 = inlined_call_operand.vmem [shape: f32[4,6], index: 1, kind: output, shape index: {}]  }
   0x1   :  { %v4_v0 = vld [vmem:[%s55_s0] sm:$0x1]  ;;  %s36_s0 = smov 122  }
   0x2   :  { %5 = vst [vmem:[#allocation1] sm:$0x1] %v4_v0 }
   0x9   :  { %v9_v1 = vld [vmem:[#allocation1] sm:$0x1]  }
   0xa   :  { %v21_v2 = vld [vmem:[#allocation1] sm:$0x1]   ;;  %10 = vrot.lane.b32.xlu0 %v9_v1, %s36_s0 }
   0xb   :  { %22 = vrot.lane.b32.xlu1 %v21_v2, %s37_s8  ;;  %v6_v3 = vld [vmem:[#allocation1] sm:$0x1]  }
   0xc   :  { %v15_v4 = vld [vmem:[#allocation1] sm:$0x1]   ;;  %8 = vst.msk [vmem:[#allocation0] sm:$0x1] %vm7_vm0, %v6_v3  }
   0xe   :  { %16 = vrot.lane.b32.xlu0 %v15_v4, %s38_s9 }
  0x7c   :  { %v11_v5 = vpop.permute.xlu0 %10  }
  0x7d   :  { %v23_v6 = vpop.permute.xlu1 %22   ;;  %14 = vst.msk [vmem:[#allocation0 + $0x1] sm:$0x1] %vm7_vm0, %v11_v5  }
  0x7e   :  { %26 = vst.msk [vmem:[#allocation0 + $0x3] sm:$0x1] %vm7_vm0, %v23_v6  }
  0x80   :  { %v17_v7 = vpop.permute.xlu0 %16  }
  0x81   :  { %20 = vst.msk [vmem:[#allocation0 + $0x2] sm:$0x1] %vm7_vm0, %v17_v7  }
  0x88   :  { %v30_v8 = vld [vmem:[#allocation0] sm:$0xf] }
  0x89   :  { %32 = vst [vmem:[%s56_s1] sm:$0xf] %v30_v8 }

// kernel: forward.9
= control target key start
LH: loop header
LB: loop body
LE: loop exit
PB: predicated region body
PF: predicated region fallthrough
CT: control target
= control target key end

     0   :  { %v541_v1 = vmov 0   ;;  %vm74_vm0 = vcmask 261120   ;;  %v188_v15 = vlaneseq  ;;  %v542_v20 = vmov 0.0   ;;  %s544_s29 = smov 32   ;;  %s545_s5 = smov 96   ;;  %s698_s2 = inlined_call_operand.vmem [shape: bf16[192,160], index: 2, kind: input, shape index: {}]   ;;  %s699_s1 = inlined_call_operand.vmem [shape: f32[14,32], index: 1, kind: input, shape index: {}]   ;;  %s700_s0 = inlined_call_operand.vmem [shape: f32[14,32], index: 0, kind: input, shape index: {}]   ;;  %s701_s3 = inlined_call_operand.vmem [shape: f32[8,160], index: 3, kind: input, shape index: {}]   ;;  %s702_s4 = inlined_call_operand.vmem [shape: f32[14,128], index: 4, kind: output, shape index: {}]  }
   0x1   :  { %v501_v0 = vld [vmem:[%s698_s2 + $0x24] ss:$8 sps:$4 sm:$0xff]   ;;  %110 = vmatprep.mubr.bf16.mxu0 %v541_v1  ;;  %v503_v2 = vld [vmem:[%s698_s2 + $0x20] ss:$8 sps:$4 sm:$0xff]   ;;  %v504_v3 = vld [vmem:[%s698_s2 + $0x34] ss:$8 sps:$4 sm:$0xff]   ;;  %471 = vmatprep.subr.bf16.mxu1 %v542_v20 }
   0x2   :  { %78 = vmatprep.subr.bf16.mxu0 %v501_v0  ;;  %v506_v4 = vld [vmem:[%s698_s2 + $0x30] ss:$8 sps:$4 sm:$0xff]   ;;  %v20_v5 = vld [vmem:[%s699_s1] sm:$0xff]  ;;  %v21_v6 = vld [vmem:[%s699_s1 + $0x8] sm:$0x3f]  ;;  %v189_v16 = vshrl.u32 %v188_v15, 7 }
   0x3   :  { %79 = vmatpush1.bf16.msra.mxu0 %v503_v2  ;;  %v509_v7 = vld [vmem:[%s698_s2 + $0x4] ss:$8 sps:$4 sm:$0xff]   ;;  %v53_v8 = vpack.c.bf16 %v21_v6, %v20_v5  ;;  %v507_v9 = vld [vmem:[%s698_s2] ss:$8 sps:$4 sm:$0xff]   ;;  %v512_v10 = vld [vmem:[%s698_s2 + $0x14] ss:$8 sps:$4 sm:$0xff]   ;;  %355 = vrot.lane.b32.xlu0 %v20_v5, %s544_s29 }
   0x4   :  { %80 = vmatprep.subr.bf16.mxu0 %v504_v3  ;;  %v510_v11 = vld [vmem:[%s698_s2 + $0x10] ss:$8 sps:$4 sm:$0xff]   ;;  %v606_v12 = vld [vmem:[%s700_s0] sm:$0xff]  ;;  %v611_v13 = vld [vmem:[%s700_s0 + $0x8] sm:$0x3f]  ;;  %v194_v18 = vsub.s32 1, %v189_v16 }
   0x5   :  { %v52_v14 = vpack.c.bf16 %v611_v13, %v606_v12  ;;  %v46_v17 = vld [vmem:[%s701_s3] ss:$8 sm:$0x3]  ;;  %v514_v22 = vld [vmem:[%s698_s2 + $0x50] ss:$8 sps:$4 sm:$0xff]   ;;  %vm543_vm1 = vmmov 0  }
   0x6   :  { %v513_v19 = vld [vmem:[%s698_s2 + $0x40] ss:$8 sps:$4 sm:$0xff]   ;;  %v195_v21 = vrot.slane %v46_v17, %v194_v18  ;;  %v516_v24 = vld [vmem:[%s698_s2 + $0x70] ss:$8 sps:$4 sm:$0xff]   ;;  %487 = vmatprep.mubr.msk.bf16.mxu1 %vm543_vm1, %v542_v20  ;;  %v190_v29 = vsub.s32 0, %v189_v16  ;;  %s546_s6 = smov 64  }
   0x7   :  { %81 = vmatpush1.bf16.msra.mxu0 %v506_v4  ;;  %472 = vmatpush3.bf16.msra.mxu1 %v513_v19  ;;  %v515_v23 = vld [vmem:[%s698_s2 + $0x60] ss:$8 sps:$4 sm:$0xff]   ;;  %v518_v26 = vld [vmem:[%s698_s2 + $0x90] ss:$8 sps:$4 sm:$0xff]   ;;  %vm243_vm2 = vcmask 259072   ;;  %vm434_vm3 = vcmask 269568  }
   0x8   :  { %144 = vmatprep.subr.bf16.mxu0 %v509_v7  ;;  %473 = vmatprep.subr.bf16.mxu1 %v542_v20  ;;  %v517_v25 = vld [vmem:[%s698_s2 + $0x80] ss:$8 sps:$4 sm:$0xff]   ;;  %v520_v28 = vld [vmem:[%s698_s2 + $0xb0] ss:$8 sps:$4 sm:$0xff]   ;;  %v191_v30 = vrot.slane %v46_v17, %v190_v29  ;;  %vm436_vm4 = vcmask 267520  }
   0x9   :  { %v519_v27 = vld [vmem:[%s698_s2 + $0xa0] ss:$8 sps:$4 sm:$0xff]   ;;  %357 = vrot.lane.b32.xlu0 %v21_v6, %s544_s29 }
   0xa   :  { %446 = vmatmul.mubr.msk.bf16.vlgmr.msra.gmra.mrb[0].mxu0 %vm74_vm0, %v53_v8  ;;  %v47_v58 = vld [vmem:[%s701_s3 + $0x1] ss:$0 sm:$0xff] }
   0xb   :  { %145 = vmatpush1.bf16.msra.mxu0 %v507_v9  ;;  %176 = vmatprep.mubr.bf16.mxu0 %v541_v1 }
   0xc   :  { %146 = vmatprep.subr.bf16.mxu0 %v512_v10  ;;  %474 = vmatpush3.bf16.msra.mxu1 %v514_v22 }
   0xd   :  { %475 = vmatprep.subr.bf16.mxu1 %v542_v20 }
   0xf   :  { %147 = vmatpush1.bf16.msra.mxu0 %v510_v11 }
  0x10   :  { %476 = vmatpush3.bf16.msra.mxu1 %v515_v23 }
  0x11   :  { %477 = vmatprep.subr.bf16.mxu1 %v542_v20 }
  0x14   :  { %478 = vmatpush3.bf16.msra.mxu1 %v516_v24 }
  0x15   :  { %479 = vmatprep.subr.bf16.mxu1 %v542_v20 }
  0x16   :  { %451 = vmatmul.mubr.msk.bf16.vlgmr.msra.gmra.mrb[0].mxu0 %vm74_vm0, %v52_v14 }
  0x18   :  { %480 = vmatpush3.bf16.msra.mxu1 %v517_v25 }
  0x19   :  { %481 = vmatprep.subr.bf16.mxu1 %v542_v20 }
  0x1c   :  { %482 = vmatpush3.bf16.msra.mxu1 %v518_v26 }
  0x1d   :  { %483 = vmatprep.subr.bf16.mxu1 %v542_v20 }
  0x20   :  { %484 = vmatpush3.bf16.msra.mxu1 %v519_v27 }
  0x21   :  { %485 = vmatprep.subr.bf16.mxu1 %v542_v20 }
  0x24   :  { %486 = vmatpush3.bf16.msra.mxu1 %v520_v28 }
  0x75   :  { %v356_v7 = vpop.permute.xlu0 %355 }
  0x7b   :  { %v358_v9 = vpop.permute.xlu0 %357 }
  0xe9   :  { %v178_v31 = vpop.f32.mrb[0].mxu0 }
  0xea   :  { %v198_v32 = vadd.f32 %v191_v30, %v178_v31  ;;  %v180_v33 = vpop.f32.mrb[1].mxu0 }
  0xeb   :  { %v645_v34 = vadd.f32 %v195_v21, %v180_v33  ;;  %v182_v35 = vpop.f32.mrb[2].mxu0 }
  0xec   :  { %v206_v36 = vmul.f32 0.044715, %v198_v32  ;;  %v200_v37 = vadd.f32 %v191_v30, %v182_v35  ;;  %v184_v38 = vpop.f32.mrb[3].mxu0  ;;  %v202_v52 = vmul.f32 0.5, %v198_v32 }
  0xed   :  { %v647_v39 = vadd.f32 %v195_v21, %v184_v38  ;;  %v207_v19 = vmul.f32 0.044715, %v645_v34  ;;  %v203_v35 = vmul.f32 0.5, %v645_v34 }
  0xee   :  { %v210_v40 = vmul.f32 %v206_v36, %v198_v32  ;;  %v208_v41 = vmul.f32 0.044715, %v200_v37  ;;  %v204_v53 = vmul.f32 0.5, %v200_v37 }
  0xef   :  { %v211_v20 = vmul.f32 %v207_v19, %v645_v34  ;;  %v209_v21 = vmul.f32 0.044715, %v647_v39 }
  0xf0   :  { %v214_v42 = vmul.f32 %v210_v40, %v198_v32  ;;  %v212_v43 = vmul.f32 %v208_v41, %v200_v37 }
  0xf1   :  { %v213_v22 = vmul.f32 %v209_v21, %v647_v39  ;;  %v215_v23 = vmul.f32 %v211_v20, %v645_v34 }
  0xf2   :  { %v216_v44 = vmul.f32 %v212_v43, %v200_v37  ;;  %v218_v45 = vadd.f32 %v214_v42, %v198_v32  ;;  %v48_v42 = vld [vmem:[%s701_s3 + $0x2] ss:$0 sm:$0xff] }
  0xf3   :  { %v219_v24 = vadd.f32 %v215_v23, %v645_v34  ;;  %v217_v25 = vmul.f32 %v213_v22, %v647_v39 }
  0xf4   :  { %v220_v46 = vadd.f32 %v216_v44, %v200_v37  ;;  %v222_v47 = vmul.f32 0.7978846, %v218_v45  ;;  %v205_v45 = vmul.f32 0.5, %v647_v39 }
  0xf5   :  { %v223_v26 = vmul.f32 0.7978846, %v219_v24  ;;  %v221_v27 = vadd.f32 %v217_v25, %v647_v39 }
  0xf6   :  { %v224_v48 = vmul.f32 0.7978846, %v220_v46  ;;  %521 = vtanh.f32 %v222_v47 }
  0xf7   :  { %v225_v28 = vmul.f32 0.7978846, %v221_v27 }
  0xf8   :  { %523 = vtanh.f32 %v224_v48 }
 0x100   :  { %v522_v49 = vpop.eup %521 }
 0x101   :  { %v230_v50 = vadd.f32 1.0, %v522_v49 }
 0x102   :  { %v524_v51 = vpop.eup %523 }
 0x103   :  { %v232_v54 = vadd.f32 1.0, %v524_v51  ;;  %v234_v55 = vmul.f32 %v230_v50, %v202_v52 }
 0x105   :  { %v236_v56 = vmul.f32 %v232_v54, %v204_v53 }
 0x107   :  { %v249_v57 = vpack.c.bf16 %v236_v56, %v234_v55 }
 0x109   :  { %488 = vmatmul.mubr.bf16.vlgmr.msra.gmra.mrb[0].mxu1 %v249_v57 }
 0x1dc   :  { %v332_v59 = vpop.f32.mrb[0].mxu1 }
 0x1dd   :  { %v333_v60 = vadd.f32 %v332_v59, %v47_v58  ;;  %v489_v61 = vpop.f32.mrb[1].mxu1 }
 0x1de   :  { %v335_v62 = vpop.f32.mrb[2].mxu1 }
 0x1df   :  { %v460_v63 = vmul.f32 -1.442695, %v333_v60  ;;  %v336_v0 = vadd.f32 %v335_v62, %v47_v58  ;;  %375 = vrot.lane.b32.xlu1 %v333_v60, %s545_s5  ;;  %v490_v1 = vpop.f32.mrb[3].mxu1  ;;  %v51_v62 = vld [vmem:[%s701_s3 + $0x5] ss:$0 sm:$0xff] }
 0x1e1   :  { %525 = vpow2.f32 %v460_v63  ;;  %v461_v2 = vmul.f32 -1.442695, %v336_v0 }
 0x1e3   :  { %527 = vpow2.f32 %v461_v2  ;;  %377 = vrot.lane.b32.xlu1 %v336_v0, %s545_s5 }
 0x1eb   :  { %v526_v3 = vpop.eup %525 }
 0x1ec   :  { %v345_v4 = vadd.f32 1.0, %v526_v3 }
 0x1ed   :  { %v528_v5 = vpop.eup %527 }
 0x1ee   :  { %529 = vrcp.f32 %v345_v4  ;;  %v346_v6 = vadd.f32 1.0, %v528_v5 }
 0x1f0   :  { %531 = vrcp.f32 %v346_v6 }
 0x1f1   :  { %533 = vtanh.f32 %v223_v26 }
 0x1f2   :  { %535 = vtanh.f32 %v225_v28 }
 0x1f8   :  { %v530_v8 = vpop.eup %529 }
 0x1f9   :  { %v361_v10 = vmul.f32 %v530_v8, %v356_v7  ;;  %v351_v33 = vmul.f32 %v530_v8, %v606_v12 }
 0x1fa   :  { %v532_v11 = vpop.eup %531 }
 0x1fb   :  { %v362_v14 = vmul.f32 %v532_v11, %v358_v9  ;;  %365 = vrot.lane.b32.xlu0 %v361_v10, %s545_s5  ;;  %v534_v29 = vpop.eup %533  ;;  %v352_v43 = vmul.f32 %v532_v11, %v611_v13  ;;  %v49_v10 = vld [vmem:[%s701_s3 + $0x3] ss:$0 sm:$0xff] }
 0x1fc   :  { %v231_v30 = vadd.f32 1.0, %v534_v29  ;;  %v536_v31 = vpop.eup %535 }
 0x1fd   :  { %367 = vrot.lane.b32.xlu1 %v362_v14, %s545_s5  ;;  %v233_v38 = vadd.f32 1.0, %v536_v31  ;;  %v50_v14 = vld [vmem:[%s701_s3 + $0x4] ss:$0 sm:$0xff] }
 0x1fe   :  { %v235_v37 = vmul.f32 %v231_v30, %v203_v35 }
 0x1ff   :  { %v237_v48 = vmul.f32 %v233_v38, %v205_v45 }
 0x200   :  { %v238_v12 = vmul.f32 %v235_v37, %v48_v42 }
 0x201   :  { %v239_v52 = vmul.f32 %v237_v48, %v48_v42 }
 0x202   :  { %v240_v50 = vsel %vm74_vm0, %v238_v12, 0.0 }
 0x203   :  { %v244_v13 = vsel %vm243_vm2, %v239_v52, 0.0 }
 0x251   :  { %v376_v15 = vpop.permute.xlu1 %375 }
 0x252   :  { %v381_v16 = vmul.f32 %v530_v8, %v376_v15 }
 0x254   :  { %385 = vrot.lane.b32.xlu0 %v381_v16, %s546_s6 }
 0x255   :  { %v378_v17 = vpop.permute.xlu1 %377 }
 0x256   :  { %v382_v18 = vmul.f32 %v532_v11, %v378_v17 }
 0x258   :  { %387 = vrot.lane.b32.xlu1 %v382_v18, %s546_s6 }
 0x26d   :  { %v366_v32 = vpop.permute.xlu0 %365 }
 0x26e   :  { %v371_v36 = vadd.f32 %v366_v32, %v351_v33 }
 0x26f   :  { %v368_v40 = vpop.permute.xlu1 %367 }
 0x270   :  { %v372_v46 = vadd.f32 %v368_v40, %v352_v43 }
 0x2c6   :  { %v386_v41 = vpop.permute.xlu0 %385 }
 0x2c7   :  { %v391_v44 = vadd.f32 %v386_v41, %v371_v36 }
 0x2c9   :  { %v393_v47 = vsel %vm74_vm0, %v391_v44, 0.0 }
 0x2ca   :  { %394 = vadd.xlane.f32.xlu0 %v393_v47  ;;  %v388_v34 = vpop.permute.xlu1 %387 }
 0x2cb   :  { %v392_v49 = vadd.f32 %v388_v34, %v372_v46 }
 0x2cd   :  { %v396_v51 = vsel %vm243_vm2, %v392_v49, 0.0 }
 0x2ce   :  { %241 = vadd.xlane.f32.xlu0 %v240_v50  ;;  %397 = vadd.xlane.f32.xlu1 %v396_v51 }
 0x2d2   :  { %245 = vadd.xlane.f32.xlu0 %v244_v13 }
 0x357   :  { %v395_v39 = vpop.xlane.xlu0 %394 }
 0x358   :  { %v400_v53 = vmul.f32 0.03125, %v395_v39 }
 0x35a   :  { %v402_v54 = vsub.f32 %v391_v44, %v400_v53 }
 0x35b   :  { %v398_v55 = vpop.xlane.xlu1 %397  ;;  %v242_v63 = vpop.xlane.xlu0 %241 }
 0x35c   :  { %v401_v56 = vmul.f32 0.03125, %v398_v55  ;;  %v404_v57 = vmul.f32 %v402_v54, %v402_v54  ;;  %v247_v0 = vadd.f32 %v242_v63, %v51_v62 }
 0x35e   :  { %v403_v58 = vsub.f32 %v392_v49, %v401_v56  ;;  %v406_v59 = vsel %vm74_vm0, %v404_v57, 0.0 }
 0x35f   :  { %407 = vadd.xlane.f32.xlu1 %v406_v59  ;;  %v246_v1 = vpop.xlane.xlu0 %245 }
 0x360   :  { %v405_v60 = vmul.f32 %v403_v58, %v403_v58  ;;  %v248_v2 = vadd.f32 %v246_v1, %v51_v62 }
 0x362   :  { %v409_v61 = vsel %vm243_vm2, %v405_v60, 0.0 }
 0x363   :  { %410 = vadd.xlane.f32.xlu0 %v409_v61 }
 0x370   :  { %428 = vrot.lane.b32.xlu1 %v247_v0, %s544_s29 }
 0x379   :  { %430 = vrot.lane.b32.xlu0 %v248_v2, %s544_s29 }
 0x3ec   :  { %v408_v3 = vpop.xlane.xlu1 %407 }
 0x3ed   :  { %v412_v4 = vmul.f32 0.03125, %v408_v3 }
 0x3ef   :  { %v414_v5 = vadd.f32 1e-05, %v412_v4 }
 0x3f0   :  { %v411_v6 = vpop.xlane.xlu0 %410  ;;  %v429_v19 = vpop.permute.xlu1 %428 }
 0x3f1   :  { %537 = vrsqrt.f32 %v414_v5  ;;  %v413_v7 = vmul.f32 0.03125, %v411_v6 }
 0x3f3   :  { %v415_v8 = vadd.f32 1e-05, %v413_v7 }
 0x3f4   :  { %v431_v22 = vpop.permute.xlu0 %430 }
 0x3f5   :  { %539 = vrsqrt.f32 %v415_v8 }
 0x3fb   :  { %v538_v9 = vpop.eup %537 }
 0x3fc   :  { %v418_v11 = vmul.f32 %v538_v9, %v402_v54 }
 0x3fe   :  { %v420_v15 = vmul.f32 %v418_v11, %v49_v10 }
 0x3ff   :  { %v540_v16 = vpop.eup %539 }
 0x400   :  { %v422_v17 = vadd.f32 %v420_v15, %v50_v14  ;;  %v419_v18 = vmul.f32 %v540_v16, %v403_v58 }
 0x402   :  { %424 = vst.msk [vmem:[%s702_s4] sm:$0xff] %vm74_vm0, %v422_v17  ;;  %v421_v20 = vmul.f32 %v419_v18, %v49_v10 }
 0x403   :  { %435 = vst.msk [vmem:[%s702_s4] sm:$0xff] %vm434_vm3, %v429_v19 }
 0x404   :  { %v423_v21 = vadd.f32 %v421_v20, %v50_v14 }
 0x406   :  { %425 = vst.msk [vmem:[%s702_s4 + $0x8] sm:$0x3f] %vm243_vm2, %v423_v21 }
 0x407   :  { %437 = vst.msk [vmem:[%s702_s4 + $0x8] sm:$0x3f] %vm436_vm4, %v431_v22 }

// kernel: forward.10
= control target key start
LH: loop header
LB: loop body
LE: loop exit
PB: predicated region body
PF: predicated region fallthrough
CT: control target
= control target key end

     0   :  { %v658_v1 = vmov 0   ;;  %vm78_vm0 = vcmask 261120   ;;  %v214_v19 = vlaneseq  ;;  %s659_s7 = smov 32   ;;  %s660_s9 = smov 96   ;;  %vm539_vm1 = vcmask 269568   ;;  %s845_s2 = inlined_call_operand.vmem [shape: bf16[192,160], index: 2, kind: input, shape index: {}]   ;;  %s846_s1 = inlined_call_operand.vmem [shape: f32[24,32], index: 1, kind: input, shape index: {}]   ;;  %s847_s0 = inlined_call_operand.vmem [shape: f32[24,32], index: 0, kind: input, shape index: {}]   ;;  %s848_s3 = inlined_call_operand.vmem [shape: f32[8,160], index: 3, kind: input, shape index: {}]   ;;  %s849_s4 = inlined_call_operand.vmem [shape: f32[24,128], index: 4, kind: output, shape index: {}]  }
   0x1   :  { %v608_v0 = vld [vmem:[%s845_s2 + $0x24] ss:$8 sps:$4 sm:$0xff]   ;;  %117 = vmatprep.mubr.bf16.mxu0 %v658_v1  ;;  %v610_v2 = vld [vmem:[%s845_s2 + $0x20] ss:$8 sps:$4 sm:$0xff]   ;;  %v611_v3 = vld [vmem:[%s845_s2 + $0x34] ss:$8 sps:$4 sm:$0xff]  }
   0x2   :  { %85 = vmatprep.subr.bf16.mxu0 %v608_v0  ;;  %v613_v4 = vld [vmem:[%s845_s2 + $0x30] ss:$8 sps:$4 sm:$0xff]   ;;  %v21_v5 = vld [vmem:[%s846_s1] sm:$0xff]  ;;  %v22_v6 = vld [vmem:[%s846_s1 + $0x8] sm:$0xff]  ;;  %v215_v20 = vshrl.u32 %v214_v19, 7  ;;  %s661_s10 = smov 64  }
   0x3   :  { %86 = vmatpush1.bf16.msra.mxu0 %v610_v2  ;;  %v616_v7 = vld [vmem:[%s845_s2 + $0x4] ss:$8 sps:$4 sm:$0xff]   ;;  %v56_v8 = vpack.c.bf16 %v22_v6, %v21_v5  ;;  %v614_v9 = vld [vmem:[%s845_s2] ss:$8 sps:$4 sm:$0xff]   ;;  %v619_v10 = vld [vmem:[%s845_s2 + $0x14] ss:$8 sps:$4 sm:$0xff]   ;;  %421 = vrot.lane.b32.xlu0 %v21_v5, %s659_s7 }
   0x4   :  { %87 = vmatprep.subr.bf16.mxu0 %v611_v3  ;;  %v23_v11 = vld [vmem:[%s846_s1 + $0x10] sm:$0xff]  ;;  %v725_v14 = vld [vmem:[%s847_s0] sm:$0xff]  ;;  %v730_v15 = vld [vmem:[%s847_s0 + $0x8] sm:$0xff]  ;;  %v220_v22 = vsub.s32 1, %v215_v20  ;;  %v216_v34 = vsub.s32 0, %v215_v20 }
   0x5   :  { %v617_v12 = vld [vmem:[%s845_s2 + $0x10] ss:$8 sps:$4 sm:$0xff]   ;;  %v57_v13 = vpack.c.bf16 %v23_v11, %v23_v11  ;;  %v54_v16 = vpack.c.bf16 %v730_v15, %v725_v14  ;;  %v48_v21 = vld [vmem:[%s848_s3] ss:$8 sm:$0x3]  ;;  %425 = vrot.lane.b32.xlu1 %v23_v11, %s659_s7 }
   0x6   :  { %v738_v17 = vld [vmem:[%s847_s0 + $0x10] sm:$0xff]  ;;  %v221_v23 = vrot.slane %v48_v21, %v220_v22  ;;  %v620_v24 = vld [vmem:[%s845_s2 + $0x40] ss:$8 sps:$4 sm:$0xff]   ;;  %v217_v37 = vrot.slane %v48_v21, %v216_v34 }
   0x7   :  { %88 = vmatpush1.bf16.msra.mxu0 %v613_v4  ;;  %v55_v18 = vpack.c.bf16 %v738_v17, %v738_v17  ;;  %580 = vmatprep.subr.bf16.mxu1 %v620_v24  ;;  %v621_v25 = vld [vmem:[%s845_s2 + $0x50] ss:$8 sps:$4 sm:$0xff]   ;;  %v622_v26 = vld [vmem:[%s845_s2 + $0x60] ss:$8 sps:$4 sm:$0xff]  }
   0x8   :  { %162 = vmatprep.subr.bf16.mxu0 %v616_v7  ;;  %581 = vmatpush3.bf16.msra.mxu1 %v620_v24  ;;  %v623_v27 = vld [vmem:[%s845_s2 + $0x70] ss:$8 sps:$4 sm:$0xff]   ;;  %v624_v28 = vld [vmem:[%s845_s2 + $0x80] ss:$8 sps:$4 sm:$0xff]  }
   0x9   :  { %582 = vmatprep.subr.bf16.mxu1 %v621_v25  ;;  %v625_v29 = vld [vmem:[%s845_s2 + $0x90] ss:$8 sps:$4 sm:$0xff]   ;;  %v626_v30 = vld [vmem:[%s845_s2 + $0xa0] ss:$8 sps:$4 sm:$0xff]   ;;  %423 = vrot.lane.b32.xlu0 %v22_v6, %s659_s7 }
   0xa   :  { %551 = vmatmul.mubr.msk.bf16.vlgmr.msra.gmra.mrb[0].mxu0 %vm78_vm0, %v56_v8  ;;  %v627_v31 = vld [vmem:[%s845_s2 + $0xb0] ss:$8 sps:$4 sm:$0xff]   ;;  %v49_v22 = vld [vmem:[%s848_s3 + $0x1] ss:$0 sm:$0xff] }
   0xb   :  { %163 = vmatpush1.bf16.msra.mxu0 %v614_v9  ;;  %127 = vmatprep.mubr.bf16.mxu0 %v658_v1 }
   0xc   :  { %164 = vmatprep.subr.bf16.mxu0 %v619_v10  ;;  %583 = vmatpush3.bf16.msra.mxu1 %v621_v25 }
   0xd   :  { %584 = vmatprep.subr.bf16.mxu1 %v622_v26 }
   0xf   :  { %165 = vmatpush1.bf16.msra.mxu0 %v617_v12 }
  0x10   :  { %585 = vmatpush3.bf16.msra.mxu1 %v622_v26 }
  0x11   :  { %586 = vmatprep.subr.bf16.mxu1 %v623_v27 }
  0x12   :  { %552 = vmatmul.mubr.msk.bf16.gmra.mrb[4].mxu0 %vm78_vm0, %v57_v13 }
  0x13   :  { %194 = vmatprep.mubr.bf16.mxu0 %v658_v1 }
  0x14   :  { %587 = vmatpush3.bf16.msra.mxu1 %v623_v27 }
  0x15   :  { %588 = vmatprep.subr.bf16.mxu1 %v624_v28 }
  0x18   :  { %589 = vmatpush3.bf16.msra.mxu1 %v624_v28 }
  0x19   :  { %590 = vmatprep.subr.bf16.mxu1 %v625_v29 }
  0x1a   :  { %557 = vmatmul.mubr.msk.bf16.vlgmr.msra.gmra.mrb[0].mxu0 %vm78_vm0, %v54_v16 }
  0x1b   :  { %204 = vmatprep.mubr.bf16.mxu0 %v658_v1 }
  0x1c   :  { %591 = vmatpush3.bf16.msra.mxu1 %v625_v29 }
  0x1d   :  { %592 = vmatprep.subr.bf16.mxu1 %v626_v30 }
  0x20   :  { %593 = vmatpush3.bf16.msra.mxu1 %v626_v30 }
  0x21   :  { %594 = vmatprep.subr.bf16.mxu1 %v627_v31 }
  0x22   :  { %558 = vmatmul.mubr.msk.bf16.gmra.mrb[8].mxu0 %vm78_vm0, %v55_v18 }
  0x24   :  { %595 = vmatpush3.bf16.msra.mxu1 %v627_v31 }
  0xe5   :  { %v129_v32 = vpop.f32.mrb[4].mxu0 }
  0xe6   :  { %v131_v33 = vpop.f32.mrb[5].mxu0 }
  0xe7   :  { %v133_v35 = vpop.f32.mrb[6].mxu0 }
  0xe8   :  { %v134_v36 = vpop.f32.mrb[7].mxu0 }
  0xed   :  { %v196_v38 = vpop.f32.mrb[0].mxu0 }
  0xee   :  { %v224_v39 = vadd.f32 %v217_v37, %v196_v38  ;;  %v198_v40 = vpop.f32.mrb[1].mxu0 }
  0xef   :  { %v773_v41 = vadd.f32 %v221_v23, %v198_v40  ;;  %v200_v42 = vpop.f32.mrb[2].mxu0  ;;  %v426_v40 = vpop.permute.xlu1 %425 }
  0xf0   :  { %v236_v43 = vmul.f32 0.044715, %v224_v39  ;;  %v226_v44 = vadd.f32 %v217_v37, %v200_v42  ;;  %v202_v45 = vpop.f32.mrb[3].mxu0  ;;  %v230_v8 = vmul.f32 0.5, %v224_v39 }
  0xf1   :  { %v775_v46 = vadd.f32 %v221_v23, %v202_v45 }
  0xf2   :  { %v238_v47 = vmul.f32 0.044715, %v226_v44  ;;  %v242_v48 = vmul.f32 %v236_v43, %v224_v39  ;;  %v232_v9 = vmul.f32 0.5, %v226_v44 }
  0xf4   :  { %v244_v49 = vmul.f32 %v238_v47, %v226_v44  ;;  %v248_v50 = vmul.f32 %v242_v48, %v224_v39 }
  0xf5   :  { %v206_v51 = vpop.f32.mrb[8].mxu0 }
  0xf6   :  { %v207_v52 = vadd.f32 %v206_v51, %v129_v32  ;;  %v208_v53 = vpop.f32.mrb[9].mxu0  ;;  %v250_v54 = vmul.f32 %v244_v49, %v226_v44  ;;  %v254_v55 = vadd.f32 %v248_v50, %v224_v39  ;;  %v422_v39 = vpop.permute.xlu0 %421 }
  0xf7   :  { %v209_v56 = vadd.f32 %v208_v53, %v131_v33  ;;  %v210_v57 = vpop.f32.mrb[10].mxu0 }
  0xf8   :  { %v228_v58 = vadd.f32 %v217_v37, %v207_v52  ;;  %v211_v59 = vpop.f32.mrb[11].mxu0  ;;  %v256_v60 = vadd.f32 %v250_v54, %v226_v44  ;;  %v260_v61 = vmul.f32 0.7978846, %v254_v55  ;;  %v237_v57 = vmul.f32 0.044715, %v773_v41 }
  0xf9   :  { %v777_v62 = vadd.f32 %v221_v23, %v209_v56  ;;  %v239_v56 = vmul.f32 0.044715, %v775_v46 }
  0xfa   :  { %v240_v63 = vmul.f32 0.044715, %v228_v58  ;;  %v262_v0 = vmul.f32 0.7978846, %v256_v60  ;;  %628 = vtanh.f32 %v260_v61  ;;  %v234_v18 = vmul.f32 0.5, %v228_v58  ;;  %v424_v44 = vpop.permute.xlu0 %423 }
  0xfb   :  { %v243_v59 = vmul.f32 %v237_v57, %v773_v41  ;;  %v241_v60 = vmul.f32 0.044715, %v777_v62 }
  0xfc   :  { %630 = vtanh.f32 %v262_v0  ;;  %v246_v1 = vmul.f32 %v240_v63, %v228_v58 }
  0xfd   :  { %v249_v63 = vmul.f32 %v243_v59, %v773_v41  ;;  %v247_v0 = vmul.f32 %v241_v60, %v777_v62  ;;  %v53_v60 = vld [vmem:[%s848_s3 + $0x5] ss:$0 sm:$0xff] }
  0xfe   :  { %v252_v2 = vmul.f32 %v246_v1, %v228_v58 }
 0x100   :  { %v258_v3 = vadd.f32 %v252_v2, %v228_v58  ;;  %v245_v58 = vmul.f32 %v239_v56, %v775_v46  ;;  %v255_v2 = vadd.f32 %v249_v63, %v773_v41 }
 0x102   :  { %v264_v4 = vmul.f32 0.7978846, %v258_v3  ;;  %v251_v61 = vmul.f32 %v245_v58, %v775_v46  ;;  %v253_v3 = vmul.f32 %v247_v0, %v777_v62 }
 0x104   :  { %v629_v5 = vpop.eup %628  ;;  %632 = vtanh.f32 %v264_v4  ;;  %v257_v1 = vadd.f32 %v251_v61, %v775_v46 }
 0x105   :  { %v272_v6 = vadd.f32 1.0, %v629_v5  ;;  %v261_v5 = vmul.f32 0.7978846, %v255_v2 }
 0x106   :  { %v631_v7 = vpop.eup %630  ;;  %v263_v4 = vmul.f32 0.7978846, %v257_v1 }
 0x107   :  { %v274_v10 = vadd.f32 1.0, %v631_v7  ;;  %v278_v11 = vmul.f32 %v272_v6, %v230_v8  ;;  %v259_v6 = vadd.f32 %v253_v3, %v777_v62 }
 0x109   :  { %v280_v12 = vmul.f32 %v274_v10, %v232_v9  ;;  %v265_v7 = vmul.f32 0.7978846, %v259_v6 }
 0x10b   :  { %v299_v13 = vpack.c.bf16 %v280_v12, %v278_v11 }
 0x10d   :  { %596 = vmatprep.mubr.bf16.mxu1 %v299_v13 }
 0x10e   :  { %v633_v16 = vpop.eup %632 }
 0x10f   :  { %v276_v19 = vadd.f32 1.0, %v633_v16 }
 0x111   :  { %v282_v20 = vmul.f32 %v276_v19, %v234_v18 }
 0x113   :  { %v300_v21 = vpack.c.bf16 %v282_v20, %v282_v20 }
 0x115   :  { %597 = vmatmul.mubr.bf16.vlgmr.msra.gmra.mrb[0].mxu1 %v300_v21  ;;  %v233_v21 = vmul.f32 0.5, %v775_v46  ;;  %v50_v46 = vld [vmem:[%s848_s3 + $0x2] ss:$0 sm:$0xff] }
 0x1e8   :  { %v598_v23 = vpop.f32.mrb[0].mxu1 }
 0x1e9   :  { %v392_v24 = vadd.f32 %v598_v23, %v49_v22  ;;  %v383_v25 = vpop.f32.mrb[1].mxu1 }
 0x1ea   :  { %v384_v26 = vadd.f32 %v383_v25, %v49_v22  ;;  %v599_v27 = vpop.f32.mrb[2].mxu1 }
 0x1eb   :  { %v569_v28 = vmul.f32 -1.442695, %v392_v24  ;;  %v386_v29 = vpop.f32.mrb[3].mxu1 }
 0x1ec   :  { %v567_v30 = vmul.f32 -1.442695, %v384_v26  ;;  %v387_v31 = vadd.f32 %v386_v29, %v49_v22  ;;  %451 = vrot.lane.b32.xlu1 %v384_v26, %s660_s9 }
 0x1ed   :  { %634 = vpow2.f32 %v569_v28 }
 0x1ee   :  { %636 = vpow2.f32 %v567_v30  ;;  %v568_v32 = vmul.f32 -1.442695, %v387_v31  ;;  %453 = vrot.lane.b32.xlu0 %v387_v31, %s660_s9 }
 0x1f0   :  { %638 = vpow2.f32 %v568_v32  ;;  %455 = vrot.lane.b32.xlu1 %v392_v24, %s660_s9  ;;  %v231_v24 = vmul.f32 0.5, %v773_v41 }
 0x1f7   :  { %v635_v33 = vpop.eup %634 }
 0x1f8   :  { %v637_v34 = vpop.eup %636  ;;  %v408_v35 = vadd.f32 1.0, %v635_v33 }
 0x1f9   :  { %v406_v36 = vadd.f32 1.0, %v637_v34 }
 0x1fa   :  { %v639_v37 = vpop.eup %638  ;;  %640 = vrcp.f32 %v408_v35  ;;  %v235_v35 = vmul.f32 0.5, %v777_v62 }
 0x1fb   :  { %v407_v38 = vadd.f32 1.0, %v639_v37  ;;  %642 = vrcp.f32 %v406_v36 }
 0x1fd   :  { %644 = vrcp.f32 %v407_v38 }
 0x1fe   :  { %646 = vtanh.f32 %v263_v4 }
 0x1ff   :  { %648 = vtanh.f32 %v261_v5 }
 0x200   :  { %650 = vtanh.f32 %v265_v7 }
 0x204   :  { %v641_v42 = vpop.eup %640 }
 0x205   :  { %v432_v43 = vmul.f32 %v641_v42, %v426_v40  ;;  %v643_v45 = vpop.eup %642  ;;  %v417_v25 = vmul.f32 %v641_v42, %v738_v17 }
 0x206   :  { %v430_v49 = vmul.f32 %v643_v45, %v422_v39  ;;  %v415_v13 = vmul.f32 %v643_v45, %v725_v14 }
 0x207   :  { %v645_v47 = vpop.eup %644  ;;  %440 = vrot.lane.b32.xlu0 %v432_v43, %s660_s9 }
 0x208   :  { %v431_v48 = vmul.f32 %v645_v47, %v424_v44  ;;  %v647_v9 = vpop.eup %646  ;;  %v416_v19 = vmul.f32 %v645_v47, %v730_v15 }
 0x209   :  { %v649_v10 = vpop.eup %648  ;;  %v275_v16 = vadd.f32 1.0, %v647_v9 }
 0x20a   :  { %438 = vrot.lane.b32.xlu1 %v431_v48, %s660_s9  ;;  %v273_v18 = vadd.f32 1.0, %v649_v10  ;;  %v651_v22 = vpop.eup %650 }
 0x20b   :  { %436 = vrot.lane.b32.xlu0 %v430_v49, %s660_s9  ;;  %v281_v28 = vmul.f32 %v275_v16, %v233_v21  ;;  %v277_v33 = vadd.f32 1.0, %v651_v22 }
 0x20c   :  { %v279_v30 = vmul.f32 %v273_v18, %v231_v24 }
 0x20d   :  { %v285_v17 = vmul.f32 %v281_v28, %v50_v46  ;;  %v283_v38 = vmul.f32 %v277_v33, %v235_v35 }
 0x20e   :  { %v284_v37 = vmul.f32 %v279_v30, %v50_v46 }
 0x20f   :  { %v290_v39 = vsel %vm78_vm0, %v285_v17, 0.0 }
 0x210   :  { %v287_v40 = vsel %vm78_vm0, %v284_v37, 0.0 }
 0x25e   :  { %v452_v50 = vpop.permute.xlu1 %451 }
 0x25f   :  { %v460_v51 = vmul.f32 %v643_v45, %v452_v50 }
 0x260   :  { %v454_v52 = vpop.permute.xlu0 %453 }
 0x261   :  { %v461_v53 = vmul.f32 %v645_v47, %v454_v52  ;;  %466 = vrot.lane.b32.xlu1 %v460_v51, %s661_s10 }
 0x262   :  { %v456_v54 = vpop.permute.xlu1 %455 }
 0x263   :  { %v462_v55 = vmul.f32 %v641_v42, %v456_v54  ;;  %468 = vrot.lane.b32.xlu0 %v461_v53, %s661_s10  ;;  %v286_v42 = vmul.f32 %v283_v38, %v50_v46 }
 0x265   :  { %470 = vrot.lane.b32.xlu1 %v462_v55, %s661_s10  ;;  %v293_v43 = vsel %vm78_vm0, %v286_v42, 0.0 }
 0x279   :  { %v441_v8 = vpop.permute.xlu0 %440 }
 0x27a   :  { %v447_v31 = vadd.f32 %v441_v8, %v417_v25 }
 0x27c   :  { %v439_v11 = vpop.permute.xlu1 %438 }
 0x27d   :  { %v437_v12 = vpop.permute.xlu0 %436  ;;  %v446_v26 = vadd.f32 %v439_v11, %v416_v19  ;;  %v52_v19 = vld [vmem:[%s848_s3 + $0x4] ss:$0 sm:$0xff] }
 0x27e   :  { %v445_v20 = vadd.f32 %v437_v12, %v415_v13  ;;  %v51_v13 = vld [vmem:[%s848_s3 + $0x3] ss:$0 sm:$0xff] }
 0x2d3   :  { %v467_v23 = vpop.permute.xlu1 %466 }
 0x2d4   :  { %v475_v27 = vadd.f32 %v467_v23, %v445_v20 }
 0x2d5   :  { %v469_v29 = vpop.permute.xlu0 %468 }
 0x2d6   :  { %v476_v14 = vadd.f32 %v469_v29, %v446_v26  ;;  %v478_v32 = vsel %vm78_vm0, %v475_v27, 0.0 }
 0x2d7   :  { %v471_v15 = vpop.permute.xlu1 %470  ;;  %479 = vadd.xlane.f32.xlu0 %v478_v32 }
 0x2d8   :  { %v477_v34 = vadd.f32 %v471_v15, %v447_v31  ;;  %v481_v41 = vsel %vm78_vm0, %v476_v14, 0.0 }
 0x2d9   :  { %482 = vadd.xlane.f32.xlu1 %v481_v41 }
 0x2da   :  { %v484_v36 = vsel %vm78_vm0, %v477_v34, 0.0 }
 0x2db   :  { %485 = vadd.xlane.f32.xlu0 %v484_v36 }
 0x2dd   :  { %291 = vadd.xlane.f32.xlu1 %v290_v39 }
 0x2df   :  { %288 = vadd.xlane.f32.xlu0 %v287_v40 }
 0x2e3   :  { %294 = vadd.xlane.f32.xlu0 %v293_v43 }
 0x364   :  { %v480_v44 = vpop.xlane.xlu0 %479 }
 0x365   :  { %v488_v45 = vmul.f32 0.03125, %v480_v44 }
 0x366   :  { %v483_v47 = vpop.xlane.xlu1 %482 }
 0x367   :  { %v491_v62 = vsub.f32 %v475_v27, %v488_v45  ;;  %v489_v48 = vmul.f32 0.03125, %v483_v47 }
 0x368   :  { %v486_v49 = vpop.xlane.xlu0 %485 }
 0x369   :  { %v492_v50 = vsub.f32 %v476_v14, %v489_v48  ;;  %v490_v51 = vmul.f32 0.03125, %v486_v49  ;;  %v494_v52 = vmul.f32 %v491_v62, %v491_v62 }
 0x36a   :  { %v292_v61 = vpop.xlane.xlu1 %291 }
 0x36b   :  { %v493_v53 = vsub.f32 %v477_v34, %v490_v51  ;;  %v497_v54 = vsel %vm78_vm0, %v494_v52, 0.0  ;;  %v495_v55 = vmul.f32 %v492_v50, %v492_v50  ;;  %v297_v63 = vadd.f32 %v292_v61, %v53_v60 }
 0x36c   :  { %498 = vadd.xlane.f32.xlu1 %v497_v54  ;;  %v289_v59 = vpop.xlane.xlu0 %288 }
 0x36d   :  { %v500_v56 = vsel %vm78_vm0, %v495_v55, 0.0  ;;  %v496_v57 = vmul.f32 %v493_v53, %v493_v53  ;;  %v296_v1 = vadd.f32 %v289_v59, %v53_v60 }
 0x36e   :  { %501 = vadd.xlane.f32.xlu0 %v500_v56 }
 0x36f   :  { %v503_v58 = vsel %vm78_vm0, %v496_v57, 0.0 }
 0x370   :  { %504 = vadd.xlane.f32.xlu1 %v503_v58  ;;  %v295_v0 = vpop.xlane.xlu0 %294 }
 0x371   :  { %v298_v2 = vadd.f32 %v295_v0, %v53_v60 }
 0x381   :  { %532 = vrot.lane.b32.xlu1 %v297_v63, %s659_s7 }
 0x384   :  { %530 = vrot.lane.b32.xlu0 %v296_v1, %s659_s7 }
 0x385   :  { %534 = vrot.lane.b32.xlu1 %v298_v2, %s659_s7 }
 0x3f9   :  { %v499_v3 = vpop.xlane.xlu1 %498 }
 0x3fa   :  { %v506_v4 = vmul.f32 0.03125, %v499_v3 }
 0x3fb   :  { %v502_v5 = vpop.xlane.xlu0 %501 }
 0x3fc   :  { %v509_v6 = vadd.f32 1e-05, %v506_v4  ;;  %v507_v7 = vmul.f32 0.03125, %v502_v5 }
 0x3fd   :  { %v505_v8 = vpop.xlane.xlu1 %504 }
 0x3fe   :  { %652 = vrsqrt.f32 %v509_v6  ;;  %v510_v9 = vadd.f32 1e-05, %v507_v7  ;;  %v508_v10 = vmul.f32 0.03125, %v505_v8 }
 0x3ff   :  { %v531_v27 = vpop.permute.xlu0 %530 }
 0x400   :  { %654 = vrsqrt.f32 %v510_v9  ;;  %v511_v11 = vadd.f32 1e-05, %v508_v10 }
 0x401   :  { %v533_v25 = vpop.permute.xlu1 %532 }
 0x402   :  { %656 = vrsqrt.f32 %v511_v11 }
 0x405   :  { %v535_v31 = vpop.permute.xlu1 %534 }
 0x408   :  { %v653_v12 = vpop.eup %652 }
 0x409   :  { %v515_v16 = vmul.f32 %v653_v12, %v491_v62 }
 0x40a   :  { %v655_v18 = vpop.eup %654 }
 0x40b   :  { %v516_v20 = vmul.f32 %v655_v18, %v492_v50  ;;  %v518_v21 = vmul.f32 %v515_v16, %v51_v13 }
 0x40c   :  { %v657_v22 = vpop.eup %656 }
 0x40d   :  { %v517_v23 = vmul.f32 %v657_v22, %v493_v53  ;;  %v521_v24 = vadd.f32 %v518_v21, %v52_v19  ;;  %v519_v26 = vmul.f32 %v516_v20, %v51_v13 }
 0x40f   :  { %524 = vst.msk [vmem:[%s849_s4] sm:$0xff] %vm78_vm0, %v521_v24  ;;  %v522_v28 = vadd.f32 %v519_v26, %v52_v19  ;;  %v520_v29 = vmul.f32 %v517_v23, %v51_v13 }
 0x410   :  { %540 = vst.msk [vmem:[%s849_s4] sm:$0xff] %vm539_vm1, %v531_v27 }
 0x411   :  { %525 = vst.msk [vmem:[%s849_s4 + $0x8] sm:$0xff] %vm78_vm0, %v522_v28  ;;  %v523_v30 = vadd.f32 %v520_v29, %v52_v19 }
 0x412   :  { %541 = vst.msk [vmem:[%s849_s4 + $0x8] sm:$0xff] %vm539_vm1, %v533_v25 }
 0x413   :  { %526 = vst.msk [vmem:[%s849_s4 + $0x10] sm:$0xff] %vm78_vm0, %v523_v30 }
 0x414   :  { %542 = vst.msk [vmem:[%s849_s4 + $0x10] sm:$0xff] %vm539_vm1, %v535_v31 }

// kernel: squeeze.28
= control target key start
LH: loop header
LB: loop body
LE: loop exit
PB: predicated region body
PF: predicated region fallthrough
CT: control target
= control target key end

     0   :  { %s37_s8 = smov 113   ;;  %vm7_vm0 = vcmask 39936   ;;  %s38_s9 = smov 118   ;;  %s55_s0 = inlined_call_operand.vmem [shape: f32[20], index: 0, kind: input, shape index: {}]   ;;  %s56_s1 = inlined_call_operand.vmem [shape: f32[4,5], index: 1, kind: output, shape index: {}]  }
   0x1   :  { %v4_v0 = vld [vmem:[%s55_s0] sm:$0x1]  ;;  %s36_s0 = smov 123  }
   0x2   :  { %5 = vst [vmem:[#allocation1] sm:$0x1] %v4_v0 }
   0x9   :  { %v9_v1 = vld [vmem:[#allocation1] sm:$0x1]  }
   0xa   :  { %v21_v2 = vld [vmem:[#allocation1] sm:$0x1]   ;;  %10 = vrot.lane.b32.xlu0 %v9_v1, %s36_s0 }
   0xb   :  { %22 = vrot.lane.b32.xlu1 %v21_v2, %s37_s8  ;;  %v6_v3 = vld [vmem:[#allocation1] sm:$0x1]  }
   0xc   :  { %v15_v4 = vld [vmem:[#allocation1] sm:$0x1]   ;;  %8 = vst.msk [vmem:[#allocation0] sm:$0x1] %vm7_vm0, %v6_v3  }
   0xe   :  { %16 = vrot.lane.b32.xlu0 %v15_v4, %s38_s9 }
  0x7c   :  { %v11_v5 = vpop.permute.xlu0 %10  }
  0x7d   :  { %v23_v6 = vpop.permute.xlu1 %22   ;;  %14 = vst.msk [vmem:[#allocation0 + $0x1] sm:$0x1] %vm7_vm0, %v11_v5  }
  0x7e   :  { %26 = vst.msk [vmem:[#allocation0 + $0x3] sm:$0x1] %vm7_vm0, %v23_v6  }
  0x80   :  { %v17_v7 = vpop.permute.xlu0 %16  }
  0x81   :  { %20 = vst.msk [vmem:[#allocation0 + $0x2] sm:$0x1] %vm7_vm0, %v17_v7  }
  0x88   :  { %v30_v8 = vld [vmem:[#allocation0] sm:$0xf] }
  0x89   :  { %32 = vst [vmem:[%s56_s1] sm:$0xf] %v30_v8 }

// kernel: squeeze.31
= control target key start
LH: loop header
LB: loop body
LE: loop exit
PB: predicated region body
PF: predicated region fallthrough
CT: control target
= control target key end

     0   :  { %s37_s8 = smov 116   ;;  %vm7_vm0 = vcmask 31744   ;;  %s38_s9 = smov 120   ;;  %s55_s0 = inlined_call_operand.vmem [shape: f32[16], index: 0, kind: input, shape index: {}]   ;;  %s56_s1 = inlined_call_operand.vmem [shape: f32[4,4], index: 1, kind: output, shape index: {}]  }
   0x1   :  { %v4_v0 = vld [vmem:[%s55_s0] sm:$0x1]  ;;  %s36_s0 = smov 124  }
   0x2   :  { %5 = vst [vmem:[#allocation1] sm:$0x1] %v4_v0 }
   0x9   :  { %v9_v1 = vld [vmem:[#allocation1] sm:$0x1]  }
   0xa   :  { %v21_v2 = vld [vmem:[#allocation1] sm:$0x1]   ;;  %10 = vrot.lane.b32.xlu0 %v9_v1, %s36_s0 }
   0xb   :  { %22 = vrot.lane.b32.xlu1 %v21_v2, %s37_s8  ;;  %v6_v3 = vld [vmem:[#allocation1] sm:$0x1]  }
   0xc   :  { %v15_v4 = vld [vmem:[#allocation1] sm:$0x1]   ;;  %8 = vst.msk [vmem:[#allocation0] sm:$0x1] %vm7_vm0, %v6_v3  }
   0xe   :  { %16 = vrot.lane.b32.xlu0 %v15_v4, %s38_s9 }
  0x7c   :  { %v11_v5 = vpop.permute.xlu0 %10  }
  0x7d   :  { %v23_v6 = vpop.permute.xlu1 %22   ;;  %14 = vst.msk [vmem:[#allocation0 + $0x1] sm:$0x1] %vm7_vm0, %v11_v5  }
  0x7e   :  { %26 = vst.msk [vmem:[#allocation0 + $0x3] sm:$0x1] %vm7_vm0, %v23_v6  }
  0x80   :  { %v17_v7 = vpop.permute.xlu0 %16  }
  0x81   :  { %20 = vst.msk [vmem:[#allocation0 + $0x2] sm:$0x1] %vm7_vm0, %v17_v7  }
  0x88   :  { %v30_v8 = vld [vmem:[#allocation0] sm:$0xf] }
  0x89   :  { %32 = vst [vmem:[%s56_s1] sm:$0xf] %v30_v8 }

// kernel: forward.11
= control target key start
LH: loop header
LB: loop body
LE: loop exit
PB: predicated region body
PF: predicated region fallthrough
CT: control target
= control target key end

     0   :  { %v660_v1 = vmov 0   ;;  %vm78_vm0 = vcmask 261120   ;;  %v214_v19 = vlaneseq  ;;  %s661_s7 = smov 32   ;;  %s662_s9 = smov 96   ;;  %vm293_vm1 = vcmask 257024   ;;  %s847_s2 = inlined_call_operand.vmem [shape: bf16[192,160], index: 2, kind: input, shape index: {}]   ;;  %s848_s1 = inlined_call_operand.vmem [shape: f32[20,32], index: 1, kind: input, shape index: {}]   ;;  %s849_s0 = inlined_call_operand.vmem [shape: f32[20,32], index: 0, kind: input, shape index: {}]   ;;  %s850_s3 = inlined_call_operand.vmem [shape: f32[8,160], index: 3, kind: input, shape index: {}]   ;;  %s851_s4 = inlined_call_operand.vmem [shape: f32[20,128], index: 4, kind: output, shape index: {}]  }
   0x1   :  { %v610_v0 = vld [vmem:[%s847_s2 + $0x24] ss:$8 sps:$4 sm:$0xff]   ;;  %117 = vmatprep.mubr.bf16.mxu0 %v660_v1  ;;  %v612_v2 = vld [vmem:[%s847_s2 + $0x20] ss:$8 sps:$4 sm:$0xff]   ;;  %v613_v3 = vld [vmem:[%s847_s2 + $0x34] ss:$8 sps:$4 sm:$0xff]  }
   0x2   :  { %85 = vmatprep.subr.bf16.mxu0 %v610_v0  ;;  %v615_v4 = vld [vmem:[%s847_s2 + $0x30] ss:$8 sps:$4 sm:$0xff]   ;;  %v21_v5 = vld [vmem:[%s848_s1] sm:$0xff]  ;;  %v22_v6 = vld [vmem:[%s848_s1 + $0x8] sm:$0xff]  ;;  %v215_v20 = vshrl.u32 %v214_v19, 7  ;;  %s663_s10 = smov 64  }
   0x3   :  { %86 = vmatpush1.bf16.msra.mxu0 %v612_v2  ;;  %v618_v7 = vld [vmem:[%s847_s2 + $0x4] ss:$8 sps:$4 sm:$0xff]   ;;  %v56_v8 = vpack.c.bf16 %v22_v6, %v21_v5  ;;  %v616_v9 = vld [vmem:[%s847_s2] ss:$8 sps:$4 sm:$0xff]   ;;  %v621_v10 = vld [vmem:[%s847_s2 + $0x14] ss:$8 sps:$4 sm:$0xff]   ;;  %422 = vrot.lane.b32.xlu0 %v21_v5, %s661_s7 }
   0x4   :  { %87 = vmatprep.subr.bf16.mxu0 %v613_v3  ;;  %v23_v11 = vld [vmem:[%s848_s1 + $0x10] sm:$0xf]  ;;  %v727_v14 = vld [vmem:[%s849_s0] sm:$0xff]  ;;  %v732_v15 = vld [vmem:[%s849_s0 + $0x8] sm:$0xff]  ;;  %v220_v22 = vsub.s32 1, %v215_v20  ;;  %v216_v34 = vsub.s32 0, %v215_v20 }
   0x5   :  { %v619_v12 = vld [vmem:[%s847_s2 + $0x10] ss:$8 sps:$4 sm:$0xff]   ;;  %v57_v13 = vpack.c.bf16 %v23_v11, %v23_v11  ;;  %v54_v16 = vpack.c.bf16 %v732_v15, %v727_v14  ;;  %v48_v21 = vld [vmem:[%s850_s3] ss:$8 sm:$0x3]  ;;  %426 = vrot.lane.b32.xlu1 %v23_v11, %s661_s7  ;;  %vm540_vm2 = vcmask 269568  }
   0x6   :  { %v740_v17 = vld [vmem:[%s849_s0 + $0x10] sm:$0xf]  ;;  %v221_v23 = vrot.slane %v48_v21, %v220_v22  ;;  %v622_v24 = vld [vmem:[%s847_s2 + $0x40] ss:$8 sps:$4 sm:$0xff]   ;;  %v217_v37 = vrot.slane %v48_v21, %v216_v34  ;;  %vm543_vm3 = vcmask 265472  }
   0x7   :  { %88 = vmatpush1.bf16.msra.mxu0 %v615_v4  ;;  %v55_v18 = vpack.c.bf16 %v740_v17, %v740_v17  ;;  %582 = vmatprep.subr.bf16.mxu1 %v622_v24  ;;  %v623_v25 = vld [vmem:[%s847_s2 + $0x50] ss:$8 sps:$4 sm:$0xff]   ;;  %v624_v26 = vld [vmem:[%s847_s2 + $0x60] ss:$8 sps:$4 sm:$0xff]  }
   0x8   :  { %162 = vmatprep.subr.bf16.mxu0 %v618_v7  ;;  %583 = vmatpush3.bf16.msra.mxu1 %v622_v24  ;;  %v625_v27 = vld [vmem:[%s847_s2 + $0x70] ss:$8 sps:$4 sm:$0xff]   ;;  %v626_v28 = vld [vmem:[%s847_s2 + $0x80] ss:$8 sps:$4 sm:$0xff]  }
   0x9   :  { %584 = vmatprep.subr.bf16.mxu1 %v623_v25  ;;  %v627_v29 = vld [vmem:[%s847_s2 + $0x90] ss:$8 sps:$4 sm:$0xff]   ;;  %v628_v30 = vld [vmem:[%s847_s2 + $0xa0] ss:$8 sps:$4 sm:$0xff]   ;;  %424 = vrot.lane.b32.xlu0 %v22_v6, %s661_s7 }
   0xa   :  { %553 = vmatmul.mubr.msk.bf16.vlgmr.msra.gmra.mrb[0].mxu0 %vm78_vm0, %v56_v8  ;;  %v629_v31 = vld [vmem:[%s847_s2 + $0xb0] ss:$8 sps:$4 sm:$0xff]   ;;  %v49_v22 = vld [vmem:[%s850_s3 + $0x1] ss:$0 sm:$0xff] }
   0xb   :  { %163 = vmatpush1.bf16.msra.mxu0 %v616_v9  ;;  %127 = vmatprep.mubr.bf16.mxu0 %v660_v1 }
   0xc   :  { %164 = vmatprep.subr.bf16.mxu0 %v621_v10  ;;  %585 = vmatpush3.bf16.msra.mxu1 %v623_v25 }
   0xd   :  { %586 = vmatprep.subr.bf16.mxu1 %v624_v26 }
   0xf   :  { %165 = vmatpush1.bf16.msra.mxu0 %v619_v12 }
  0x10   :  { %587 = vmatpush3.bf16.msra.mxu1 %v624_v26 }
  0x11   :  { %588 = vmatprep.subr.bf16.mxu1 %v625_v27 }
  0x12   :  { %554 = vmatmul.mubr.msk.bf16.gmra.mrb[4].mxu0 %vm78_vm0, %v57_v13 }
  0x13   :  { %194 = vmatprep.mubr.bf16.mxu0 %v660_v1 }
  0x14   :  { %589 = vmatpush3.bf16.msra.mxu1 %v625_v27 }
  0x15   :  { %590 = vmatprep.subr.bf16.mxu1 %v626_v28 }
  0x18   :  { %591 = vmatpush3.bf16.msra.mxu1 %v626_v28 }
  0x19   :  { %592 = vmatprep.subr.bf16.mxu1 %v627_v29 }
  0x1a   :  { %559 = vmatmul.mubr.msk.bf16.vlgmr.msra.gmra.mrb[0].mxu0 %vm78_vm0, %v54_v16 }
  0x1b   :  { %204 = vmatprep.mubr.bf16.mxu0 %v660_v1 }
  0x1c   :  { %593 = vmatpush3.bf16.msra.mxu1 %v627_v29 }
  0x1d   :  { %594 = vmatprep.subr.bf16.mxu1 %v628_v30 }
  0x20   :  { %595 = vmatpush3.bf16.msra.mxu1 %v628_v30 }
  0x21   :  { %596 = vmatprep.subr.bf16.mxu1 %v629_v31 }
  0x22   :  { %560 = vmatmul.mubr.msk.bf16.gmra.mrb[8].mxu0 %vm78_vm0, %v55_v18 }
  0x24   :  { %597 = vmatpush3.bf16.msra.mxu1 %v629_v31 }
  0xe5   :  { %v129_v32 = vpop.f32.mrb[4].mxu0 }
  0xe6   :  { %v131_v33 = vpop.f32.mrb[5].mxu0 }
  0xe7   :  { %v133_v35 = vpop.f32.mrb[6].mxu0 }
  0xe8   :  { %v134_v36 = vpop.f32.mrb[7].mxu0 }
  0xed   :  { %v196_v38 = vpop.f32.mrb[0].mxu0 }
  0xee   :  { %v224_v39 = vadd.f32 %v217_v37, %v196_v38  ;;  %v198_v40 = vpop.f32.mrb[1].mxu0 }
  0xef   :  { %v775_v41 = vadd.f32 %v221_v23, %v198_v40  ;;  %v200_v42 = vpop.f32.mrb[2].mxu0  ;;  %v427_v40 = vpop.permute.xlu1 %426 }
  0xf0   :  { %v236_v43 = vmul.f32 0.044715, %v224_v39  ;;  %v226_v44 = vadd.f32 %v217_v37, %v200_v42  ;;  %v202_v45 = vpop.f32.mrb[3].mxu0  ;;  %v230_v8 = vmul.f32 0.5, %v224_v39 }
  0xf1   :  { %v777_v46 = vadd.f32 %v221_v23, %v202_v45 }
  0xf2   :  { %v238_v47 = vmul.f32 0.044715, %v226_v44  ;;  %v242_v48 = vmul.f32 %v236_v43, %v224_v39  ;;  %v232_v9 = vmul.f32 0.5, %v226_v44 }
  0xf4   :  { %v244_v49 = vmul.f32 %v238_v47, %v226_v44  ;;  %v248_v50 = vmul.f32 %v242_v48, %v224_v39 }
  0xf5   :  { %v206_v51 = vpop.f32.mrb[8].mxu0 }
  0xf6   :  { %v207_v52 = vadd.f32 %v206_v51, %v129_v32  ;;  %v208_v53 = vpop.f32.mrb[9].mxu0  ;;  %v250_v54 = vmul.f32 %v244_v49, %v226_v44  ;;  %v254_v55 = vadd.f32 %v248_v50, %v224_v39  ;;  %v423_v39 = vpop.permute.xlu0 %422 }
  0xf7   :  { %v209_v56 = vadd.f32 %v208_v53, %v131_v33  ;;  %v210_v57 = vpop.f32.mrb[10].mxu0 }
  0xf8   :  { %v228_v58 = vadd.f32 %v217_v37, %v207_v52  ;;  %v211_v59 = vpop.f32.mrb[11].mxu0  ;;  %v256_v60 = vadd.f32 %v250_v54, %v226_v44  ;;  %v260_v61 = vmul.f32 0.7978846, %v254_v55  ;;  %v237_v57 = vmul.f32 0.044715, %v775_v41 }
  0xf9   :  { %v779_v62 = vadd.f32 %v221_v23, %v209_v56  ;;  %v239_v56 = vmul.f32 0.044715, %v777_v46 }
  0xfa   :  { %v240_v63 = vmul.f32 0.044715, %v228_v58  ;;  %v262_v0 = vmul.f32 0.7978846, %v256_v60  ;;  %630 = vtanh.f32 %v260_v61  ;;  %v234_v18 = vmul.f32 0.5, %v228_v58  ;;  %v425_v44 = vpop.permute.xlu0 %424 }
  0xfb   :  { %v243_v59 = vmul.f32 %v237_v57, %v775_v41  ;;  %v241_v60 = vmul.f32 0.044715, %v779_v62 }
  0xfc   :  { %632 = vtanh.f32 %v262_v0  ;;  %v246_v1 = vmul.f32 %v240_v63, %v228_v58 }
  0xfd   :  { %v249_v63 = vmul.f32 %v243_v59, %v775_v41  ;;  %v247_v0 = vmul.f32 %v241_v60, %v779_v62  ;;  %v53_v60 = vld [vmem:[%s850_s3 + $0x5] ss:$0 sm:$0xff] }
  0xfe   :  { %v252_v2 = vmul.f32 %v246_v1, %v228_v58 }
 0x100   :  { %v258_v3 = vadd.f32 %v252_v2, %v228_v58  ;;  %v245_v58 = vmul.f32 %v239_v56, %v777_v46  ;;  %v255_v2 = vadd.f32 %v249_v63, %v775_v41 }
 0x102   :  { %v264_v4 = vmul.f32 0.7978846, %v258_v3  ;;  %v251_v61 = vmul.f32 %v245_v58, %v777_v46  ;;  %v253_v3 = vmul.f32 %v247_v0, %v779_v62 }
 0x104   :  { %v631_v5 = vpop.eup %630  ;;  %634 = vtanh.f32 %v264_v4  ;;  %v257_v1 = vadd.f32 %v251_v61, %v777_v46 }
 0x105   :  { %v272_v6 = vadd.f32 1.0, %v631_v5  ;;  %v261_v5 = vmul.f32 0.7978846, %v255_v2 }
 0x106   :  { %v633_v7 = vpop.eup %632  ;;  %v263_v4 = vmul.f32 0.7978846, %v257_v1 }
 0x107   :  { %v274_v10 = vadd.f32 1.0, %v633_v7  ;;  %v278_v11 = vmul.f32 %v272_v6, %v230_v8  ;;  %v259_v6 = vadd.f32 %v253_v3, %v779_v62 }
 0x109   :  { %v280_v12 = vmul.f32 %v274_v10, %v232_v9  ;;  %v265_v7 = vmul.f32 0.7978846, %v259_v6 }
 0x10b   :  { %v300_v13 = vpack.c.bf16 %v280_v12, %v278_v11 }
 0x10d   :  { %598 = vmatprep.mubr.bf16.mxu1 %v300_v13 }
 0x10e   :  { %v635_v16 = vpop.eup %634 }
 0x10f   :  { %v276_v19 = vadd.f32 1.0, %v635_v16 }
 0x111   :  { %v282_v20 = vmul.f32 %v276_v19, %v234_v18 }
 0x113   :  { %v301_v21 = vpack.c.bf16 %v282_v20, %v282_v20 }
 0x115   :  { %599 = vmatmul.mubr.bf16.vlgmr.msra.gmra.mrb[0].mxu1 %v301_v21  ;;  %v233_v21 = vmul.f32 0.5, %v777_v46  ;;  %v50_v46 = vld [vmem:[%s850_s3 + $0x2] ss:$0 sm:$0xff] }
 0x1e8   :  { %v600_v23 = vpop.f32.mrb[0].mxu1 }
 0x1e9   :  { %v393_v24 = vadd.f32 %v600_v23, %v49_v22  ;;  %v384_v25 = vpop.f32.mrb[1].mxu1 }
 0x1ea   :  { %v385_v26 = vadd.f32 %v384_v25, %v49_v22  ;;  %v601_v27 = vpop.f32.mrb[2].mxu1 }
 0x1eb   :  { %v571_v28 = vmul.f32 -1.442695, %v393_v24  ;;  %v387_v29 = vpop.f32.mrb[3].mxu1 }
 0x1ec   :  { %v569_v30 = vmul.f32 -1.442695, %v385_v26  ;;  %v388_v31 = vadd.f32 %v387_v29, %v49_v22  ;;  %452 = vrot.lane.b32.xlu1 %v385_v26, %s662_s9 }
 0x1ed   :  { %636 = vpow2.f32 %v571_v28 }
 0x1ee   :  { %638 = vpow2.f32 %v569_v30  ;;  %v570_v32 = vmul.f32 -1.442695, %v388_v31  ;;  %454 = vrot.lane.b32.xlu0 %v388_v31, %s662_s9 }
 0x1f0   :  { %640 = vpow2.f32 %v570_v32  ;;  %456 = vrot.lane.b32.xlu1 %v393_v24, %s662_s9  ;;  %v231_v24 = vmul.f32 0.5, %v775_v41 }
 0x1f7   :  { %v637_v33 = vpop.eup %636 }
 0x1f8   :  { %v639_v34 = vpop.eup %638  ;;  %v409_v35 = vadd.f32 1.0, %v637_v33 }
 0x1f9   :  { %v407_v36 = vadd.f32 1.0, %v639_v34 }
 0x1fa   :  { %v641_v37 = vpop.eup %640  ;;  %642 = vrcp.f32 %v409_v35  ;;  %v235_v35 = vmul.f32 0.5, %v779_v62 }
 0x1fb   :  { %v408_v38 = vadd.f32 1.0, %v641_v37  ;;  %644 = vrcp.f32 %v407_v36 }
 0x1fd   :  { %646 = vrcp.f32 %v408_v38 }
 0x1fe   :  { %648 = vtanh.f32 %v263_v4 }
 0x1ff   :  { %650 = vtanh.f32 %v261_v5 }
 0x200   :  { %652 = vtanh.f32 %v265_v7 }
 0x204   :  { %v643_v42 = vpop.eup %642 }
 0x205   :  { %v433_v43 = vmul.f32 %v643_v42, %v427_v40  ;;  %v645_v45 = vpop.eup %644  ;;  %v418_v25 = vmul.f32 %v643_v42, %v740_v17 }
 0x206   :  { %v431_v49 = vmul.f32 %v645_v45, %v423_v39  ;;  %v416_v13 = vmul.f32 %v645_v45, %v727_v14 }
 0x207   :  { %v647_v47 = vpop.eup %646  ;;  %441 = vrot.lane.b32.xlu0 %v433_v43, %s662_s9 }
 0x208   :  { %v432_v48 = vmul.f32 %v647_v47, %v425_v44  ;;  %v649_v9 = vpop.eup %648  ;;  %v417_v19 = vmul.f32 %v647_v47, %v732_v15 }
 0x209   :  { %v651_v10 = vpop.eup %650  ;;  %v275_v16 = vadd.f32 1.0, %v649_v9 }
 0x20a   :  { %439 = vrot.lane.b32.xlu1 %v432_v48, %s662_s9  ;;  %v273_v18 = vadd.f32 1.0, %v651_v10  ;;  %v653_v22 = vpop.eup %652 }
 0x20b   :  { %437 = vrot.lane.b32.xlu0 %v431_v49, %s662_s9  ;;  %v281_v28 = vmul.f32 %v275_v16, %v233_v21  ;;  %v277_v33 = vadd.f32 1.0, %v653_v22 }
 0x20c   :  { %v279_v30 = vmul.f32 %v273_v18, %v231_v24 }
 0x20d   :  { %v285_v17 = vmul.f32 %v281_v28, %v50_v46  ;;  %v283_v38 = vmul.f32 %v277_v33, %v235_v35 }
 0x20e   :  { %v284_v37 = vmul.f32 %v279_v30, %v50_v46 }
 0x20f   :  { %v290_v39 = vsel %vm78_vm0, %v285_v17, 0.0 }
 0x210   :  { %v287_v40 = vsel %vm78_vm0, %v284_v37, 0.0 }
 0x25e   :  { %v453_v50 = vpop.permute.xlu1 %452 }
 0x25f   :  { %v461_v51 = vmul.f32 %v645_v45, %v453_v50 }
 0x260   :  { %v455_v52 = vpop.permute.xlu0 %454 }
 0x261   :  { %v462_v53 = vmul.f32 %v647_v47, %v455_v52  ;;  %467 = vrot.lane.b32.xlu1 %v461_v51, %s663_s10 }
 0x262   :  { %v457_v54 = vpop.permute.xlu1 %456 }
 0x263   :  { %v463_v55 = vmul.f32 %v643_v42, %v457_v54  ;;  %469 = vrot.lane.b32.xlu0 %v462_v53, %s663_s10  ;;  %v286_v42 = vmul.f32 %v283_v38, %v50_v46 }
 0x265   :  { %471 = vrot.lane.b32.xlu1 %v463_v55, %s663_s10  ;;  %v294_v43 = vsel %vm293_vm1, %v286_v42, 0.0 }
 0x279   :  { %v442_v8 = vpop.permute.xlu0 %441 }
 0x27a   :  { %v448_v31 = vadd.f32 %v442_v8, %v418_v25 }
 0x27c   :  { %v440_v11 = vpop.permute.xlu1 %439 }
 0x27d   :  { %v438_v12 = vpop.permute.xlu0 %437  ;;  %v447_v26 = vadd.f32 %v440_v11, %v417_v19  ;;  %v52_v19 = vld [vmem:[%s850_s3 + $0x4] ss:$0 sm:$0xff] }
 0x27e   :  { %v446_v20 = vadd.f32 %v438_v12, %v416_v13  ;;  %v51_v13 = vld [vmem:[%s850_s3 + $0x3] ss:$0 sm:$0xff] }
 0x2d3   :  { %v468_v23 = vpop.permute.xlu1 %467 }
 0x2d4   :  { %v476_v27 = vadd.f32 %v468_v23, %v446_v20 }
 0x2d5   :  { %v470_v29 = vpop.permute.xlu0 %469 }
 0x2d6   :  { %v477_v14 = vadd.f32 %v470_v29, %v447_v26  ;;  %v479_v32 = vsel %vm78_vm0, %v476_v27, 0.0 }
 0x2d7   :  { %v472_v15 = vpop.permute.xlu1 %471  ;;  %480 = vadd.xlane.f32.xlu0 %v479_v32 }
 0x2d8   :  { %v478_v34 = vadd.f32 %v472_v15, %v448_v31  ;;  %v482_v41 = vsel %vm78_vm0, %v477_v14, 0.0 }
 0x2d9   :  { %483 = vadd.xlane.f32.xlu1 %v482_v41 }
 0x2da   :  { %v485_v36 = vsel %vm293_vm1, %v478_v34, 0.0 }
 0x2db   :  { %486 = vadd.xlane.f32.xlu0 %v485_v36 }
 0x2dd   :  { %291 = vadd.xlane.f32.xlu1 %v290_v39 }
 0x2df   :  { %288 = vadd.xlane.f32.xlu0 %v287_v40 }
 0x2e3   :  { %295 = vadd.xlane.f32.xlu0 %v294_v43 }
 0x364   :  { %v481_v44 = vpop.xlane.xlu0 %480 }
 0x365   :  { %v489_v45 = vmul.f32 0.03125, %v481_v44 }
 0x366   :  { %v484_v62 = vpop.xlane.xlu1 %483 }
 0x367   :  { %v492_v47 = vsub.f32 %v476_v27, %v489_v45  ;;  %v490_v48 = vmul.f32 0.03125, %v484_v62 }
 0x368   :  { %v487_v49 = vpop.xlane.xlu0 %486 }
 0x369   :  { %v493_v50 = vsub.f32 %v477_v14, %v490_v48  ;;  %v491_v51 = vmul.f32 0.03125, %v487_v49  ;;  %v495_v52 = vmul.f32 %v492_v47, %v492_v47 }
 0x36a   :  { %v292_v61 = vpop.xlane.xlu1 %291 }
 0x36b   :  { %v494_v53 = vsub.f32 %v478_v34, %v491_v51  ;;  %v498_v54 = vsel %vm78_vm0, %v495_v52, 0.0  ;;  %v496_v55 = vmul.f32 %v493_v50, %v493_v50  ;;  %v298_v63 = vadd.f32 %v292_v61, %v53_v60 }
 0x36c   :  { %499 = vadd.xlane.f32.xlu1 %v498_v54  ;;  %v289_v59 = vpop.xlane.xlu0 %288 }
 0x36d   :  { %v501_v56 = vsel %vm78_vm0, %v496_v55, 0.0  ;;  %v497_v57 = vmul.f32 %v494_v53, %v494_v53  ;;  %v297_v1 = vadd.f32 %v289_v59, %v53_v60 }
 0x36e   :  { %502 = vadd.xlane.f32.xlu0 %v501_v56 }
 0x36f   :  { %v504_v58 = vsel %vm293_vm1, %v497_v57, 0.0 }
 0x370   :  { %505 = vadd.xlane.f32.xlu1 %v504_v58  ;;  %v296_v0 = vpop.xlane.xlu0 %295 }
 0x371   :  { %v299_v2 = vadd.f32 %v296_v0, %v53_v60 }
 0x381   :  { %533 = vrot.lane.b32.xlu1 %v298_v63, %s661_s7 }
 0x384   :  { %531 = vrot.lane.b32.xlu0 %v297_v1, %s661_s7 }
 0x385   :  { %535 = vrot.lane.b32.xlu1 %v299_v2, %s661_s7 }
 0x3f9   :  { %v500_v3 = vpop.xlane.xlu1 %499 }
 0x3fa   :  { %v507_v4 = vmul.f32 0.03125, %v500_v3 }
 0x3fb   :  { %v503_v5 = vpop.xlane.xlu0 %502 }
 0x3fc   :  { %v510_v6 = vadd.f32 1e-05, %v507_v4  ;;  %v508_v7 = vmul.f32 0.03125, %v503_v5 }
 0x3fd   :  { %v506_v8 = vpop.xlane.xlu1 %505 }
 0x3fe   :  { %654 = vrsqrt.f32 %v510_v6  ;;  %v511_v9 = vadd.f32 1e-05, %v508_v7  ;;  %v509_v10 = vmul.f32 0.03125, %v506_v8 }
 0x3ff   :  { %v532_v27 = vpop.permute.xlu0 %531 }
 0x400   :  { %656 = vrsqrt.f32 %v511_v9  ;;  %v512_v11 = vadd.f32 1e-05, %v509_v10 }
 0x401   :  { %v534_v25 = vpop.permute.xlu1 %533 }
 0x402   :  { %658 = vrsqrt.f32 %v512_v11 }
 0x405   :  { %v536_v31 = vpop.permute.xlu1 %535 }
 0x408   :  { %v655_v12 = vpop.eup %654 }
 0x409   :  { %v516_v16 = vmul.f32 %v655_v12, %v492_v47 }
 0x40a   :  { %v657_v18 = vpop.eup %656 }
 0x40b   :  { %v517_v20 = vmul.f32 %v657_v18, %v493_v50  ;;  %v519_v21 = vmul.f32 %v516_v16, %v51_v13 }
 0x40c   :  { %v659_v22 = vpop.eup %658 }
 0x40d   :  { %v518_v23 = vmul.f32 %v659_v22, %v494_v53  ;;  %v522_v24 = vadd.f32 %v519_v21, %v52_v19  ;;  %v520_v26 = vmul.f32 %v517_v20, %v51_v13 }
 0x40f   :  { %525 = vst.msk [vmem:[%s851_s4] sm:$0xff] %vm78_vm0, %v522_v24  ;;  %v523_v28 = vadd.f32 %v520_v26, %v52_v19  ;;  %v521_v29 = vmul.f32 %v518_v23, %v51_v13 }
 0x410   :  { %541 = vst.msk [vmem:[%s851_s4] sm:$0xff] %vm540_vm2, %v532_v27 }
 0x411   :  { %526 = vst.msk [vmem:[%s851_s4 + $0x8] sm:$0xff] %vm78_vm0, %v523_v28  ;;  %v524_v30 = vadd.f32 %v521_v29, %v52_v19 }
 0x412   :  { %542 = vst.msk [vmem:[%s851_s4 + $0x8] sm:$0xff] %vm540_vm2, %v534_v25 }
 0x413   :  { %527 = vst.msk [vmem:[%s851_s4 + $0x10] sm:$0xf] %vm293_vm1, %v524_v30 }
 0x414   :  { %544 = vst.msk [vmem:[%s851_s4 + $0x10] sm:$0xf] %vm543_vm3, %v536_v31 }

// kernel: squeeze.34
= control target key start
LH: loop header
LB: loop body
LE: loop exit
PB: predicated region body
PF: predicated region fallthrough
CT: control target
= control target key end

     0   :  { %s37_s8 = smov 119   ;;  %vm7_vm0 = vcmask 23552   ;;  %s38_s9 = smov 122   ;;  %s55_s0 = inlined_call_operand.vmem [shape: f32[12], index: 0, kind: input, shape index: {}]   ;;  %s56_s1 = inlined_call_operand.vmem [shape: f32[4,3], index: 1, kind: output, shape index: {}]  }
   0x1   :  { %v4_v0 = vld [vmem:[%s55_s0] sm:$0x1]  ;;  %s36_s0 = smov 125  }
   0x2   :  { %5 = vst [vmem:[#allocation1] sm:$0x1] %v4_v0 }
   0x9   :  { %v9_v1 = vld [vmem:[#allocation1] sm:$0x1]  }
   0xa   :  { %v21_v2 = vld [vmem:[#allocation1] sm:$0x1]   ;;  %10 = vrot.lane.b32.xlu0 %v9_v1, %s36_s0 }
   0xb   :  { %22 = vrot.lane.b32.xlu1 %v21_v2, %s37_s8  ;;  %v6_v3 = vld [vmem:[#allocation1] sm:$0x1]  }
   0xc   :  { %v15_v4 = vld [vmem:[#allocation1] sm:$0x1]   ;;  %8 = vst.msk [vmem:[#allocation0] sm:$0x1] %vm7_vm0, %v6_v3  }
   0xe   :  { %16 = vrot.lane.b32.xlu0 %v15_v4, %s38_s9 }
  0x7c   :  { %v11_v5 = vpop.permute.xlu0 %10  }
  0x7d   :  { %v23_v6 = vpop.permute.xlu1 %22   ;;  %14 = vst.msk [vmem:[#allocation0 + $0x1] sm:$0x1] %vm7_vm0, %v11_v5  }
  0x7e   :  { %26 = vst.msk [vmem:[#allocation0 + $0x3] sm:$0x1] %vm7_vm0, %v23_v6  }
  0x80   :  { %v17_v7 = vpop.permute.xlu0 %16  }
  0x81   :  { %20 = vst.msk [vmem:[#allocation0 + $0x2] sm:$0x1] %vm7_vm0, %v17_v7  }
  0x88   :  { %v30_v8 = vld [vmem:[#allocation0] sm:$0xf] }
  0x89   :  { %32 = vst [vmem:[%s56_s1] sm:$0xf] %v30_v8 }

// kernel: forward.12
= control target key start
LH: loop header
LB: loop body
LE: loop exit
PB: predicated region body
PF: predicated region fallthrough
CT: control target
= control target key end

     0   :  { %v539_v1 = vmov 0   ;;  %vm74_vm0 = vcmask 261120   ;;  %v188_v15 = vlaneseq  ;;  %v540_v20 = vmov 0.0   ;;  %s542_s29 = smov 32   ;;  %s543_s5 = smov 96   ;;  %s696_s2 = inlined_call_operand.vmem [shape: bf16[192,160], index: 2, kind: input, shape index: {}]   ;;  %s697_s1 = inlined_call_operand.vmem [shape: f32[16,32], index: 1, kind: input, shape index: {}]   ;;  %s698_s0 = inlined_call_operand.vmem [shape: f32[16,32], index: 0, kind: input, shape index: {}]   ;;  %s699_s3 = inlined_call_operand.vmem [shape: f32[8,160], index: 3, kind: input, shape index: {}]   ;;  %s700_s4 = inlined_call_operand.vmem [shape: f32[16,128], index: 4, kind: output, shape index: {}]  }
   0x1   :  { %v499_v0 = vld [vmem:[%s696_s2 + $0x24] ss:$8 sps:$4 sm:$0xff]   ;;  %110 = vmatprep.mubr.bf16.mxu0 %v539_v1  ;;  %v501_v2 = vld [vmem:[%s696_s2 + $0x20] ss:$8 sps:$4 sm:$0xff]   ;;  %v502_v3 = vld [vmem:[%s696_s2 + $0x34] ss:$8 sps:$4 sm:$0xff]   ;;  %469 = vmatprep.subr.bf16.mxu1 %v540_v20 }
   0x2   :  { %78 = vmatprep.subr.bf16.mxu0 %v499_v0  ;;  %v504_v4 = vld [vmem:[%s696_s2 + $0x30] ss:$8 sps:$4 sm:$0xff]   ;;  %v20_v5 = vld [vmem:[%s697_s1] sm:$0xff]  ;;  %v21_v6 = vld [vmem:[%s697_s1 + $0x8] sm:$0xff]  ;;  %v189_v16 = vshrl.u32 %v188_v15, 7  ;;  %vm541_vm1 = vmmov 0  }
   0x3   :  { %79 = vmatpush1.bf16.msra.mxu0 %v501_v2  ;;  %v507_v7 = vld [vmem:[%s696_s2 + $0x4] ss:$8 sps:$4 sm:$0xff]   ;;  %v53_v8 = vpack.c.bf16 %v21_v6, %v20_v5  ;;  %v505_v9 = vld [vmem:[%s696_s2] ss:$8 sps:$4 sm:$0xff]   ;;  %v510_v10 = vld [vmem:[%s696_s2 + $0x14] ss:$8 sps:$4 sm:$0xff]   ;;  %485 = vmatprep.mubr.msk.bf16.mxu1 %vm541_vm1, %v540_v20 }
   0x4   :  { %80 = vmatprep.subr.bf16.mxu0 %v502_v3  ;;  %v508_v11 = vld [vmem:[%s696_s2 + $0x10] ss:$8 sps:$4 sm:$0xff]   ;;  %v604_v12 = vld [vmem:[%s698_s0] sm:$0xff]  ;;  %v609_v13 = vld [vmem:[%s698_s0 + $0x8] sm:$0xff]  ;;  %v194_v18 = vsub.s32 1, %v189_v16  ;;  %354 = vrot.lane.b32.xlu0 %v20_v5, %s542_s29  ;;  %v190_v29 = vsub.s32 0, %v189_v16 }
   0x5   :  { %v52_v14 = vpack.c.bf16 %v609_v13, %v604_v12  ;;  %v46_v17 = vld [vmem:[%s699_s3] ss:$8 sm:$0x3]  ;;  %v512_v22 = vld [vmem:[%s696_s2 + $0x50] ss:$8 sps:$4 sm:$0xff]   ;;  %s544_s6 = smov 64  }
   0x6   :  { %v511_v19 = vld [vmem:[%s696_s2 + $0x40] ss:$8 sps:$4 sm:$0xff]   ;;  %v195_v21 = vrot.slane %v46_v17, %v194_v18  ;;  %v514_v24 = vld [vmem:[%s696_s2 + $0x70] ss:$8 sps:$4 sm:$0xff]   ;;  %v191_v30 = vrot.slane %v46_v17, %v190_v29  ;;  %vm433_vm2 = vcmask 269568  }
   0x7   :  { %81 = vmatpush1.bf16.msra.mxu0 %v504_v4  ;;  %470 = vmatpush3.bf16.msra.mxu1 %v511_v19  ;;  %v513_v23 = vld [vmem:[%s696_s2 + $0x60] ss:$8 sps:$4 sm:$0xff]   ;;  %v516_v26 = vld [vmem:[%s696_s2 + $0x90] ss:$8 sps:$4 sm:$0xff]  }
   0x8   :  { %144 = vmatprep.subr.bf16.mxu0 %v507_v7  ;;  %471 = vmatprep.subr.bf16.mxu1 %v540_v20  ;;  %v515_v25 = vld [vmem:[%s696_s2 + $0x80] ss:$8 sps:$4 sm:$0xff]   ;;  %v518_v28 = vld [vmem:[%s696_s2 + $0xb0] ss:$8 sps:$4 sm:$0xff]  }
   0x9   :  { %v517_v27 = vld [vmem:[%s696_s2 + $0xa0] ss:$8 sps:$4 sm:$0xff]   ;;  %356 = vrot.lane.b32.xlu0 %v21_v6, %s542_s29 }
   0xa   :  { %444 = vmatmul.mubr.msk.bf16.vlgmr.msra.gmra.mrb[0].mxu0 %vm74_vm0, %v53_v8  ;;  %v47_v58 = vld [vmem:[%s699_s3 + $0x1] ss:$0 sm:$0xff] }
   0xb   :  { %145 = vmatpush1.bf16.msra.mxu0 %v505_v9  ;;  %176 = vmatprep.mubr.bf16.mxu0 %v539_v1 }
   0xc   :  { %146 = vmatprep.subr.bf16.mxu0 %v510_v10  ;;  %472 = vmatpush3.bf16.msra.mxu1 %v512_v22 }
   0xd   :  { %473 = vmatprep.subr.bf16.mxu1 %v540_v20 }
   0xf   :  { %147 = vmatpush1.bf16.msra.mxu0 %v508_v11 }
  0x10   :  { %474 = vmatpush3.bf16.msra.mxu1 %v513_v23 }
  0x11   :  { %475 = vmatprep.subr.bf16.mxu1 %v540_v20 }
  0x14   :  { %476 = vmatpush3.bf16.msra.mxu1 %v514_v24 }
  0x15   :  { %477 = vmatprep.subr.bf16.mxu1 %v540_v20 }
  0x16   :  { %449 = vmatmul.mubr.msk.bf16.vlgmr.msra.gmra.mrb[0].mxu0 %vm74_vm0, %v52_v14 }
  0x18   :  { %478 = vmatpush3.bf16.msra.mxu1 %v515_v25 }
  0x19   :  { %479 = vmatprep.subr.bf16.mxu1 %v540_v20 }
  0x1c   :  { %480 = vmatpush3.bf16.msra.mxu1 %v516_v26 }
  0x1d   :  { %481 = vmatprep.subr.bf16.mxu1 %v540_v20 }
  0x20   :  { %482 = vmatpush3.bf16.msra.mxu1 %v517_v27 }
  0x21   :  { %483 = vmatprep.subr.bf16.mxu1 %v540_v20 }
  0x24   :  { %484 = vmatpush3.bf16.msra.mxu1 %v518_v28 }
  0x76   :  { %v355_v7 = vpop.permute.xlu0 %354 }
  0x7b   :  { %v357_v9 = vpop.permute.xlu0 %356 }
  0xe9   :  { %v178_v31 = vpop.f32.mrb[0].mxu0 }
  0xea   :  { %v198_v32 = vadd.f32 %v191_v30, %v178_v31  ;;  %v180_v33 = vpop.f32.mrb[1].mxu0 }
  0xeb   :  { %v643_v34 = vadd.f32 %v195_v21, %v180_v33  ;;  %v182_v35 = vpop.f32.mrb[2].mxu0 }
  0xec   :  { %v206_v36 = vmul.f32 0.044715, %v198_v32  ;;  %v200_v37 = vadd.f32 %v191_v30, %v182_v35  ;;  %v184_v38 = vpop.f32.mrb[3].mxu0  ;;  %v202_v52 = vmul.f32 0.5, %v198_v32 }
  0xed   :  { %v645_v39 = vadd.f32 %v195_v21, %v184_v38  ;;  %v207_v19 = vmul.f32 0.044715, %v643_v34  ;;  %v203_v35 = vmul.f32 0.5, %v643_v34 }
  0xee   :  { %v210_v40 = vmul.f32 %v206_v36, %v198_v32  ;;  %v208_v41 = vmul.f32 0.044715, %v200_v37  ;;  %v204_v53 = vmul.f32 0.5, %v200_v37 }
  0xef   :  { %v211_v20 = vmul.f32 %v207_v19, %v643_v34  ;;  %v209_v21 = vmul.f32 0.044715, %v645_v39 }
  0xf0   :  { %v214_v42 = vmul.f32 %v210_v40, %v198_v32  ;;  %v212_v43 = vmul.f32 %v208_v41, %v200_v37 }
  0xf1   :  { %v213_v22 = vmul.f32 %v209_v21, %v645_v39  ;;  %v215_v23 = vmul.f32 %v211_v20, %v643_v34 }
  0xf2   :  { %v216_v44 = vmul.f32 %v212_v43, %v200_v37  ;;  %v218_v45 = vadd.f32 %v214_v42, %v198_v32  ;;  %v48_v42 = vld [vmem:[%s699_s3 + $0x2] ss:$0 sm:$0xff] }
  0xf3   :  { %v219_v24 = vadd.f32 %v215_v23, %v643_v34  ;;  %v217_v25 = vmul.f32 %v213_v22, %v645_v39 }
  0xf4   :  { %v220_v46 = vadd.f32 %v216_v44, %v200_v37  ;;  %v222_v47 = vmul.f32 0.7978846, %v218_v45  ;;  %v205_v45 = vmul.f32 0.5, %v645_v39 }
  0xf5   :  { %v223_v26 = vmul.f32 0.7978846, %v219_v24  ;;  %v221_v27 = vadd.f32 %v217_v25, %v645_v39 }
  0xf6   :  { %v224_v48 = vmul.f32 0.7978846, %v220_v46  ;;  %519 = vtanh.f32 %v222_v47 }
  0xf7   :  { %v225_v28 = vmul.f32 0.7978846, %v221_v27 }
  0xf8   :  { %521 = vtanh.f32 %v224_v48 }
 0x100   :  { %v520_v49 = vpop.eup %519 }
 0x101   :  { %v230_v50 = vadd.f32 1.0, %v520_v49 }
 0x102   :  { %v522_v51 = vpop.eup %521 }
 0x103   :  { %v232_v54 = vadd.f32 1.0, %v522_v51  ;;  %v234_v55 = vmul.f32 %v230_v50, %v202_v52 }
 0x105   :  { %v236_v56 = vmul.f32 %v232_v54, %v204_v53 }
 0x107   :  { %v248_v57 = vpack.c.bf16 %v236_v56, %v234_v55 }
 0x109   :  { %486 = vmatmul.mubr.bf16.vlgmr.msra.gmra.mrb[0].mxu1 %v248_v57 }
 0x1dc   :  { %v331_v59 = vpop.f32.mrb[0].mxu1 }
 0x1dd   :  { %v332_v60 = vadd.f32 %v331_v59, %v47_v58  ;;  %v487_v61 = vpop.f32.mrb[1].mxu1 }
 0x1de   :  { %v334_v62 = vpop.f32.mrb[2].mxu1 }
 0x1df   :  { %v458_v63 = vmul.f32 -1.442695, %v332_v60  ;;  %v335_v0 = vadd.f32 %v334_v62, %v47_v58  ;;  %374 = vrot.lane.b32.xlu1 %v332_v60, %s543_s5  ;;  %v488_v1 = vpop.f32.mrb[3].mxu1  ;;  %v51_v62 = vld [vmem:[%s699_s3 + $0x5] ss:$0 sm:$0xff] }
 0x1e1   :  { %523 = vpow2.f32 %v458_v63  ;;  %v459_v2 = vmul.f32 -1.442695, %v335_v0 }
 0x1e3   :  { %525 = vpow2.f32 %v459_v2  ;;  %376 = vrot.lane.b32.xlu1 %v335_v0, %s543_s5 }
 0x1eb   :  { %v524_v3 = vpop.eup %523 }
 0x1ec   :  { %v344_v4 = vadd.f32 1.0, %v524_v3 }
 0x1ed   :  { %v526_v5 = vpop.eup %525 }
 0x1ee   :  { %527 = vrcp.f32 %v344_v4  ;;  %v345_v6 = vadd.f32 1.0, %v526_v5 }
 0x1f0   :  { %529 = vrcp.f32 %v345_v6 }
 0x1f1   :  { %531 = vtanh.f32 %v223_v26 }
 0x1f2   :  { %533 = vtanh.f32 %v225_v28 }
 0x1f8   :  { %v528_v8 = vpop.eup %527 }
 0x1f9   :  { %v360_v10 = vmul.f32 %v528_v8, %v355_v7  ;;  %v350_v33 = vmul.f32 %v528_v8, %v604_v12 }
 0x1fa   :  { %v530_v11 = vpop.eup %529 }
 0x1fb   :  { %v361_v14 = vmul.f32 %v530_v11, %v357_v9  ;;  %364 = vrot.lane.b32.xlu0 %v360_v10, %s543_s5  ;;  %v532_v29 = vpop.eup %531  ;;  %v351_v43 = vmul.f32 %v530_v11, %v609_v13  ;;  %v49_v10 = vld [vmem:[%s699_s3 + $0x3] ss:$0 sm:$0xff] }
 0x1fc   :  { %v231_v30 = vadd.f32 1.0, %v532_v29  ;;  %v534_v31 = vpop.eup %533 }
 0x1fd   :  { %366 = vrot.lane.b32.xlu1 %v361_v14, %s543_s5  ;;  %v233_v38 = vadd.f32 1.0, %v534_v31  ;;  %v50_v14 = vld [vmem:[%s699_s3 + $0x4] ss:$0 sm:$0xff] }
 0x1fe   :  { %v235_v37 = vmul.f32 %v231_v30, %v203_v35 }
 0x1ff   :  { %v237_v48 = vmul.f32 %v233_v38, %v205_v45 }
 0x200   :  { %v238_v12 = vmul.f32 %v235_v37, %v48_v42 }
 0x201   :  { %v239_v52 = vmul.f32 %v237_v48, %v48_v42 }
 0x202   :  { %v240_v50 = vsel %vm74_vm0, %v238_v12, 0.0 }
 0x203   :  { %v243_v13 = vsel %vm74_vm0, %v239_v52, 0.0 }
 0x251   :  { %v375_v15 = vpop.permute.xlu1 %374 }
 0x252   :  { %v380_v16 = vmul.f32 %v528_v8, %v375_v15 }
 0x254   :  { %384 = vrot.lane.b32.xlu0 %v380_v16, %s544_s6 }
 0x255   :  { %v377_v17 = vpop.permute.xlu1 %376 }
 0x256   :  { %v381_v18 = vmul.f32 %v530_v11, %v377_v17 }
 0x258   :  { %386 = vrot.lane.b32.xlu1 %v381_v18, %s544_s6 }
 0x26d   :  { %v365_v32 = vpop.permute.xlu0 %364 }
 0x26e   :  { %v370_v36 = vadd.f32 %v365_v32, %v350_v33 }
 0x26f   :  { %v367_v40 = vpop.permute.xlu1 %366 }
 0x270   :  { %v371_v46 = vadd.f32 %v367_v40, %v351_v43 }
 0x2c6   :  { %v385_v41 = vpop.permute.xlu0 %384 }
 0x2c7   :  { %v390_v44 = vadd.f32 %v385_v41, %v370_v36 }
 0x2c9   :  { %v392_v47 = vsel %vm74_vm0, %v390_v44, 0.0 }
 0x2ca   :  { %393 = vadd.xlane.f32.xlu0 %v392_v47  ;;  %v387_v34 = vpop.permute.xlu1 %386 }
 0x2cb   :  { %v391_v49 = vadd.f32 %v387_v34, %v371_v46 }
 0x2cd   :  { %v395_v51 = vsel %vm74_vm0, %v391_v49, 0.0 }
 0x2ce   :  { %241 = vadd.xlane.f32.xlu0 %v240_v50  ;;  %396 = vadd.xlane.f32.xlu1 %v395_v51 }
 0x2d2   :  { %244 = vadd.xlane.f32.xlu0 %v243_v13 }
 0x357   :  { %v394_v53 = vpop.xlane.xlu0 %393 }
 0x358   :  { %v399_v39 = vmul.f32 0.03125, %v394_v53 }
 0x35a   :  { %v401_v54 = vsub.f32 %v390_v44, %v399_v39 }
 0x35b   :  { %v397_v55 = vpop.xlane.xlu1 %396  ;;  %v242_v63 = vpop.xlane.xlu0 %241 }
 0x35c   :  { %v400_v56 = vmul.f32 0.03125, %v397_v55  ;;  %v403_v57 = vmul.f32 %v401_v54, %v401_v54  ;;  %v246_v0 = vadd.f32 %v242_v63, %v51_v62 }
 0x35e   :  { %v402_v58 = vsub.f32 %v391_v49, %v400_v56  ;;  %v405_v59 = vsel %vm74_vm0, %v403_v57, 0.0 }
 0x35f   :  { %406 = vadd.xlane.f32.xlu1 %v405_v59  ;;  %v245_v1 = vpop.xlane.xlu0 %244 }
 0x360   :  { %v404_v60 = vmul.f32 %v402_v58, %v402_v58  ;;  %v247_v2 = vadd.f32 %v245_v1, %v51_v62 }
 0x362   :  { %v408_v61 = vsel %vm74_vm0, %v404_v60, 0.0 }
 0x363   :  { %409 = vadd.xlane.f32.xlu0 %v408_v61 }
 0x370   :  { %427 = vrot.lane.b32.xlu1 %v246_v0, %s542_s29 }
 0x379   :  { %429 = vrot.lane.b32.xlu0 %v247_v2, %s542_s29 }
 0x3ec   :  { %v407_v3 = vpop.xlane.xlu1 %406 }
 0x3ed   :  { %v411_v4 = vmul.f32 0.03125, %v407_v3 }
 0x3ef   :  { %v413_v5 = vadd.f32 1e-05, %v411_v4 }
 0x3f0   :  { %v410_v6 = vpop.xlane.xlu0 %409  ;;  %v428_v19 = vpop.permute.xlu1 %427 }
 0x3f1   :  { %535 = vrsqrt.f32 %v413_v5  ;;  %v412_v7 = vmul.f32 0.03125, %v410_v6 }
 0x3f3   :  { %v414_v8 = vadd.f32 1e-05, %v412_v7 }
 0x3f4   :  { %v430_v22 = vpop.permute.xlu0 %429 }
 0x3f5   :  { %537 = vrsqrt.f32 %v414_v8 }
 0x3fb   :  { %v536_v9 = vpop.eup %535 }
 0x3fc   :  { %v417_v11 = vmul.f32 %v536_v9, %v401_v54 }
 0x3fe   :  { %v419_v15 = vmul.f32 %v417_v11, %v49_v10 }
 0x3ff   :  { %v538_v16 = vpop.eup %537 }
 0x400   :  { %v421_v17 = vadd.f32 %v419_v15, %v50_v14  ;;  %v418_v18 = vmul.f32 %v538_v16, %v402_v58 }
 0x402   :  { %423 = vst.msk [vmem:[%s700_s4] sm:$0xff] %vm74_vm0, %v421_v17  ;;  %v420_v20 = vmul.f32 %v418_v18, %v49_v10 }
 0x403   :  { %434 = vst.msk [vmem:[%s700_s4] sm:$0xff] %vm433_vm2, %v428_v19 }
 0x404   :  { %v422_v21 = vadd.f32 %v420_v20, %v50_v14 }
 0x406   :  { %424 = vst.msk [vmem:[%s700_s4 + $0x8] sm:$0xff] %vm74_vm0, %v422_v21 }
 0x407   :  { %435 = vst.msk [vmem:[%s700_s4 + $0x8] sm:$0xff] %vm433_vm2, %v430_v22 }

// kernel: forward.13
= control target key start
LH: loop header
LB: loop body
LE: loop exit
PB: predicated region body
PF: predicated region fallthrough
CT: control target
= control target key end

     0   :  { %v541_v1 = vmov 0   ;;  %vm74_vm0 = vcmask 261120   ;;  %v188_v15 = vlaneseq  ;;  %v542_v20 = vmov 0.0   ;;  %s544_s29 = smov 32   ;;  %s545_s5 = smov 96   ;;  %s698_s2 = inlined_call_operand.vmem [shape: bf16[192,160], index: 2, kind: input, shape index: {}]   ;;  %s699_s1 = inlined_call_operand.vmem [shape: f32[12,32], index: 1, kind: input, shape index: {}]   ;;  %s700_s0 = inlined_call_operand.vmem [shape: f32[12,32], index: 0, kind: input, shape index: {}]   ;;  %s701_s3 = inlined_call_operand.vmem [shape: f32[8,160], index: 3, kind: input, shape index: {}]   ;;  %s702_s4 = inlined_call_operand.vmem [shape: f32[12,128], index: 4, kind: output, shape index: {}]  }
   0x1   :  { %v501_v0 = vld [vmem:[%s698_s2 + $0x24] ss:$8 sps:$4 sm:$0xff]   ;;  %110 = vmatprep.mubr.bf16.mxu0 %v541_v1  ;;  %v503_v2 = vld [vmem:[%s698_s2 + $0x20] ss:$8 sps:$4 sm:$0xff]   ;;  %v504_v3 = vld [vmem:[%s698_s2 + $0x34] ss:$8 sps:$4 sm:$0xff]   ;;  %471 = vmatprep.subr.bf16.mxu1 %v542_v20 }
   0x2   :  { %78 = vmatprep.subr.bf16.mxu0 %v501_v0  ;;  %v506_v4 = vld [vmem:[%s698_s2 + $0x30] ss:$8 sps:$4 sm:$0xff]   ;;  %v20_v5 = vld [vmem:[%s699_s1] sm:$0xff]  ;;  %v21_v6 = vld [vmem:[%s699_s1 + $0x8] sm:$0xf]  ;;  %v189_v16 = vshrl.u32 %v188_v15, 7 }
   0x3   :  { %79 = vmatpush1.bf16.msra.mxu0 %v503_v2  ;;  %v509_v7 = vld [vmem:[%s698_s2 + $0x4] ss:$8 sps:$4 sm:$0xff]   ;;  %v53_v8 = vpack.c.bf16 %v21_v6, %v20_v5  ;;  %v507_v9 = vld [vmem:[%s698_s2] ss:$8 sps:$4 sm:$0xff]   ;;  %v512_v10 = vld [vmem:[%s698_s2 + $0x14] ss:$8 sps:$4 sm:$0xff]   ;;  %355 = vrot.lane.b32.xlu0 %v20_v5, %s544_s29 }
   0x4   :  { %80 = vmatprep.subr.bf16.mxu0 %v504_v3  ;;  %v510_v11 = vld [vmem:[%s698_s2 + $0x10] ss:$8 sps:$4 sm:$0xff]   ;;  %v606_v12 = vld [vmem:[%s700_s0] sm:$0xff]  ;;  %v611_v13 = vld [vmem:[%s700_s0 + $0x8] sm:$0xf]  ;;  %v194_v18 = vsub.s32 1, %v189_v16 }
   0x5   :  { %v52_v14 = vpack.c.bf16 %v611_v13, %v606_v12  ;;  %v46_v17 = vld [vmem:[%s701_s3] ss:$8 sm:$0x3]  ;;  %v514_v22 = vld [vmem:[%s698_s2 + $0x50] ss:$8 sps:$4 sm:$0xff]   ;;  %vm543_vm1 = vmmov 0  }
   0x6   :  { %v513_v19 = vld [vmem:[%s698_s2 + $0x40] ss:$8 sps:$4 sm:$0xff]   ;;  %v195_v21 = vrot.slane %v46_v17, %v194_v18  ;;  %v516_v24 = vld [vmem:[%s698_s2 + $0x70] ss:$8 sps:$4 sm:$0xff]   ;;  %487 = vmatprep.mubr.msk.bf16.mxu1 %vm543_vm1, %v542_v20  ;;  %v190_v29 = vsub.s32 0, %v189_v16  ;;  %s546_s6 = smov 64  }
   0x7   :  { %81 = vmatpush1.bf16.msra.mxu0 %v506_v4  ;;  %472 = vmatpush3.bf16.msra.mxu1 %v513_v19  ;;  %v515_v23 = vld [vmem:[%s698_s2 + $0x60] ss:$8 sps:$4 sm:$0xff]   ;;  %v518_v26 = vld [vmem:[%s698_s2 + $0x90] ss:$8 sps:$4 sm:$0xff]   ;;  %vm243_vm2 = vcmask 257024   ;;  %vm434_vm3 = vcmask 269568  }
   0x8   :  { %144 = vmatprep.subr.bf16.mxu0 %v509_v7  ;;  %473 = vmatprep.subr.bf16.mxu1 %v542_v20  ;;  %v517_v25 = vld [vmem:[%s698_s2 + $0x80] ss:$8 sps:$4 sm:$0xff]   ;;  %v520_v28 = vld [vmem:[%s698_s2 + $0xb0] ss:$8 sps:$4 sm:$0xff]   ;;  %v191_v30 = vrot.slane %v46_v17, %v190_v29  ;;  %vm436_vm4 = vcmask 265472  }
   0x9   :  { %v519_v27 = vld [vmem:[%s698_s2 + $0xa0] ss:$8 sps:$4 sm:$0xff]   ;;  %357 = vrot.lane.b32.xlu0 %v21_v6, %s544_s29 }
   0xa   :  { %446 = vmatmul.mubr.msk.bf16.vlgmr.msra.gmra.mrb[0].mxu0 %vm74_vm0, %v53_v8  ;;  %v47_v58 = vld [vmem:[%s701_s3 + $0x1] ss:$0 sm:$0xff] }
   0xb   :  { %145 = vmatpush1.bf16.msra.mxu0 %v507_v9  ;;  %176 = vmatprep.mubr.bf16.mxu0 %v541_v1 }
   0xc   :  { %146 = vmatprep.subr.bf16.mxu0 %v512_v10  ;;  %474 = vmatpush3.bf16.msra.mxu1 %v514_v22 }
   0xd   :  { %475 = vmatprep.subr.bf16.mxu1 %v542_v20 }
   0xf   :  { %147 = vmatpush1.bf16.msra.mxu0 %v510_v11 }
  0x10   :  { %476 = vmatpush3.bf16.msra.mxu1 %v515_v23 }
  0x11   :  { %477 = vmatprep.subr.bf16.mxu1 %v542_v20 }
  0x14   :  { %478 = vmatpush3.bf16.msra.mxu1 %v516_v24 }
  0x15   :  { %479 = vmatprep.subr.bf16.mxu1 %v542_v20 }
  0x16   :  { %451 = vmatmul.mubr.msk.bf16.vlgmr.msra.gmra.mrb[0].mxu0 %vm74_vm0, %v52_v14 }
  0x18   :  { %480 = vmatpush3.bf16.msra.mxu1 %v517_v25 }
  0x19   :  { %481 = vmatprep.subr.bf16.mxu1 %v542_v20 }
  0x1c   :  { %482 = vmatpush3.bf16.msra.mxu1 %v518_v26 }
  0x1d   :  { %483 = vmatprep.subr.bf16.mxu1 %v542_v20 }
  0x20   :  { %484 = vmatpush3.bf16.msra.mxu1 %v519_v27 }
  0x21   :  { %485 = vmatprep.subr.bf16.mxu1 %v542_v20 }
  0x24   :  { %486 = vmatpush3.bf16.msra.mxu1 %v520_v28 }
  0x75   :  { %v356_v7 = vpop.permute.xlu0 %355 }
  0x7b   :  { %v358_v9 = vpop.permute.xlu0 %357 }
  0xe9   :  { %v178_v31 = vpop.f32.mrb[0].mxu0 }
  0xea   :  { %v198_v32 = vadd.f32 %v191_v30, %v178_v31  ;;  %v180_v33 = vpop.f32.mrb[1].mxu0 }
  0xeb   :  { %v645_v34 = vadd.f32 %v195_v21, %v180_v33  ;;  %v182_v35 = vpop.f32.mrb[2].mxu0 }
  0xec   :  { %v206_v36 = vmul.f32 0.044715, %v198_v32  ;;  %v200_v37 = vadd.f32 %v191_v30, %v182_v35  ;;  %v184_v38 = vpop.f32.mrb[3].mxu0  ;;  %v202_v52 = vmul.f32 0.5, %v198_v32 }
  0xed   :  { %v647_v39 = vadd.f32 %v195_v21, %v184_v38  ;;  %v207_v19 = vmul.f32 0.044715, %v645_v34  ;;  %v203_v35 = vmul.f32 0.5, %v645_v34 }
  0xee   :  { %v210_v40 = vmul.f32 %v206_v36, %v198_v32  ;;  %v208_v41 = vmul.f32 0.044715, %v200_v37  ;;  %v204_v53 = vmul.f32 0.5, %v200_v37 }
  0xef   :  { %v211_v20 = vmul.f32 %v207_v19, %v645_v34  ;;  %v209_v21 = vmul.f32 0.044715, %v647_v39 }
  0xf0   :  { %v214_v42 = vmul.f32 %v210_v40, %v198_v32  ;;  %v212_v43 = vmul.f32 %v208_v41, %v200_v37 }
  0xf1   :  { %v213_v22 = vmul.f32 %v209_v21, %v647_v39  ;;  %v215_v23 = vmul.f32 %v211_v20, %v645_v34 }
  0xf2   :  { %v216_v44 = vmul.f32 %v212_v43, %v200_v37  ;;  %v218_v45 = vadd.f32 %v214_v42, %v198_v32  ;;  %v48_v42 = vld [vmem:[%s701_s3 + $0x2] ss:$0 sm:$0xff] }
  0xf3   :  { %v219_v24 = vadd.f32 %v215_v23, %v645_v34  ;;  %v217_v25 = vmul.f32 %v213_v22, %v647_v39 }
  0xf4   :  { %v220_v46 = vadd.f32 %v216_v44, %v200_v37  ;;  %v222_v47 = vmul.f32 0.7978846, %v218_v45  ;;  %v205_v45 = vmul.f32 0.5, %v647_v39 }
  0xf5   :  { %v223_v26 = vmul.f32 0.7978846, %v219_v24  ;;  %v221_v27 = vadd.f32 %v217_v25, %v647_v39 }
  0xf6   :  { %v224_v48 = vmul.f32 0.7978846, %v220_v46  ;;  %521 = vtanh.f32 %v222_v47 }
  0xf7   :  { %v225_v28 = vmul.f32 0.7978846, %v221_v27 }
  0xf8   :  { %523 = vtanh.f32 %v224_v48 }
 0x100   :  { %v522_v49 = vpop.eup %521 }
 0x101   :  { %v230_v50 = vadd.f32 1.0, %v522_v49 }
 0x102   :  { %v524_v51 = vpop.eup %523 }
 0x103   :  { %v232_v54 = vadd.f32 1.0, %v524_v51  ;;  %v234_v55 = vmul.f32 %v230_v50, %v202_v52 }
 0x105   :  { %v236_v56 = vmul.f32 %v232_v54, %v204_v53 }
 0x107   :  { %v249_v57 = vpack.c.bf16 %v236_v56, %v234_v55 }
 0x109   :  { %488 = vmatmul.mubr.bf16.vlgmr.msra.gmra.mrb[0].mxu1 %v249_v57 }
 0x1dc   :  { %v332_v59 = vpop.f32.mrb[0].mxu1 }
 0x1dd   :  { %v333_v60 = vadd.f32 %v332_v59, %v47_v58  ;;  %v489_v61 = vpop.f32.mrb[1].mxu1 }
 0x1de   :  { %v335_v62 = vpop.f32.mrb[2].mxu1 }
 0x1df   :  { %v460_v63 = vmul.f32 -1.442695, %v333_v60  ;;  %v336_v0 = vadd.f32 %v335_v62, %v47_v58  ;;  %375 = vrot.lane.b32.xlu1 %v333_v60, %s545_s5  ;;  %v490_v1 = vpop.f32.mrb[3].mxu1  ;;  %v51_v62 = vld [vmem:[%s701_s3 + $0x5] ss:$0 sm:$0xff] }
 0x1e1   :  { %525 = vpow2.f32 %v460_v63  ;;  %v461_v2 = vmul.f32 -1.442695, %v336_v0 }
 0x1e3   :  { %527 = vpow2.f32 %v461_v2  ;;  %377 = vrot.lane.b32.xlu1 %v336_v0, %s545_s5 }
 0x1eb   :  { %v526_v3 = vpop.eup %525 }
 0x1ec   :  { %v345_v4 = vadd.f32 1.0, %v526_v3 }
 0x1ed   :  { %v528_v5 = vpop.eup %527 }
 0x1ee   :  { %529 = vrcp.f32 %v345_v4  ;;  %v346_v6 = vadd.f32 1.0, %v528_v5 }
 0x1f0   :  { %531 = vrcp.f32 %v346_v6 }
 0x1f1   :  { %533 = vtanh.f32 %v223_v26 }
 0x1f2   :  { %535 = vtanh.f32 %v225_v28 }
 0x1f8   :  { %v530_v8 = vpop.eup %529 }
 0x1f9   :  { %v361_v10 = vmul.f32 %v530_v8, %v356_v7  ;;  %v351_v33 = vmul.f32 %v530_v8, %v606_v12 }
 0x1fa   :  { %v532_v11 = vpop.eup %531 }
 0x1fb   :  { %v362_v14 = vmul.f32 %v532_v11, %v358_v9  ;;  %365 = vrot.lane.b32.xlu0 %v361_v10, %s545_s5  ;;  %v534_v29 = vpop.eup %533  ;;  %v352_v43 = vmul.f32 %v532_v11, %v611_v13  ;;  %v49_v10 = vld [vmem:[%s701_s3 + $0x3] ss:$0 sm:$0xff] }
 0x1fc   :  { %v231_v30 = vadd.f32 1.0, %v534_v29  ;;  %v536_v31 = vpop.eup %535 }
 0x1fd   :  { %367 = vrot.lane.b32.xlu1 %v362_v14, %s545_s5  ;;  %v233_v38 = vadd.f32 1.0, %v536_v31  ;;  %v50_v14 = vld [vmem:[%s701_s3 + $0x4] ss:$0 sm:$0xff] }
 0x1fe   :  { %v235_v37 = vmul.f32 %v231_v30, %v203_v35 }
 0x1ff   :  { %v237_v48 = vmul.f32 %v233_v38, %v205_v45 }
 0x200   :  { %v238_v12 = vmul.f32 %v235_v37, %v48_v42 }
 0x201   :  { %v239_v52 = vmul.f32 %v237_v48, %v48_v42 }
 0x202   :  { %v240_v50 = vsel %vm74_vm0, %v238_v12, 0.0 }
 0x203   :  { %v244_v13 = vsel %vm243_vm2, %v239_v52, 0.0 }
 0x251   :  { %v376_v15 = vpop.permute.xlu1 %375 }
 0x252   :  { %v381_v16 = vmul.f32 %v530_v8, %v376_v15 }
 0x254   :  { %385 = vrot.lane.b32.xlu0 %v381_v16, %s546_s6 }
 0x255   :  { %v378_v17 = vpop.permute.xlu1 %377 }
 0x256   :  { %v382_v18 = vmul.f32 %v532_v11, %v378_v17 }
 0x258   :  { %387 = vrot.lane.b32.xlu1 %v382_v18, %s546_s6 }
 0x26d   :  { %v366_v32 = vpop.permute.xlu0 %365 }
 0x26e   :  { %v371_v36 = vadd.f32 %v366_v32, %v351_v33 }
 0x26f   :  { %v368_v40 = vpop.permute.xlu1 %367 }
 0x270   :  { %v372_v46 = vadd.f32 %v368_v40, %v352_v43 }
 0x2c6   :  { %v386_v41 = vpop.permute.xlu0 %385 }
 0x2c7   :  { %v391_v44 = vadd.f32 %v386_v41, %v371_v36 }
 0x2c9   :  { %v393_v47 = vsel %vm74_vm0, %v391_v44, 0.0 }
 0x2ca   :  { %394 = vadd.xlane.f32.xlu0 %v393_v47  ;;  %v388_v34 = vpop.permute.xlu1 %387 }
 0x2cb   :  { %v392_v49 = vadd.f32 %v388_v34, %v372_v46 }
 0x2cd   :  { %v396_v51 = vsel %vm243_vm2, %v392_v49, 0.0 }
 0x2ce   :  { %241 = vadd.xlane.f32.xlu0 %v240_v50  ;;  %397 = vadd.xlane.f32.xlu1 %v396_v51 }
 0x2d2   :  { %245 = vadd.xlane.f32.xlu0 %v244_v13 }
 0x357   :  { %v395_v39 = vpop.xlane.xlu0 %394 }
 0x358   :  { %v400_v53 = vmul.f32 0.03125, %v395_v39 }
 0x35a   :  { %v402_v54 = vsub.f32 %v391_v44, %v400_v53 }
 0x35b   :  { %v398_v55 = vpop.xlane.xlu1 %397  ;;  %v242_v63 = vpop.xlane.xlu0 %241 }
 0x35c   :  { %v401_v56 = vmul.f32 0.03125, %v398_v55  ;;  %v404_v57 = vmul.f32 %v402_v54, %v402_v54  ;;  %v247_v0 = vadd.f32 %v242_v63, %v51_v62 }
 0x35e   :  { %v403_v58 = vsub.f32 %v392_v49, %v401_v56  ;;  %v406_v59 = vsel %vm74_vm0, %v404_v57, 0.0 }
 0x35f   :  { %407 = vadd.xlane.f32.xlu1 %v406_v59  ;;  %v246_v1 = vpop.xlane.xlu0 %245 }
 0x360   :  { %v405_v60 = vmul.f32 %v403_v58, %v403_v58  ;;  %v248_v2 = vadd.f32 %v246_v1, %v51_v62 }
 0x362   :  { %v409_v61 = vsel %vm243_vm2, %v405_v60, 0.0 }
 0x363   :  { %410 = vadd.xlane.f32.xlu0 %v409_v61 }
 0x370   :  { %428 = vrot.lane.b32.xlu1 %v247_v0, %s544_s29 }
 0x379   :  { %430 = vrot.lane.b32.xlu0 %v248_v2, %s544_s29 }
 0x3ec   :  { %v408_v3 = vpop.xlane.xlu1 %407 }
 0x3ed   :  { %v412_v4 = vmul.f32 0.03125, %v408_v3 }
 0x3ef   :  { %v414_v5 = vadd.f32 1e-05, %v412_v4 }
 0x3f0   :  { %v411_v6 = vpop.xlane.xlu0 %410  ;;  %v429_v19 = vpop.permute.xlu1 %428 }
 0x3f1   :  { %537 = vrsqrt.f32 %v414_v5  ;;  %v413_v7 = vmul.f32 0.03125, %v411_v6 }
 0x3f3   :  { %v415_v8 = vadd.f32 1e-05, %v413_v7 }
 0x3f4   :  { %v431_v22 = vpop.permute.xlu0 %430 }
 0x3f5   :  { %539 = vrsqrt.f32 %v415_v8 }
 0x3fb   :  { %v538_v9 = vpop.eup %537 }
 0x3fc   :  { %v418_v11 = vmul.f32 %v538_v9, %v402_v54 }
 0x3fe   :  { %v420_v15 = vmul.f32 %v418_v11, %v49_v10 }
 0x3ff   :  { %v540_v16 = vpop.eup %539 }
 0x400   :  { %v422_v17 = vadd.f32 %v420_v15, %v50_v14  ;;  %v419_v18 = vmul.f32 %v540_v16, %v403_v58 }
 0x402   :  { %424 = vst.msk [vmem:[%s702_s4] sm:$0xff] %vm74_vm0, %v422_v17  ;;  %v421_v20 = vmul.f32 %v419_v18, %v49_v10 }
 0x403   :  { %435 = vst.msk [vmem:[%s702_s4] sm:$0xff] %vm434_vm3, %v429_v19 }
 0x404   :  { %v423_v21 = vadd.f32 %v421_v20, %v50_v14 }
 0x406   :  { %425 = vst.msk [vmem:[%s702_s4 + $0x8] sm:$0xf] %vm243_vm2, %v423_v21 }
 0x407   :  { %437 = vst.msk [vmem:[%s702_s4 + $0x8] sm:$0xf] %vm436_vm4, %v431_v22 }

// kernel: squeeze.37
= control target key start
LH: loop header
LB: loop body
LE: loop exit
PB: predicated region body
PF: predicated region fallthrough
CT: control target
= control target key end

     0   :  { %s37_s8 = smov 122   ;;  %vm7_vm0 = vcmask 15360   ;;  %s38_s9 = smov 124   ;;  %s55_s0 = inlined_call_operand.vmem [shape: f32[8], index: 0, kind: input, shape index: {}]   ;;  %s56_s1 = inlined_call_operand.vmem [shape: f32[4,2], index: 1, kind: output, shape index: {}]  }
   0x1   :  { %v4_v0 = vld [vmem:[%s55_s0] sm:$0x1]  ;;  %s36_s0 = smov 126  }
   0x2   :  { %5 = vst [vmem:[#allocation1] sm:$0x1] %v4_v0 }
   0x9   :  { %v9_v1 = vld [vmem:[#allocation1] sm:$0x1]  }
   0xa   :  { %v21_v2 = vld [vmem:[#allocation1] sm:$0x1]   ;;  %10 = vrot.lane.b32.xlu0 %v9_v1, %s36_s0 }
   0xb   :  { %22 = vrot.lane.b32.xlu1 %v21_v2, %s37_s8  ;;  %v6_v3 = vld [vmem:[#allocation1] sm:$0x1]  }
   0xc   :  { %v15_v4 = vld [vmem:[#allocation1] sm:$0x1]   ;;  %8 = vst.msk [vmem:[#allocation0] sm:$0x1] %vm7_vm0, %v6_v3  }
   0xe   :  { %16 = vrot.lane.b32.xlu0 %v15_v4, %s38_s9 }
  0x7c   :  { %v11_v5 = vpop.permute.xlu0 %10  }
  0x7d   :  { %v23_v6 = vpop.permute.xlu1 %22   ;;  %14 = vst.msk [vmem:[#allocation0 + $0x1] sm:$0x1] %vm7_vm0, %v11_v5  }
  0x7e   :  { %26 = vst.msk [vmem:[#allocation0 + $0x3] sm:$0x1] %vm7_vm0, %v23_v6  }
  0x80   :  { %v17_v7 = vpop.permute.xlu0 %16  }
  0x81   :  { %20 = vst.msk [vmem:[#allocation0 + $0x2] sm:$0x1] %vm7_vm0, %v17_v7  }
  0x88   :  { %v30_v8 = vld [vmem:[#allocation0] sm:$0xf] }
  0x89   :  { %32 = vst [vmem:[%s56_s1] sm:$0xf] %v30_v8 }

// kernel: forward.14
= control target key start
LH: loop header
LB: loop body
LE: loop exit
PB: predicated region body
PF: predicated region fallthrough
CT: control target
= control target key end

     0   :  { %v444_v1 = vmov 0   ;;  %vm72_vm0 = vcmask 261120   ;;  %v182_v13 = vlaneseq  ;;  %v445_v17 = vmov 0.0   ;;  %s447_s25 = smov 32   ;;  %s448_s27 = smov 96   ;;  %s566_s2 = inlined_call_operand.vmem [shape: bf16[192,160], index: 2, kind: input, shape index: {}]   ;;  %s567_s1 = inlined_call_operand.vmem [shape: f32[8,32], index: 1, kind: input, shape index: {}]   ;;  %s568_s0 = inlined_call_operand.vmem [shape: f32[8,32], index: 0, kind: input, shape index: {}]   ;;  %s569_s3 = inlined_call_operand.vmem [shape: f32[8,160], index: 3, kind: input, shape index: {}]   ;;  %s570_s4 = inlined_call_operand.vmem [shape: f32[8,128], index: 4, kind: output, shape index: {}]  }
   0x1   :  { %v414_v0 = vld [vmem:[%s566_s2 + $0x24] ss:$8 sps:$4 sm:$0xff]   ;;  %108 = vmatprep.mubr.bf16.mxu1 %v444_v1  ;;  %v416_v2 = vld [vmem:[%s566_s2 + $0x20] ss:$8 sps:$4 sm:$0xff]   ;;  %v417_v3 = vld [vmem:[%s566_s2 + $0x34] ss:$8 sps:$4 sm:$0xff]   ;;  %388 = vmatprep.subr.bf16.mxu0 %v445_v17 }
   0x2   :  { %76 = vmatprep.subr.bf16.mxu1 %v414_v0  ;;  %v419_v4 = vld [vmem:[%s566_s2 + $0x30] ss:$8 sps:$4 sm:$0xff]   ;;  %v19_v5 = vld [vmem:[%s567_s1] sm:$0xff]  ;;  %v425_v9 = vld [vmem:[%s566_s2 + $0x14] ss:$8 sps:$4 sm:$0xff]   ;;  %v183_v14 = vshrl.u32 %v182_v13, 7 }
   0x3   :  { %77 = vmatpush1.bf16.msra.mxu1 %v416_v2  ;;  %v422_v6 = vld [vmem:[%s566_s2 + $0x4] ss:$8 sps:$4 sm:$0xff]   ;;  %v420_v7 = vld [vmem:[%s566_s2] ss:$8 sps:$4 sm:$0xff]   ;;  %v51_v8 = vpack.c.bf16 %v19_v5, %v19_v5  ;;  %v423_v10 = vld [vmem:[%s566_s2 + $0x10] ss:$8 sps:$4 sm:$0xff]   ;;  %314 = vrot.lane.b32.xlu0 %v19_v5, %s447_s25 }
   0x4   :  { %78 = vmatprep.subr.bf16.mxu1 %v417_v3  ;;  %v506_v11 = vld [vmem:[%s568_s0] sm:$0xff]  ;;  %v188_v18 = vsub.s32 1, %v183_v14  ;;  %v427_v20 = vld [vmem:[%s566_s2 + $0x50] ss:$8 sps:$4 sm:$0xff]   ;;  %vm446_vm1 = vmmov 0   ;;  %v184_v31 = vsub.s32 0, %v183_v14 }
   0x5   :  { %v50_v12 = vpack.c.bf16 %v506_v11, %v506_v11  ;;  %v44_v15 = vld [vmem:[%s569_s3] ss:$8 sm:$0x3]  ;;  %v429_v22 = vld [vmem:[%s566_s2 + $0x70] ss:$8 sps:$4 sm:$0xff]   ;;  %404 = vmatprep.mubr.msk.bf16.mxu0 %vm446_vm1, %v445_v17  ;;  %s449_s28 = smov 64  }
   0x6   :  { %v426_v16 = vld [vmem:[%s566_s2 + $0x40] ss:$8 sps:$4 sm:$0xff]   ;;  %v189_v19 = vrot.slane %v44_v15, %v188_v18  ;;  %v431_v24 = vld [vmem:[%s566_s2 + $0x90] ss:$8 sps:$4 sm:$0xff]   ;;  %v185_v32 = vrot.slane %v44_v15, %v184_v31  ;;  %vm354_vm2 = vcmask 269568  }
   0x7   :  { %79 = vmatpush1.bf16.msra.mxu1 %v419_v4  ;;  %389 = vmatpush3.bf16.msra.mxu0 %v426_v16  ;;  %v428_v21 = vld [vmem:[%s566_s2 + $0x60] ss:$8 sps:$4 sm:$0xff]   ;;  %v433_v26 = vld [vmem:[%s566_s2 + $0xb0] ss:$8 sps:$4 sm:$0xff]  }
   0x8   :  { %140 = vmatprep.subr.bf16.mxu1 %v422_v6  ;;  %390 = vmatprep.subr.bf16.mxu0 %v445_v17  ;;  %v430_v23 = vld [vmem:[%s566_s2 + $0x80] ss:$8 sps:$4 sm:$0xff]  }
   0x9   :  { %v432_v25 = vld [vmem:[%s566_s2 + $0xa0] ss:$8 sps:$4 sm:$0xff]  }
   0xa   :  { %364 = vmatmul.mubr.msk.bf16.vlgmr.msra.gmra.mrb[0].mxu1 %vm72_vm0, %v51_v8  ;;  %v45_v51 = vld [vmem:[%s569_s3 + $0x1] ss:$0 sm:$0xff]  ;;  %v47_v31 = vld [vmem:[%s569_s3 + $0x3] ss:$0 sm:$0xff] }
   0xb   :  { %141 = vmatpush1.bf16.msra.mxu1 %v420_v7  ;;  %172 = vmatprep.mubr.bf16.mxu1 %v444_v1 }
   0xc   :  { %142 = vmatprep.subr.bf16.mxu1 %v425_v9  ;;  %391 = vmatpush3.bf16.msra.mxu0 %v427_v20 }
   0xd   :  { %392 = vmatprep.subr.bf16.mxu0 %v445_v17 }
   0xf   :  { %143 = vmatpush1.bf16.msra.mxu1 %v423_v10  ;;  %v46_v10 = vld [vmem:[%s569_s3 + $0x2] ss:$0 sm:$0xff] }
  0x10   :  { %393 = vmatpush3.bf16.msra.mxu0 %v428_v21 }
  0x11   :  { %394 = vmatprep.subr.bf16.mxu0 %v445_v17 }
  0x12   :  { %369 = vmatmul.mubr.msk.bf16.vlgmr.msra.gmra.mrb[4].mxu1 %vm72_vm0, %v50_v12 }
  0x14   :  { %395 = vmatpush3.bf16.msra.mxu0 %v429_v22 }
  0x15   :  { %396 = vmatprep.subr.bf16.mxu0 %v445_v17 }
  0x18   :  { %397 = vmatpush3.bf16.msra.mxu0 %v430_v23 }
  0x19   :  { %398 = vmatprep.subr.bf16.mxu0 %v445_v17 }
  0x1c   :  { %399 = vmatpush3.bf16.msra.mxu0 %v431_v24 }
  0x1d   :  { %400 = vmatprep.subr.bf16.mxu0 %v445_v17 }
  0x20   :  { %401 = vmatpush3.bf16.msra.mxu0 %v432_v25  ;;  %v49_v25 = vld [vmem:[%s569_s3 + $0x5] ss:$0 sm:$0xff] }
  0x21   :  { %402 = vmatprep.subr.bf16.mxu0 %v445_v17 }
  0x24   :  { %403 = vmatpush3.bf16.msra.mxu0 %v433_v26 }
  0x75   :  { %v315_v60 = vpop.permute.xlu0 %314 }
  0xdd   :  { %v110_v27 = vpop.f32.mrb[0].mxu1 }
  0xde   :  { %v112_v28 = vpop.f32.mrb[1].mxu1 }
  0xdf   :  { %v114_v29 = vpop.f32.mrb[2].mxu1 }
  0xe0   :  { %v115_v30 = vpop.f32.mrb[3].mxu1 }
  0xe5   :  { %v174_v33 = vpop.f32.mrb[4].mxu1 }
  0xe6   :  { %v175_v34 = vadd.f32 %v174_v33, %v110_v27  ;;  %v176_v35 = vpop.f32.mrb[5].mxu1  ;;  %v48_v33 = vld [vmem:[%s569_s3 + $0x4] ss:$0 sm:$0xff] }
  0xe7   :  { %v177_v36 = vadd.f32 %v176_v35, %v112_v28  ;;  %v178_v37 = vpop.f32.mrb[6].mxu1 }
  0xe8   :  { %v192_v38 = vadd.f32 %v185_v32, %v175_v34  ;;  %v179_v39 = vpop.f32.mrb[7].mxu1 }
  0xe9   :  { %v193_v40 = vadd.f32 %v189_v19, %v177_v36 }
  0xea   :  { %v196_v41 = vmul.f32 0.044715, %v192_v38  ;;  %v194_v47 = vmul.f32 0.5, %v192_v38 }
  0xeb   :  { %v197_v63 = vmul.f32 0.044715, %v193_v40  ;;  %v195_v8 = vmul.f32 0.5, %v193_v40 }
  0xec   :  { %v198_v42 = vmul.f32 %v196_v41, %v192_v38 }
  0xed   :  { %v199_v0 = vmul.f32 %v197_v63, %v193_v40 }
  0xee   :  { %v200_v43 = vmul.f32 %v198_v42, %v192_v38 }
  0xef   :  { %v201_v3 = vmul.f32 %v199_v0, %v193_v40 }
  0xf0   :  { %v202_v44 = vadd.f32 %v200_v43, %v192_v38 }
  0xf1   :  { %v203_v4 = vadd.f32 %v201_v3, %v193_v40 }
  0xf2   :  { %v204_v45 = vmul.f32 0.7978846, %v202_v44 }
  0xf3   :  { %v205_v5 = vmul.f32 0.7978846, %v203_v4 }
  0xf4   :  { %434 = vtanh.f32 %v204_v45 }
  0xfe   :  { %v435_v46 = vpop.eup %434 }
  0xff   :  { %v208_v48 = vadd.f32 1.0, %v435_v46 }
 0x101   :  { %v210_v49 = vmul.f32 %v208_v48, %v194_v47 }
 0x103   :  { %v217_v50 = vpack.c.bf16 %v210_v49, %v210_v49 }
 0x105   :  { %405 = vmatmul.mubr.bf16.vlgmr.msra.gmra.mrb[0].mxu0 %v217_v50 }
 0x1d8   :  { %v300_v52 = vpop.f32.mrb[0].mxu0 }
 0x1d9   :  { %v301_v53 = vadd.f32 %v300_v52, %v45_v51  ;;  %v406_v54 = vpop.f32.mrb[1].mxu0 }
 0x1da   :  { %v303_v55 = vpop.f32.mrb[2].mxu0 }
 0x1db   :  { %v378_v56 = vmul.f32 -1.442695, %v301_v53  ;;  %324 = vrot.lane.b32.xlu0 %v301_v53, %s448_s27  ;;  %v407_v57 = vpop.f32.mrb[3].mxu0 }
 0x1dd   :  { %436 = vpow2.f32 %v378_v56 }
 0x1e7   :  { %v437_v58 = vpop.eup %436 }
 0x1e8   :  { %v309_v59 = vadd.f32 1.0, %v437_v58 }
 0x1ea   :  { %438 = vrcp.f32 %v309_v59 }
 0x1eb   :  { %440 = vtanh.f32 %v205_v5 }
 0x1f4   :  { %v439_v61 = vpop.eup %438 }
 0x1f5   :  { %v317_v62 = vmul.f32 %v439_v61, %v315_v60  ;;  %v441_v6 = vpop.eup %440  ;;  %v312_v15 = vmul.f32 %v439_v61, %v506_v11 }
 0x1f6   :  { %v209_v7 = vadd.f32 1.0, %v441_v6 }
 0x1f7   :  { %319 = vrot.lane.b32.xlu1 %v317_v62, %s448_s27 }
 0x1f8   :  { %v211_v9 = vmul.f32 %v209_v7, %v195_v8 }
 0x1fa   :  { %v212_v12 = vmul.f32 %v211_v9, %v46_v10 }
 0x1fc   :  { %v213_v13 = vsel %vm72_vm0, %v212_v12, 0.0 }
 0x24d   :  { %v325_v1 = vpop.permute.xlu0 %324 }
 0x24e   :  { %v327_v2 = vmul.f32 %v439_v61, %v325_v1 }
 0x250   :  { %329 = vrot.lane.b32.xlu1 %v327_v2, %s449_s28 }
 0x269   :  { %v320_v14 = vpop.permute.xlu1 %319 }
 0x26a   :  { %v322_v16 = vadd.f32 %v320_v14, %v312_v15 }
 0x274   :  { %214 = vadd.xlane.f32.xlu1 %v213_v13 }
 0x2c2   :  { %v330_v17 = vpop.permute.xlu1 %329 }
 0x2c3   :  { %v332_v18 = vadd.f32 %v330_v17, %v322_v16 }
 0x2c5   :  { %v333_v19 = vsel %vm72_vm0, %v332_v18, 0.0 }
 0x2c6   :  { %334 = vadd.xlane.f32.xlu0 %v333_v19 }
 0x301   :  { %v215_v26 = vpop.xlane.xlu1 %214 }
 0x302   :  { %v216_v27 = vadd.f32 %v215_v26, %v49_v25 }
 0x353   :  { %v335_v20 = vpop.xlane.xlu0 %334 }
 0x354   :  { %v337_v21 = vmul.f32 0.03125, %v335_v20 }
 0x356   :  { %v338_v22 = vsub.f32 %v332_v18, %v337_v21 }
 0x358   :  { %v339_v23 = vmul.f32 %v338_v22, %v338_v22 }
 0x35a   :  { %v340_v24 = vsel %vm72_vm0, %v339_v23, 0.0 }
 0x35b   :  { %341 = vadd.xlane.f32.xlu0 %v340_v24 }
 0x371   :  { %351 = vrot.lane.b32.xlu0 %v216_v27, %s447_s25 }
 0x3e8   :  { %v342_v11 = vpop.xlane.xlu0 %341 }
 0x3e9   :  { %v343_v28 = vmul.f32 0.03125, %v342_v11 }
 0x3eb   :  { %v344_v29 = vadd.f32 1e-05, %v343_v28 }
 0x3ec   :  { %v352_v36 = vpop.permute.xlu0 %351 }
 0x3ed   :  { %442 = vrsqrt.f32 %v344_v29 }
 0x3f7   :  { %v443_v30 = vpop.eup %442 }
 0x3f8   :  { %v346_v32 = vmul.f32 %v443_v30, %v338_v22 }
 0x3fa   :  { %v347_v34 = vmul.f32 %v346_v32, %v47_v31 }
 0x3fc   :  { %v348_v35 = vadd.f32 %v347_v34, %v48_v33 }
 0x3fe   :  { %349 = vst.msk [vmem:[%s570_s4] sm:$0xff] %vm72_vm0, %v348_v35 }
 0x3ff   :  { %355 = vst.msk [vmem:[%s570_s4] sm:$0xff] %vm354_vm2, %v352_v36 }

// kernel: forward.15
= control target key start
LH: loop header
LB: loop body
LE: loop exit
PB: predicated region body
PF: predicated region fallthrough
CT: control target
= control target key end

     0   :  { %v445_v1 = vmov 0   ;;  %vm72_vm0 = vcmask 261120   ;;  %v182_v13 = vlaneseq  ;;  %v446_v17 = vmov 0.0   ;;  %s448_s25 = smov 32   ;;  %s449_s27 = smov 96   ;;  %s565_s2 = inlined_call_operand.vmem [shape: bf16[192,160], index: 2, kind: input, shape index: {}]   ;;  %s566_s1 = inlined_call_operand.vmem [shape: f32[4,32], index: 1, kind: input, shape index: {}]   ;;  %s567_s0 = inlined_call_operand.vmem [shape: f32[4,32], index: 0, kind: input, shape index: {}]   ;;  %s568_s3 = inlined_call_operand.vmem [shape: f32[8,160], index: 3, kind: input, shape index: {}]   ;;  %s569_s4 = inlined_call_operand.vmem [shape: f32[4,128], index: 4, kind: output, shape index: {}]  }
   0x1   :  { %v415_v0 = vld [vmem:[%s565_s2 + $0x24] ss:$8 sps:$4 sm:$0xff]   ;;  %108 = vmatprep.mubr.bf16.mxu1 %v445_v1  ;;  %v417_v2 = vld [vmem:[%s565_s2 + $0x20] ss:$8 sps:$4 sm:$0xff]   ;;  %v418_v3 = vld [vmem:[%s565_s2 + $0x34] ss:$8 sps:$4 sm:$0xff]   ;;  %389 = vmatprep.subr.bf16.mxu0 %v446_v17 }
   0x2   :  { %76 = vmatprep.subr.bf16.mxu1 %v415_v0  ;;  %v420_v4 = vld [vmem:[%s565_s2 + $0x30] ss:$8 sps:$4 sm:$0xff]   ;;  %v19_v5 = vld [vmem:[%s566_s1] sm:$0xf]  ;;  %v423_v6 = vld [vmem:[%s565_s2 + $0x4] ss:$8 sps:$4 sm:$0xff]  }
   0x3   :  { %77 = vmatpush1.bf16.msra.mxu1 %v417_v2  ;;  %v421_v7 = vld [vmem:[%s565_s2] ss:$8 sps:$4 sm:$0xff]   ;;  %v51_v8 = vpack.c.bf16 %v19_v5, %v19_v5  ;;  %v426_v9 = vld [vmem:[%s565_s2 + $0x14] ss:$8 sps:$4 sm:$0xff]   ;;  %v424_v10 = vld [vmem:[%s565_s2 + $0x10] ss:$8 sps:$4 sm:$0xff]   ;;  %315 = vrot.lane.b32.xlu0 %v19_v5, %s448_s25 }
   0x4   :  { %78 = vmatprep.subr.bf16.mxu1 %v418_v3  ;;  %v506_v11 = vld [vmem:[%s567_s0] sm:$0xf]  ;;  %v183_v14 = vshrl.u32 %v182_v13, 7  ;;  %v428_v20 = vld [vmem:[%s565_s2 + $0x50] ss:$8 sps:$4 sm:$0xff]   ;;  %vm447_vm1 = vmmov 0  }
   0x5   :  { %v50_v12 = vpack.c.bf16 %v506_v11, %v506_v11  ;;  %v44_v15 = vld [vmem:[%s568_s3] ss:$8 sm:$0x3]  ;;  %v430_v22 = vld [vmem:[%s565_s2 + $0x70] ss:$8 sps:$4 sm:$0xff]   ;;  %405 = vmatprep.mubr.msk.bf16.mxu0 %vm447_vm1, %v446_v17  ;;  %s450_s28 = smov 64  }
   0x6   :  { %v427_v16 = vld [vmem:[%s565_s2 + $0x40] ss:$8 sps:$4 sm:$0xff]   ;;  %v188_v18 = vsub.s32 1, %v183_v14  ;;  %v432_v24 = vld [vmem:[%s565_s2 + $0x90] ss:$8 sps:$4 sm:$0xff]   ;;  %v184_v31 = vsub.s32 0, %v183_v14 }
   0x7   :  { %79 = vmatpush1.bf16.msra.mxu1 %v420_v4  ;;  %390 = vmatpush3.bf16.msra.mxu0 %v427_v16  ;;  %v429_v21 = vld [vmem:[%s565_s2 + $0x60] ss:$8 sps:$4 sm:$0xff]   ;;  %v434_v26 = vld [vmem:[%s565_s2 + $0xb0] ss:$8 sps:$4 sm:$0xff]   ;;  %vm213_vm2 = vcmask 257024   ;;  %vm355_vm3 = vcmask 265472  }
   0x8   :  { %140 = vmatprep.subr.bf16.mxu1 %v423_v6  ;;  %v189_v19 = vrot.slane %v44_v15, %v188_v18  ;;  %391 = vmatprep.subr.bf16.mxu0 %v446_v17  ;;  %v431_v23 = vld [vmem:[%s565_s2 + $0x80] ss:$8 sps:$4 sm:$0xff]   ;;  %v185_v32 = vrot.slane %v44_v15, %v184_v31 }
   0x9   :  { %v433_v25 = vld [vmem:[%s565_s2 + $0xa0] ss:$8 sps:$4 sm:$0xff]  }
   0xa   :  { %365 = vmatmul.mubr.msk.bf16.vlgmr.msra.gmra.mrb[0].mxu1 %vm72_vm0, %v51_v8  ;;  %v45_v51 = vld [vmem:[%s568_s3 + $0x1] ss:$0 sm:$0xff]  ;;  %v47_v31 = vld [vmem:[%s568_s3 + $0x3] ss:$0 sm:$0xff] }
   0xb   :  { %141 = vmatpush1.bf16.msra.mxu1 %v421_v7  ;;  %172 = vmatprep.mubr.bf16.mxu1 %v445_v1 }
   0xc   :  { %142 = vmatprep.subr.bf16.mxu1 %v426_v9  ;;  %392 = vmatpush3.bf16.msra.mxu0 %v428_v20 }
   0xd   :  { %393 = vmatprep.subr.bf16.mxu0 %v446_v17 }
   0xf   :  { %143 = vmatpush1.bf16.msra.mxu1 %v424_v10  ;;  %v46_v10 = vld [vmem:[%s568_s3 + $0x2] ss:$0 sm:$0xff] }
  0x10   :  { %394 = vmatpush3.bf16.msra.mxu0 %v429_v21 }
  0x11   :  { %395 = vmatprep.subr.bf16.mxu0 %v446_v17 }
  0x12   :  { %370 = vmatmul.mubr.msk.bf16.vlgmr.msra.gmra.mrb[4].mxu1 %vm72_vm0, %v50_v12 }
  0x14   :  { %396 = vmatpush3.bf16.msra.mxu0 %v430_v22 }
  0x15   :  { %397 = vmatprep.subr.bf16.mxu0 %v446_v17 }
  0x18   :  { %398 = vmatpush3.bf16.msra.mxu0 %v431_v23 }
  0x19   :  { %399 = vmatprep.subr.bf16.mxu0 %v446_v17 }
  0x1c   :  { %400 = vmatpush3.bf16.msra.mxu0 %v432_v24 }
  0x1d   :  { %401 = vmatprep.subr.bf16.mxu0 %v446_v17 }
  0x20   :  { %402 = vmatpush3.bf16.msra.mxu0 %v433_v25  ;;  %v49_v25 = vld [vmem:[%s568_s3 + $0x5] ss:$0 sm:$0xff] }
  0x21   :  { %403 = vmatprep.subr.bf16.mxu0 %v446_v17 }
  0x24   :  { %404 = vmatpush3.bf16.msra.mxu0 %v434_v26 }
  0x75   :  { %v316_v60 = vpop.permute.xlu0 %315 }
  0xdd   :  { %v110_v27 = vpop.f32.mrb[0].mxu1 }
  0xde   :  { %v112_v28 = vpop.f32.mrb[1].mxu1 }
  0xdf   :  { %v114_v29 = vpop.f32.mrb[2].mxu1 }
  0xe0   :  { %v115_v30 = vpop.f32.mrb[3].mxu1 }
  0xe5   :  { %v174_v33 = vpop.f32.mrb[4].mxu1 }
  0xe6   :  { %v175_v34 = vadd.f32 %v174_v33, %v110_v27  ;;  %v176_v35 = vpop.f32.mrb[5].mxu1  ;;  %v48_v33 = vld [vmem:[%s568_s3 + $0x4] ss:$0 sm:$0xff] }
  0xe7   :  { %v177_v36 = vadd.f32 %v176_v35, %v112_v28  ;;  %v178_v37 = vpop.f32.mrb[6].mxu1 }
  0xe8   :  { %v192_v38 = vadd.f32 %v185_v32, %v175_v34  ;;  %v179_v39 = vpop.f32.mrb[7].mxu1 }
  0xe9   :  { %v193_v40 = vadd.f32 %v189_v19, %v177_v36 }
  0xea   :  { %v196_v41 = vmul.f32 0.044715, %v192_v38  ;;  %v194_v47 = vmul.f32 0.5, %v192_v38 }
  0xeb   :  { %v197_v63 = vmul.f32 0.044715, %v193_v40  ;;  %v195_v8 = vmul.f32 0.5, %v193_v40 }
  0xec   :  { %v198_v42 = vmul.f32 %v196_v41, %v192_v38 }
  0xed   :  { %v199_v0 = vmul.f32 %v197_v63, %v193_v40 }
  0xee   :  { %v200_v43 = vmul.f32 %v198_v42, %v192_v38 }
  0xef   :  { %v201_v3 = vmul.f32 %v199_v0, %v193_v40 }
  0xf0   :  { %v202_v44 = vadd.f32 %v200_v43, %v192_v38 }
  0xf1   :  { %v203_v4 = vadd.f32 %v201_v3, %v193_v40 }
  0xf2   :  { %v204_v45 = vmul.f32 0.7978846, %v202_v44 }
  0xf3   :  { %v205_v5 = vmul.f32 0.7978846, %v203_v4 }
  0xf4   :  { %435 = vtanh.f32 %v204_v45 }
  0xfe   :  { %v436_v46 = vpop.eup %435 }
  0xff   :  { %v208_v48 = vadd.f32 1.0, %v436_v46 }
 0x101   :  { %v210_v49 = vmul.f32 %v208_v48, %v194_v47 }
 0x103   :  { %v218_v50 = vpack.c.bf16 %v210_v49, %v210_v49 }
 0x105   :  { %406 = vmatmul.mubr.bf16.vlgmr.msra.gmra.mrb[0].mxu0 %v218_v50 }
 0x1d8   :  { %v301_v52 = vpop.f32.mrb[0].mxu0 }
 0x1d9   :  { %v302_v53 = vadd.f32 %v301_v52, %v45_v51  ;;  %v407_v54 = vpop.f32.mrb[1].mxu0 }
 0x1da   :  { %v304_v55 = vpop.f32.mrb[2].mxu0 }
 0x1db   :  { %v379_v56 = vmul.f32 -1.442695, %v302_v53  ;;  %325 = vrot.lane.b32.xlu0 %v302_v53, %s449_s27  ;;  %v408_v57 = vpop.f32.mrb[3].mxu0 }
 0x1dd   :  { %437 = vpow2.f32 %v379_v56 }
 0x1e7   :  { %v438_v58 = vpop.eup %437 }
 0x1e8   :  { %v310_v59 = vadd.f32 1.0, %v438_v58 }
 0x1ea   :  { %439 = vrcp.f32 %v310_v59 }
 0x1eb   :  { %441 = vtanh.f32 %v205_v5 }
 0x1f4   :  { %v440_v61 = vpop.eup %439 }
 0x1f5   :  { %v318_v62 = vmul.f32 %v440_v61, %v316_v60  ;;  %v442_v6 = vpop.eup %441  ;;  %v313_v15 = vmul.f32 %v440_v61, %v506_v11 }
 0x1f6   :  { %v209_v7 = vadd.f32 1.0, %v442_v6 }
 0x1f7   :  { %320 = vrot.lane.b32.xlu1 %v318_v62, %s449_s27 }
 0x1f8   :  { %v211_v9 = vmul.f32 %v209_v7, %v195_v8 }
 0x1fa   :  { %v212_v12 = vmul.f32 %v211_v9, %v46_v10 }
 0x1fc   :  { %v214_v13 = vsel %vm213_vm2, %v212_v12, 0.0 }
 0x24d   :  { %v326_v1 = vpop.permute.xlu0 %325 }
 0x24e   :  { %v328_v2 = vmul.f32 %v440_v61, %v326_v1 }
 0x250   :  { %330 = vrot.lane.b32.xlu1 %v328_v2, %s450_s28 }
 0x269   :  { %v321_v14 = vpop.permute.xlu1 %320 }
 0x26a   :  { %v323_v16 = vadd.f32 %v321_v14, %v313_v15 }
 0x274   :  { %215 = vadd.xlane.f32.xlu1 %v214_v13 }
 0x2c2   :  { %v331_v17 = vpop.permute.xlu1 %330 }
 0x2c3   :  { %v333_v18 = vadd.f32 %v331_v17, %v323_v16 }
 0x2c5   :  { %v334_v19 = vsel %vm213_vm2, %v333_v18, 0.0 }
 0x2c6   :  { %335 = vadd.xlane.f32.xlu0 %v334_v19 }
 0x301   :  { %v216_v26 = vpop.xlane.xlu1 %215 }
 0x302   :  { %v217_v27 = vadd.f32 %v216_v26, %v49_v25 }
 0x353   :  { %v336_v20 = vpop.xlane.xlu0 %335 }
 0x354   :  { %v338_v21 = vmul.f32 0.03125, %v336_v20 }
 0x356   :  { %v339_v22 = vsub.f32 %v333_v18, %v338_v21 }
 0x358   :  { %v340_v23 = vmul.f32 %v339_v22, %v339_v22 }
 0x35a   :  { %v341_v24 = vsel %vm213_vm2, %v340_v23, 0.0 }
 0x35b   :  { %342 = vadd.xlane.f32.xlu0 %v341_v24 }
 0x371   :  { %352 = vrot.lane.b32.xlu0 %v217_v27, %s448_s25 }
 0x3e8   :  { %v343_v11 = vpop.xlane.xlu0 %342 }
 0x3e9   :  { %v344_v28 = vmul.f32 0.03125, %v343_v11 }
 0x3eb   :  { %v345_v29 = vadd.f32 1e-05, %v344_v28 }
 0x3ec   :  { %v353_v36 = vpop.permute.xlu0 %352 }
 0x3ed   :  { %443 = vrsqrt.f32 %v345_v29 }
 0x3f7   :  { %v444_v30 = vpop.eup %443 }
 0x3f8   :  { %v347_v32 = vmul.f32 %v444_v30, %v339_v22 }
 0x3fa   :  { %v348_v34 = vmul.f32 %v347_v32, %v47_v31 }
 0x3fc   :  { %v349_v35 = vadd.f32 %v348_v34, %v48_v33 }
 0x3fe   :  { %350 = vst.msk [vmem:[%s569_s4] sm:$0xf] %vm213_vm2, %v349_v35 }
 0x3ff   :  { %356 = vst.msk [vmem:[%s569_s4] sm:$0xf] %vm355_vm3, %v353_v36 }

</bundles_post_ra>
